<compile_context>
chip_gen: v7x
topology: tpu7x:2x2x1
jax: 0.10.0
libtpu: 0.0.40
codegen_flags: <defaults>
</compile_context>

<pallas_src>
import functools

import jax
import jax.numpy as jnp
from jax.experimental import pallas as pl
from jax.experimental.pallas import tpu as pltpu

KH = KW = 3
CIN = 3
COUT = 64
ROWS_PER_CHUNK = 8            # output rows per dot/store chunk (= f32 sublane tile)
OUT_TILE_BUDGET = 4 << 20     # target bytes for one f32 output tile (x2 buffers)


def _round_up(a, b):
    return (a + b - 1) // b * b


def _conv_kernel(x_ref, w_ref, b_ref, o_ref, *, th, w_out):
    """One (batch, row-tile) grid step.

    x_ref: (1, CIN, h_pad, w)    bf16 — whole image (W in lanes), resident
                                        across the row-tile grid axis.
    w_ref: (COUT, 27)            bf16 — resident; column order (ci, kw, kh).
    b_ref: (COUT, 1)             f32  — resident.
    o_ref: (1, COUT, th, w_out)  f32  — NCHW output tile (Cout in sublane-
                                        planes, W in lanes).
    """
    R = ROWS_PER_CHUNK
    row0 = pl.program_id(1) * th                 # first output row of this tile
    w2d = w_ref[...]                             # (COUT, 27) bf16, hoisted
    # Hoisted bias broadcast (JAX does not CSE broadcast_in_dim).
    bias = jnp.broadcast_to(b_ref[...], (COUT, w_out)).astype(jnp.float32)

    def chunk_body(c, carry):
        start = pl.multiple_of(row0 + c * R, R)
        # (CIN, R+2, w) input window including the 2-row halo.
        win = x_ref[0, :, pl.ds(start, R + KH - 1), :]
        # Three statically kw-shifted copies, each (CIN, R+2, w_out):
        #   sh[kw][ci, a, col] = x[ci, start + a, col + kw]
        sh = [win[:, :, kw:kw + w_out] for kw in range(KW)]

        rows_out = []
        for r in range(R):                       # static unroll over the chunk
            taps = []
            for ci in range(CIN):
                for kw in range(KW):
                    taps.append(sh[kw][ci, r:r + KH, :])       # (KH, w_out)
            # (27, w_out) patch matrix, row order (ci, kw, kh) — matches w2d.
            rhs = jnp.concatenate(taps, axis=0)
            acc = jnp.dot(w2d, rhs,
                          preferred_element_type=jnp.float32)  # (COUT, w_out)
            rows_out.append((acc + bias)[:, None, :])           # (COUT,1,w_out)

        # Assemble the 8 rows in VMEM and store one aligned (COUT, R, w_out)
        # block (no per-row masked HBM scatter).
        chunk = jnp.concatenate(rows_out, axis=1)                # (COUT,R,w_out)
        off = pl.multiple_of(c * R, R)
        o_ref[0, :, pl.ds(off, R), :] = chunk
        return carry

    jax.lax.fori_loop(0, th // R, chunk_body, 0)


@jax.jit
def gration_forward(x, weight, bias):
    """Conv2d(3, 64, 3) forward.

    x:      (N, 3, H, W)  f32, NCHW (PyTorch layout)
    weight: (64, 3, 3, 3) f32, (Cout, Cin, KH, KW) (PyTorch layout)
    bias:   (64,)         f32
    returns (N, 64, H-2, W-2) f32, NCHW
    """
    n, cin, h, w = x.shape
    assert cin == CIN, f"expected {CIN} input channels, got {cin}"
    assert h >= KH and w >= KW
    h_out, w_out = h - KH + 1, w - KW + 1
    R = ROWS_PER_CHUNK

    # Row-tile size: multiple of R, capped by the VMEM budget of the f32
    # output tile, and shrunk if needed so the grid has >= 2 parallel tiles
    # (v7x has 2 TensorCores).
    th = min(64, _round_up(h_out, R))
    vmem_rows = max(R, (OUT_TILE_BUDGET // (COUT * w_out * 4)) // R * R)
    th = min(th, vmem_rows)
    if n * pl.cdiv(h_out, th) < 2 and h_out > R:
        th = _round_up(pl.cdiv(h_out, 2), R)
    n_h = pl.cdiv(h_out, th)
    h_pad = n_h * th + (KH - 1)       # cover the last tile's rows + halo reads

    # Prologue (all on the ~40x-smaller input side): pad rows, cast the MXU
    # operand to bf16.  Input stays NCHW with W as the minor (lane) dim.
    x_p = x
    if h_pad > h:
        x_p = jnp.pad(x_p, ((0, 0), (0, 0), (0, h_pad - h), (0, 0)))
    x_p = x_p.astype(jnp.bfloat16)

    # (Cout, Cin, KH, KW) -> (Cout, Cin, KW, KH) -> (Cout, 27).  Column order
    # (ci, kw, kh) matches the kernel's tap concatenation order.
    w2d = jnp.transpose(weight, (0, 1, 3, 2)).reshape(COUT, CIN * KH * KW)
    w2d = w2d.astype(jnp.bfloat16)
    b2d = bias.reshape(COUT, 1).astype(jnp.float32)

    kernel = functools.partial(_conv_kernel, th=th, w_out=w_out)

    x_blk_bytes = CIN * h_pad * w * 2
    o_blk_bytes = COUT * th * w_out * 4
    vmem_limit = int(min(max(2 * (x_blk_bytes + o_blk_bytes) + (4 << 20),
                             32 << 20), 100 << 20))

    cost = pl.CostEstimate(
        flops=2 * n * h_out * w_out * COUT * CIN * KH * KW,
        transcendentals=0,
        bytes_accessed=(n * x_blk_bytes + w2d.size * 2 + b2d.size * 4
                        + n * COUT * h_out * w_out * 4),
    )

    return pl.pallas_call(
        kernel,
        out_shape=jax.ShapeDtypeStruct((n, COUT, h_out, w_out), jnp.float32),
        grid=(n, n_h),
        in_specs=[
            # Whole (row-padded) compact image; constant over the row-tile
            # axis -> DMA'd once per batch element, halo rows read as in-VMEM
            # slices.
            pl.BlockSpec((1, CIN, h_pad, w), lambda i, j: (i, 0, 0, 0)),
            # Tiny weight / bias: constant index_map -> resident all grid long.
            pl.BlockSpec((COUT, CIN * KH * KW), lambda i, j: (0, 0)),
            pl.BlockSpec((COUT, 1), lambda i, j: (0, 0)),
        ],
        out_specs=pl.BlockSpec((1, COUT, th, w_out),
                               lambda i, j: (i, 0, j, 0)),
        compiler_params=pltpu.CompilerParams(
            dimension_semantics=("parallel", "parallel"),
            vmem_limit_bytes=vmem_limit),
        cost_estimate=cost,
    )(x_p, w2d, b2d)


if __name__ == "__main__":
    key = jax.random.PRNGKey(0)
    kx, kw_key, kb_key = jax.random.split(key, 3)

    # Small deterministic example consistent with the module: N=2, Cin=3, 16x16.
    x = jax.random.normal(kx, (2, CIN, 16, 16), dtype=jnp.float32)
    # PyTorch Conv2d default init: U(-1/sqrt(fan_in), 1/sqrt(fan_in)), fan_in=27.
    bound = 1.0 / (CIN * KH * KW) ** 0.5
    weight = jax.random.uniform(kw_key, (COUT, CIN, KH, KW), jnp.float32,
                                -bound, bound)
    bias = jax.random.uniform(kb_key, (COUT,), jnp.float32, -bound, bound)

    out = jax.block_until_ready(gration_forward(x, weight, bias))

    # Sanity check against XLA's conv (loose tol: kernel MXU operands are bf16).
    ref = jax.lax.conv_general_dilated(
        x, weight, window_strides=(1, 1), padding="VALID",
        dimension_numbers=("NCHW", "OIHW", "NCHW"))
    ref = ref + bias[None, :, None, None]
    assert out.shape == ref.shape, (out.shape, ref.shape)
    max_err = float(jnp.max(jnp.abs(out - ref)))
    assert bool(jnp.allclose(out, ref, rtol=2e-2, atol=2e-2)), max_err

    print("KERNEL_OK")
</pallas_src>

<mosaic_0001>
module attributes {stable_mosaic.version = 11 : i64} {
  func.func @_conv_kernel(%arg0: i32, %arg1: i32, %arg2: memref<1x3x18x16xbf16, #tpu.memory_space<vmem>>, %arg3: memref<64x27xbf16, #tpu.memory_space<vmem>>, %arg4: memref<64x1xf32, #tpu.memory_space<vmem>>, %arg5: memref<1x64x16x14xf32, #tpu.memory_space<vmem>>) attributes {dimension_semantics = [#tpu.dimension_semantics<parallel>, #tpu.dimension_semantics<parallel>], iteration_bounds = array<i64: 2, 1>, scalar_prefetch = 0 : i64, scratch_operands = 0 : i64, tpu.core_type = #tpu.core_type<tc>, window_params = [{transform_indices = @transform_0, window_bounds = array<i64: 1, 3, 18, 16>}, {pipeline_mode = #tpu.pipeline_mode<synchronous>, transform_indices = @transform_1, window_bounds = array<i64: 64, 27>}, {pipeline_mode = #tpu.pipeline_mode<synchronous>, transform_indices = @transform_2, window_bounds = array<i64: 64, 1>}, {transform_indices = @transform_3, window_bounds = array<i64: 1, 64, 16, 14>}]} {
    %c16_i32 = arith.constant 16 : i32
    %0 = arith.muli %arg1, %c16_i32 : i32
    %c0 = arith.constant 0 : index
    %c0_0 = arith.constant 0 : index
    %1 = vector.load %arg3[%c0, %c0_0] : memref<64x27xbf16, #tpu.memory_space<vmem>>, vector<64x27xbf16>
    %c0_1 = arith.constant 0 : index
    %c0_2 = arith.constant 0 : index
    %2 = vector.load %arg4[%c0_1, %c0_2] : memref<64x1xf32, #tpu.memory_space<vmem>>, vector<64x1xf32>
    %3 = vector.shape_cast %2 : vector<64x1xf32> to vector<64x1xf32>
    %4 = vector.broadcast %3 : vector<64x1xf32> to vector<64x14xf32>
    %c0_i32 = arith.constant 0 : i32
    %c2_i32 = arith.constant 2 : i32
    %5 = arith.addi %c0_i32, %c2_i32 : i32
    %c1_i32 = arith.constant 1 : i32
    scf.for %arg6 = %c0_i32 to %5 step %c1_i32  : i32 {
      %c8_i32 = arith.constant 8 : i32
      %6 = arith.muli %arg6, %c8_i32 : i32
      %7 = arith.addi %0, %6 : i32
      %8 = tpu.assume_multiple %7, 8 : i32
      %c0_4 = arith.constant 0 : index
      %c0_5 = arith.constant 0 : index
      %9 = arith.index_cast %8 : i32 to index
      %c0_6 = arith.constant 0 : index
      %10 = vector.load %arg2[%c0_4, %c0_5, %9, %c0_6] : memref<1x3x18x16xbf16, #tpu.memory_space<vmem>>, vector<1x3x10x16xbf16>
      %11 = vector.shape_cast %10 : vector<1x3x10x16xbf16> to vector<3x10x16xbf16>
      %12 = vector.extract_strided_slice %11 {offsets = [0, 0, 0], sizes = [3, 10, 14], strides = [1, 1, 1]} : vector<3x10x16xbf16> to vector<3x10x14xbf16>
      %13 = vector.extract_strided_slice %11 {offsets = [0, 0, 1], sizes = [3, 10, 14], strides = [1, 1, 1]} : vector<3x10x16xbf16> to vector<3x10x14xbf16>
      %14 = vector.extract_strided_slice %11 {offsets = [0, 0, 2], sizes = [3, 10, 14], strides = [1, 1, 1]} : vector<3x10x16xbf16> to vector<3x10x14xbf16>
      %15 = vector.extract_strided_slice %12 {offsets = [0, 0, 0], sizes = [1, 3, 14], strides = [1, 1, 1]} : vector<3x10x14xbf16> to vector<1x3x14xbf16>
      %16 = vector.shape_cast %15 : vector<1x3x14xbf16> to vector<3x14xbf16>
      %17 = vector.extract_strided_slice %13 {offsets = [0, 0, 0], sizes = [1, 3, 14], strides = [1, 1, 1]} : vector<3x10x14xbf16> to vector<1x3x14xbf16>
      %18 = vector.shape_cast %17 : vector<1x3x14xbf16> to vector<3x14xbf16>
      %19 = vector.extract_strided_slice %14 {offsets = [0, 0, 0], sizes = [1, 3, 14], strides = [1, 1, 1]} : vector<3x10x14xbf16> to vector<1x3x14xbf16>
      %20 = vector.shape_cast %19 : vector<1x3x14xbf16> to vector<3x14xbf16>
      %21 = vector.extract_strided_slice %12 {offsets = [1, 0, 0], sizes = [1, 3, 14], strides = [1, 1, 1]} : vector<3x10x14xbf16> to vector<1x3x14xbf16>
      %22 = vector.shape_cast %21 : vector<1x3x14xbf16> to vector<3x14xbf16>
      %23 = vector.extract_strided_slice %13 {offsets = [1, 0, 0], sizes = [1, 3, 14], strides = [1, 1, 1]} : vector<3x10x14xbf16> to vector<1x3x14xbf16>
      %24 = vector.shape_cast %23 : vector<1x3x14xbf16> to vector<3x14xbf16>
      %25 = vector.extract_strided_slice %14 {offsets = [1, 0, 0], sizes = [1, 3, 14], strides = [1, 1, 1]} : vector<3x10x14xbf16> to vector<1x3x14xbf16>
      %26 = vector.shape_cast %25 : vector<1x3x14xbf16> to vector<3x14xbf16>
      %27 = vector.extract_strided_slice %12 {offsets = [2, 0, 0], sizes = [1, 3, 14], strides = [1, 1, 1]} : vector<3x10x14xbf16> to vector<1x3x14xbf16>
      %28 = vector.shape_cast %27 : vector<1x3x14xbf16> to vector<3x14xbf16>
      %29 = vector.extract_strided_slice %13 {offsets = [2, 0, 0], sizes = [1, 3, 14], strides = [1, 1, 1]} : vector<3x10x14xbf16> to vector<1x3x14xbf16>
      %30 = vector.shape_cast %29 : vector<1x3x14xbf16> to vector<3x14xbf16>
      %31 = vector.extract_strided_slice %14 {offsets = [2, 0, 0], sizes = [1, 3, 14], strides = [1, 1, 1]} : vector<3x10x14xbf16> to vector<1x3x14xbf16>
      %32 = vector.shape_cast %31 : vector<1x3x14xbf16> to vector<3x14xbf16>
      %33 = tpu.concatenate %16, %18, %20, %22, %24, %26, %28, %30, %32 in 0 : vector<3x14xbf16>, vector<3x14xbf16>, vector<3x14xbf16>, vector<3x14xbf16>, vector<3x14xbf16>, vector<3x14xbf16>, vector<3x14xbf16>, vector<3x14xbf16>, vector<3x14xbf16> -> vector<27x14xbf16>
      %cst = arith.constant dense<0.000000e+00> : vector<64x14xf32>
      %34 = tpu.matmul %1, %33, %cst {dimension_numbers = #tpu.dot_dimension_numbers<[1], [0], [0], [1], [0, 0, 1, 1], [], []>} : vector<64x27xbf16>, vector<27x14xbf16>, vector<64x14xf32> -> vector<64x14xf32>
      %35 = arith.addf %34, %4 : vector<64x14xf32>
      %36 = vector.shape_cast %35 : vector<64x14xf32> to vector<64x1x14xf32>
      %37 = vector.extract_strided_slice %12 {offsets = [0, 1, 0], sizes = [1, 3, 14], strides = [1, 1, 1]} : vector<3x10x14xbf16> to vector<1x3x14xbf16>
      %38 = vector.shape_cast %37 : vector<1x3x14xbf16> to vector<3x14xbf16>
      %39 = vector.extract_strided_slice %13 {offsets = [0, 1, 0], sizes = [1, 3, 14], strides = [1, 1, 1]} : vector<3x10x14xbf16> to vector<1x3x14xbf16>
      %40 = vector.shape_cast %39 : vector<1x3x14xbf16> to vector<3x14xbf16>
      %41 = vector.extract_strided_slice %14 {offsets = [0, 1, 0], sizes = [1, 3, 14], strides = [1, 1, 1]} : vector<3x10x14xbf16> to vector<1x3x14xbf16>
      %42 = vector.shape_cast %41 : vector<1x3x14xbf16> to vector<3x14xbf16>
      %43 = vector.extract_strided_slice %12 {offsets = [1, 1, 0], sizes = [1, 3, 14], strides = [1, 1, 1]} : vector<3x10x14xbf16> to vector<1x3x14xbf16>
      %44 = vector.shape_cast %43 : vector<1x3x14xbf16> to vector<3x14xbf16>
      %45 = vector.extract_strided_slice %13 {offsets = [1, 1, 0], sizes = [1, 3, 14], strides = [1, 1, 1]} : vector<3x10x14xbf16> to vector<1x3x14xbf16>
      %46 = vector.shape_cast %45 : vector<1x3x14xbf16> to vector<3x14xbf16>
      %47 = vector.extract_strided_slice %14 {offsets = [1, 1, 0], sizes = [1, 3, 14], strides = [1, 1, 1]} : vector<3x10x14xbf16> to vector<1x3x14xbf16>
      %48 = vector.shape_cast %47 : vector<1x3x14xbf16> to vector<3x14xbf16>
      %49 = vector.extract_strided_slice %12 {offsets = [2, 1, 0], sizes = [1, 3, 14], strides = [1, 1, 1]} : vector<3x10x14xbf16> to vector<1x3x14xbf16>
      %50 = vector.shape_cast %49 : vector<1x3x14xbf16> to vector<3x14xbf16>
      %51 = vector.extract_strided_slice %13 {offsets = [2, 1, 0], sizes = [1, 3, 14], strides = [1, 1, 1]} : vector<3x10x14xbf16> to vector<1x3x14xbf16>
      %52 = vector.shape_cast %51 : vector<1x3x14xbf16> to vector<3x14xbf16>
      %53 = vector.extract_strided_slice %14 {offsets = [2, 1, 0], sizes = [1, 3, 14], strides = [1, 1, 1]} : vector<3x10x14xbf16> to vector<1x3x14xbf16>
      %54 = vector.shape_cast %53 : vector<1x3x14xbf16> to vector<3x14xbf16>
      %55 = tpu.concatenate %38, %40, %42, %44, %46, %48, %50, %52, %54 in 0 : vector<3x14xbf16>, vector<3x14xbf16>, vector<3x14xbf16>, vector<3x14xbf16>, vector<3x14xbf16>, vector<3x14xbf16>, vector<3x14xbf16>, vector<3x14xbf16>, vector<3x14xbf16> -> vector<27x14xbf16>
      %cst_7 = arith.constant dense<0.000000e+00> : vector<64x14xf32>
      %56 = tpu.matmul %1, %55, %cst_7 {dimension_numbers = #tpu.dot_dimension_numbers<[1], [0], [0], [1], [0, 0, 1, 1], [], []>} : vector<64x27xbf16>, vector<27x14xbf16>, vector<64x14xf32> -> vector<64x14xf32>
      %57 = arith.addf %56, %4 : vector<64x14xf32>
      %58 = vector.shape_cast %57 : vector<64x14xf32> to vector<64x1x14xf32>
      %59 = vector.extract_strided_slice %12 {offsets = [0, 2, 0], sizes = [1, 3, 14], strides = [1, 1, 1]} : vector<3x10x14xbf16> to vector<1x3x14xbf16>
      %60 = vector.shape_cast %59 : vector<1x3x14xbf16> to vector<3x14xbf16>
      %61 = vector.extract_strided_slice %13 {offsets = [0, 2, 0], sizes = [1, 3, 14], strides = [1, 1, 1]} : vector<3x10x14xbf16> to vector<1x3x14xbf16>
      %62 = vector.shape_cast %61 : vector<1x3x14xbf16> to vector<3x14xbf16>
      %63 = vector.extract_strided_slice %14 {offsets = [0, 2, 0], sizes = [1, 3, 14], strides = [1, 1, 1]} : vector<3x10x14xbf16> to vector<1x3x14xbf16>
      %64 = vector.shape_cast %63 : vector<1x3x14xbf16> to vector<3x14xbf16>
      %65 = vector.extract_strided_slice %12 {offsets = [1, 2, 0], sizes = [1, 3, 14], strides = [1, 1, 1]} : vector<3x10x14xbf16> to vector<1x3x14xbf16>
      %66 = vector.shape_cast %65 : vector<1x3x14xbf16> to vector<3x14xbf16>
      %67 = vector.extract_strided_slice %13 {offsets = [1, 2, 0], sizes = [1, 3, 14], strides = [1, 1, 1]} : vector<3x10x14xbf16> to vector<1x3x14xbf16>
      %68 = vector.shape_cast %67 : vector<1x3x14xbf16> to vector<3x14xbf16>
      %69 = vector.extract_strided_slice %14 {offsets = [1, 2, 0], sizes = [1, 3, 14], strides = [1, 1, 1]} : vector<3x10x14xbf16> to vector<1x3x14xbf16>
      %70 = vector.shape_cast %69 : vector<1x3x14xbf16> to vector<3x14xbf16>
      %71 = vector.extract_strided_slice %12 {offsets = [2, 2, 0], sizes = [1, 3, 14], strides = [1, 1, 1]} : vector<3x10x14xbf16> to vector<1x3x14xbf16>
      %72 = vector.shape_cast %71 : vector<1x3x14xbf16> to vector<3x14xbf16>
      %73 = vector.extract_strided_slice %13 {offsets = [2, 2, 0], sizes = [1, 3, 14], strides = [1, 1, 1]} : vector<3x10x14xbf16> to vector<1x3x14xbf16>
      %74 = vector.shape_cast %73 : vector<1x3x14xbf16> to vector<3x14xbf16>
      %75 = vector.extract_strided_slice %14 {offsets = [2, 2, 0], sizes = [1, 3, 14], strides = [1, 1, 1]} : vector<3x10x14xbf16> to vector<1x3x14xbf16>
      %76 = vector.shape_cast %75 : vector<1x3x14xbf16> to vector<3x14xbf16>
      %77 = tpu.concatenate %60, %62, %64, %66, %68, %70, %72, %74, %76 in 0 : vector<3x14xbf16>, vector<3x14xbf16>, vector<3x14xbf16>, vector<3x14xbf16>, vector<3x14xbf16>, vector<3x14xbf16>, vector<3x14xbf16>, vector<3x14xbf16>, vector<3x14xbf16> -> vector<27x14xbf16>
      %cst_8 = arith.constant dense<0.000000e+00> : vector<64x14xf32>
      %78 = tpu.matmul %1, %77, %cst_8 {dimension_numbers = #tpu.dot_dimension_numbers<[1], [0], [0], [1], [0, 0, 1, 1], [], []>} : vector<64x27xbf16>, vector<27x14xbf16>, vector<64x14xf32> -> vector<64x14xf32>
      %79 = arith.addf %78, %4 : vector<64x14xf32>
      %80 = vector.shape_cast %79 : vector<64x14xf32> to vector<64x1x14xf32>
      %81 = vector.extract_strided_slice %12 {offsets = [0, 3, 0], sizes = [1, 3, 14], strides = [1, 1, 1]} : vector<3x10x14xbf16> to vector<1x3x14xbf16>
      %82 = vector.shape_cast %81 : vector<1x3x14xbf16> to vector<3x14xbf16>
      %83 = vector.extract_strided_slice %13 {offsets = [0, 3, 0], sizes = [1, 3, 14], strides = [1, 1, 1]} : vector<3x10x14xbf16> to vector<1x3x14xbf16>
      %84 = vector.shape_cast %83 : vector<1x3x14xbf16> to vector<3x14xbf16>
      %85 = vector.extract_strided_slice %14 {offsets = [0, 3, 0], sizes = [1, 3, 14], strides = [1, 1, 1]} : vector<3x10x14xbf16> to vector<1x3x14xbf16>
      %86 = vector.shape_cast %85 : vector<1x3x14xbf16> to vector<3x14xbf16>
      %87 = vector.extract_strided_slice %12 {offsets = [1, 3, 0], sizes = [1, 3, 14], strides = [1, 1, 1]} : vector<3x10x14xbf16> to vector<1x3x14xbf16>
      %88 = vector.shape_cast %87 : vector<1x3x14xbf16> to vector<3x14xbf16>
      %89 = vector.extract_strided_slice %13 {offsets = [1, 3, 0], sizes = [1, 3, 14], strides = [1, 1, 1]} : vector<3x10x14xbf16> to vector<1x3x14xbf16>
      %90 = vector.shape_cast %89 : vector<1x3x14xbf16> to vector<3x14xbf16>
      %91 = vector.extract_strided_slice %14 {offsets = [1, 3, 0], sizes = [1, 3, 14], strides = [1, 1, 1]} : vector<3x10x14xbf16> to vector<1x3x14xbf16>
      %92 = vector.shape_cast %91 : vector<1x3x14xbf16> to vector<3x14xbf16>
      %93 = vector.extract_strided_slice %12 {offsets = [2, 3, 0], sizes = [1, 3, 14], strides = [1, 1, 1]} : vector<3x10x14xbf16> to vector<1x3x14xbf16>
      %94 = vector.shape_cast %93 : vector<1x3x14xbf16> to vector<3x14xbf16>
      %95 = vector.extract_strided_slice %13 {offsets = [2, 3, 0], sizes = [1, 3, 14], strides = [1, 1, 1]} : vector<3x10x14xbf16> to vector<1x3x14xbf16>
      %96 = vector.shape_cast %95 : vector<1x3x14xbf16> to vector<3x14xbf16>
      %97 = vector.extract_strided_slice %14 {offsets = [2, 3, 0], sizes = [1, 3, 14], strides = [1, 1, 1]} : vector<3x10x14xbf16> to vector<1x3x14xbf16>
      %98 = vector.shape_cast %97 : vector<1x3x14xbf16> to vector<3x14xbf16>
      %99 = tpu.concatenate %82, %84, %86, %88, %90, %92, %94, %96, %98 in 0 : vector<3x14xbf16>, vector<3x14xbf16>, vector<3x14xbf16>, vector<3x14xbf16>, vector<3x14xbf16>, vector<3x14xbf16>, vector<3x14xbf16>, vector<3x14xbf16>, vector<3x14xbf16> -> vector<27x14xbf16>
      %cst_9 = arith.constant dense<0.000000e+00> : vector<64x14xf32>
      %100 = tpu.matmul %1, %99, %cst_9 {dimension_numbers = #tpu.dot_dimension_numbers<[1], [0], [0], [1], [0, 0, 1, 1], [], []>} : vector<64x27xbf16>, vector<27x14xbf16>, vector<64x14xf32> -> vector<64x14xf32>
      %101 = arith.addf %100, %4 : vector<64x14xf32>
      %102 = vector.shape_cast %101 : vector<64x14xf32> to vector<64x1x14xf32>
      %103 = vector.extract_strided_slice %12 {offsets = [0, 4, 0], sizes = [1, 3, 14], strides = [1, 1, 1]} : vector<3x10x14xbf16> to vector<1x3x14xbf16>
      %104 = vector.shape_cast %103 : vector<1x3x14xbf16> to vector<3x14xbf16>
      %105 = vector.extract_strided_slice %13 {offsets = [0, 4, 0], sizes = [1, 3, 14], strides = [1, 1, 1]} : vector<3x10x14xbf16> to vector<1x3x14xbf16>
      %106 = vector.shape_cast %105 : vector<1x3x14xbf16> to vector<3x14xbf16>
      %107 = vector.extract_strided_slice %14 {offsets = [0, 4, 0], sizes = [1, 3, 14], strides = [1, 1, 1]} : vector<3x10x14xbf16> to vector<1x3x14xbf16>
      %108 = vector.shape_cast %107 : vector<1x3x14xbf16> to vector<3x14xbf16>
      %109 = vector.extract_strided_slice %12 {offsets = [1, 4, 0], sizes = [1, 3, 14], strides = [1, 1, 1]} : vector<3x10x14xbf16> to vector<1x3x14xbf16>
      %110 = vector.shape_cast %109 : vector<1x3x14xbf16> to vector<3x14xbf16>
      %111 = vector.extract_strided_slice %13 {offsets = [1, 4, 0], sizes = [1, 3, 14], strides = [1, 1, 1]} : vector<3x10x14xbf16> to vector<1x3x14xbf16>
      %112 = vector.shape_cast %111 : vector<1x3x14xbf16> to vector<3x14xbf16>
      %113 = vector.extract_strided_slice %14 {offsets = [1, 4, 0], sizes = [1, 3, 14], strides = [1, 1, 1]} : vector<3x10x14xbf16> to vector<1x3x14xbf16>
      %114 = vector.shape_cast %113 : vector<1x3x14xbf16> to vector<3x14xbf16>
      %115 = vector.extract_strided_slice %12 {offsets = [2, 4, 0], sizes = [1, 3, 14], strides = [1, 1, 1]} : vector<3x10x14xbf16> to vector<1x3x14xbf16>
      %116 = vector.shape_cast %115 : vector<1x3x14xbf16> to vector<3x14xbf16>
      %117 = vector.extract_strided_slice %13 {offsets = [2, 4, 0], sizes = [1, 3, 14], strides = [1, 1, 1]} : vector<3x10x14xbf16> to vector<1x3x14xbf16>
      %118 = vector.shape_cast %117 : vector<1x3x14xbf16> to vector<3x14xbf16>
      %119 = vector.extract_strided_slice %14 {offsets = [2, 4, 0], sizes = [1, 3, 14], strides = [1, 1, 1]} : vector<3x10x14xbf16> to vector<1x3x14xbf16>
      %120 = vector.shape_cast %119 : vector<1x3x14xbf16> to vector<3x14xbf16>
      %121 = tpu.concatenate %104, %106, %108, %110, %112, %114, %116, %118, %120 in 0 : vector<3x14xbf16>, vector<3x14xbf16>, vector<3x14xbf16>, vector<3x14xbf16>, vector<3x14xbf16>, vector<3x14xbf16>, vector<3x14xbf16>, vector<3x14xbf16>, vector<3x14xbf16> -> vector<27x14xbf16>
      %cst_10 = arith.constant dense<0.000000e+00> : vector<64x14xf32>
      %122 = tpu.matmul %1, %121, %cst_10 {dimension_numbers = #tpu.dot_dimension_numbers<[1], [0], [0], [1], [0, 0, 1, 1], [], []>} : vector<64x27xbf16>, vector<27x14xbf16>, vector<64x14xf32> -> vector<64x14xf32>
      %123 = arith.addf %122, %4 : vector<64x14xf32>
      %124 = vector.shape_cast %123 : vector<64x14xf32> to vector<64x1x14xf32>
      %125 = vector.extract_strided_slice %12 {offsets = [0, 5, 0], sizes = [1, 3, 14], strides = [1, 1, 1]} : vector<3x10x14xbf16> to vector<1x3x14xbf16>
      %126 = vector.shape_cast %125 : vector<1x3x14xbf16> to vector<3x14xbf16>
      %127 = vector.extract_strided_slice %13 {offsets = [0, 5, 0], sizes = [1, 3, 14], strides = [1, 1, 1]} : vector<3x10x14xbf16> to vector<1x3x14xbf16>
      %128 = vector.shape_cast %127 : vector<1x3x14xbf16> to vector<3x14xbf16>
      %129 = vector.extract_strided_slice %14 {offsets = [0, 5, 0], sizes = [1, 3, 14], strides = [1, 1, 1]} : vector<3x10x14xbf16> to vector<1x3x14xbf16>
      %130 = vector.shape_cast %129 : vector<1x3x14xbf16> to vector<3x14xbf16>
      %131 = vector.extract_strided_slice %12 {offsets = [1, 5, 0], sizes = [1, 3, 14], strides = [1, 1, 1]} : vector<3x10x14xbf16> to vector<1x3x14xbf16>
      %132 = vector.shape_cast %131 : vector<1x3x14xbf16> to vector<3x14xbf16>
      %133 = vector.extract_strided_slice %13 {offsets = [1, 5, 0], sizes = [1, 3, 14], strides = [1, 1, 1]} : vector<3x10x14xbf16> to vector<1x3x14xbf16>
      %134 = vector.shape_cast %133 : vector<1x3x14xbf16> to vector<3x14xbf16>
      %135 = vector.extract_strided_slice %14 {offsets = [1, 5, 0], sizes = [1, 3, 14], strides = [1, 1, 1]} : vector<3x10x14xbf16> to vector<1x3x14xbf16>
      %136 = vector.shape_cast %135 : vector<1x3x14xbf16> to vector<3x14xbf16>
      %137 = vector.extract_strided_slice %12 {offsets = [2, 5, 0], sizes = [1, 3, 14], strides = [1, 1, 1]} : vector<3x10x14xbf16> to vector<1x3x14xbf16>
      %138 = vector.shape_cast %137 : vector<1x3x14xbf16> to vector<3x14xbf16>
      %139 = vector.extract_strided_slice %13 {offsets = [2, 5, 0], sizes = [1, 3, 14], strides = [1, 1, 1]} : vector<3x10x14xbf16> to vector<1x3x14xbf16>
      %140 = vector.shape_cast %139 : vector<1x3x14xbf16> to vector<3x14xbf16>
      %141 = vector.extract_strided_slice %14 {offsets = [2, 5, 0], sizes = [1, 3, 14], strides = [1, 1, 1]} : vector<3x10x14xbf16> to vector<1x3x14xbf16>
      %142 = vector.shape_cast %141 : vector<1x3x14xbf16> to vector<3x14xbf16>
      %143 = tpu.concatenate %126, %128, %130, %132, %134, %136, %138, %140, %142 in 0 : vector<3x14xbf16>, vector<3x14xbf16>, vector<3x14xbf16>, vector<3x14xbf16>, vector<3x14xbf16>, vector<3x14xbf16>, vector<3x14xbf16>, vector<3x14xbf16>, vector<3x14xbf16> -> vector<27x14xbf16>
      %cst_11 = arith.constant dense<0.000000e+00> : vector<64x14xf32>
      %144 = tpu.matmul %1, %143, %cst_11 {dimension_numbers = #tpu.dot_dimension_numbers<[1], [0], [0], [1], [0, 0, 1, 1], [], []>} : vector<64x27xbf16>, vector<27x14xbf16>, vector<64x14xf32> -> vector<64x14xf32>
      %145 = arith.addf %144, %4 : vector<64x14xf32>
      %146 = vector.shape_cast %145 : vector<64x14xf32> to vector<64x1x14xf32>
      %147 = vector.extract_strided_slice %12 {offsets = [0, 6, 0], sizes = [1, 3, 14], strides = [1, 1, 1]} : vector<3x10x14xbf16> to vector<1x3x14xbf16>
      %148 = vector.shape_cast %147 : vector<1x3x14xbf16> to vector<3x14xbf16>
      %149 = vector.extract_strided_slice %13 {offsets = [0, 6, 0], sizes = [1, 3, 14], strides = [1, 1, 1]} : vector<3x10x14xbf16> to vector<1x3x14xbf16>
      %150 = vector.shape_cast %149 : vector<1x3x14xbf16> to vector<3x14xbf16>
      %151 = vector.extract_strided_slice %14 {offsets = [0, 6, 0], sizes = [1, 3, 14], strides = [1, 1, 1]} : vector<3x10x14xbf16> to vector<1x3x14xbf16>
      %152 = vector.shape_cast %151 : vector<1x3x14xbf16> to vector<3x14xbf16>
      %153 = vector.extract_strided_slice %12 {offsets = [1, 6, 0], sizes = [1, 3, 14], strides = [1, 1, 1]} : vector<3x10x14xbf16> to vector<1x3x14xbf16>
      %154 = vector.shape_cast %153 : vector<1x3x14xbf16> to vector<3x14xbf16>
      %155 = vector.extract_strided_slice %13 {offsets = [1, 6, 0], sizes = [1, 3, 14], strides = [1, 1, 1]} : vector<3x10x14xbf16> to vector<1x3x14xbf16>
      %156 = vector.shape_cast %155 : vector<1x3x14xbf16> to vector<3x14xbf16>
      %157 = vector.extract_strided_slice %14 {offsets = [1, 6, 0], sizes = [1, 3, 14], strides = [1, 1, 1]} : vector<3x10x14xbf16> to vector<1x3x14xbf16>
      %158 = vector.shape_cast %157 : vector<1x3x14xbf16> to vector<3x14xbf16>
      %159 = vector.extract_strided_slice %12 {offsets = [2, 6, 0], sizes = [1, 3, 14], strides = [1, 1, 1]} : vector<3x10x14xbf16> to vector<1x3x14xbf16>
      %160 = vector.shape_cast %159 : vector<1x3x14xbf16> to vector<3x14xbf16>
      %161 = vector.extract_strided_slice %13 {offsets = [2, 6, 0], sizes = [1, 3, 14], strides = [1, 1, 1]} : vector<3x10x14xbf16> to vector<1x3x14xbf16>
      %162 = vector.shape_cast %161 : vector<1x3x14xbf16> to vector<3x14xbf16>
      %163 = vector.extract_strided_slice %14 {offsets = [2, 6, 0], sizes = [1, 3, 14], strides = [1, 1, 1]} : vector<3x10x14xbf16> to vector<1x3x14xbf16>
      %164 = vector.shape_cast %163 : vector<1x3x14xbf16> to vector<3x14xbf16>
      %165 = tpu.concatenate %148, %150, %152, %154, %156, %158, %160, %162, %164 in 0 : vector<3x14xbf16>, vector<3x14xbf16>, vector<3x14xbf16>, vector<3x14xbf16>, vector<3x14xbf16>, vector<3x14xbf16>, vector<3x14xbf16>, vector<3x14xbf16>, vector<3x14xbf16> -> vector<27x14xbf16>
      %cst_12 = arith.constant dense<0.000000e+00> : vector<64x14xf32>
      %166 = tpu.matmul %1, %165, %cst_12 {dimension_numbers = #tpu.dot_dimension_numbers<[1], [0], [0], [1], [0, 0, 1, 1], [], []>} : vector<64x27xbf16>, vector<27x14xbf16>, vector<64x14xf32> -> vector<64x14xf32>
      %167 = arith.addf %166, %4 : vector<64x14xf32>
      %168 = vector.shape_cast %167 : vector<64x14xf32> to vector<64x1x14xf32>
      %169 = vector.extract_strided_slice %12 {offsets = [0, 7, 0], sizes = [1, 3, 14], strides = [1, 1, 1]} : vector<3x10x14xbf16> to vector<1x3x14xbf16>
      %170 = vector.shape_cast %169 : vector<1x3x14xbf16> to vector<3x14xbf16>
      %171 = vector.extract_strided_slice %13 {offsets = [0, 7, 0], sizes = [1, 3, 14], strides = [1, 1, 1]} : vector<3x10x14xbf16> to vector<1x3x14xbf16>
      %172 = vector.shape_cast %171 : vector<1x3x14xbf16> to vector<3x14xbf16>
      %173 = vector.extract_strided_slice %14 {offsets = [0, 7, 0], sizes = [1, 3, 14], strides = [1, 1, 1]} : vector<3x10x14xbf16> to vector<1x3x14xbf16>
      %174 = vector.shape_cast %173 : vector<1x3x14xbf16> to vector<3x14xbf16>
      %175 = vector.extract_strided_slice %12 {offsets = [1, 7, 0], sizes = [1, 3, 14], strides = [1, 1, 1]} : vector<3x10x14xbf16> to vector<1x3x14xbf16>
      %176 = vector.shape_cast %175 : vector<1x3x14xbf16> to vector<3x14xbf16>
      %177 = vector.extract_strided_slice %13 {offsets = [1, 7, 0], sizes = [1, 3, 14], strides = [1, 1, 1]} : vector<3x10x14xbf16> to vector<1x3x14xbf16>
      %178 = vector.shape_cast %177 : vector<1x3x14xbf16> to vector<3x14xbf16>
      %179 = vector.extract_strided_slice %14 {offsets = [1, 7, 0], sizes = [1, 3, 14], strides = [1, 1, 1]} : vector<3x10x14xbf16> to vector<1x3x14xbf16>
      %180 = vector.shape_cast %179 : vector<1x3x14xbf16> to vector<3x14xbf16>
      %181 = vector.extract_strided_slice %12 {offsets = [2, 7, 0], sizes = [1, 3, 14], strides = [1, 1, 1]} : vector<3x10x14xbf16> to vector<1x3x14xbf16>
      %182 = vector.shape_cast %181 : vector<1x3x14xbf16> to vector<3x14xbf16>
      %183 = vector.extract_strided_slice %13 {offsets = [2, 7, 0], sizes = [1, 3, 14], strides = [1, 1, 1]} : vector<3x10x14xbf16> to vector<1x3x14xbf16>
      %184 = vector.shape_cast %183 : vector<1x3x14xbf16> to vector<3x14xbf16>
      %185 = vector.extract_strided_slice %14 {offsets = [2, 7, 0], sizes = [1, 3, 14], strides = [1, 1, 1]} : vector<3x10x14xbf16> to vector<1x3x14xbf16>
      %186 = vector.shape_cast %185 : vector<1x3x14xbf16> to vector<3x14xbf16>
      %187 = tpu.concatenate %170, %172, %174, %176, %178, %180, %182, %184, %186 in 0 : vector<3x14xbf16>, vector<3x14xbf16>, vector<3x14xbf16>, vector<3x14xbf16>, vector<3x14xbf16>, vector<3x14xbf16>, vector<3x14xbf16>, vector<3x14xbf16>, vector<3x14xbf16> -> vector<27x14xbf16>
      %cst_13 = arith.constant dense<0.000000e+00> : vector<64x14xf32>
      %188 = tpu.matmul %1, %187, %cst_13 {dimension_numbers = #tpu.dot_dimension_numbers<[1], [0], [0], [1], [0, 0, 1, 1], [], []>} : vector<64x27xbf16>, vector<27x14xbf16>, vector<64x14xf32> -> vector<64x14xf32>
      %189 = arith.addf %188, %4 : vector<64x14xf32>
      %190 = vector.shape_cast %189 : vector<64x14xf32> to vector<64x1x14xf32>
      %191 = tpu.concatenate %36, %58, %80, %102, %124, %146, %168, %190 in 1 : vector<64x1x14xf32>, vector<64x1x14xf32>, vector<64x1x14xf32>, vector<64x1x14xf32>, vector<64x1x14xf32>, vector<64x1x14xf32>, vector<64x1x14xf32>, vector<64x1x14xf32> -> vector<64x8x14xf32>
      %c8_i32_14 = arith.constant 8 : i32
      %192 = arith.muli %arg6, %c8_i32_14 : i32
      %193 = tpu.assume_multiple %192, 8 : i32
      %c0_15 = arith.constant 0 : index
      %c0_16 = arith.constant 0 : index
      %194 = arith.index_cast %193 : i32 to index
      %c0_17 = arith.constant 0 : index
      %195 = vector.load %arg5[%c0_15, %c0_16, %194, %c0_17] : memref<1x64x16x14xf32, #tpu.memory_space<vmem>>, vector<1x64x8x14xf32>
      %196 = vector.shape_cast %195 : vector<1x64x8x14xf32> to vector<64x8x14xf32>
      %197 = vector.shape_cast %191 : vector<64x8x14xf32> to vector<1x64x8x14xf32>
      tpu.vector_store %arg5[%c0_15, %c0_16, %194, %c0_17], %197 {strides = array<i32>} : memref<1x64x16x14xf32, #tpu.memory_space<vmem>>, vector<1x64x8x14xf32>,
    }
    %c2_i32_3 = arith.constant 2 : i32
    return
  }
  func.func @transform_0(%arg0: i32, %arg1: i32) -> (i32, i32, i32, i32) {
    %c0_i32 = arith.constant 0 : i32
    %c0_i32_0 = arith.constant 0 : i32
    %c0_i32_1 = arith.constant 0 : i32
    %c0_i32_2 = arith.constant 0 : i32
    return %arg0, %c0_i32, %c0_i32_0, %c0_i32_1 : i32, i32, i32, i32
  }
  func.func @transform_1(%arg0: i32, %arg1: i32) -> (i32, i32) {
    %c0_i32 = arith.constant 0 : i32
    %c0_i32_0 = arith.constant 0 : i32
    %c0_i32_1 = arith.constant 0 : i32
    return %c0_i32, %c0_i32_0 : i32, i32
  }
  func.func @transform_2(%arg0: i32, %arg1: i32) -> (i32, i32) {
    %c0_i32 = arith.constant 0 : i32
    %c0_i32_0 = arith.constant 0 : i32
    %c0_i32_1 = arith.constant 0 : i32
    return %c0_i32, %c0_i32_0 : i32, i32
  }
  func.func @transform_3(%arg0: i32, %arg1: i32) -> (i32, i32, i32, i32) {
    %c0_i32 = arith.constant 0 : i32
    %c0_i32_0 = arith.constant 0 : i32
    %c0_i32_1 = arith.constant 0 : i32
    return %arg0, %c0_i32, %arg1, %c0_i32_0 : i32, i32, i32, i32
  }
}

</mosaic_0001>

<bundles_post_ra>
// kernel: gration_forward.1
= control target key start
LH: loop header
LB: loop body
LE: loop exit
PB: predicated region body
PF: predicated region fallthrough
CT: control target
= control target key end

     0   :  { %s7717_s12 = smov 0   ;;  %s7719_s13 = smov 0   ;;  %s11456_s0 = inlined_call_operand.vmem [shape: bf16[2,3,18,16], index: 0, kind: input, shape index: {}]   ;;  %s11457_s1 = inlined_call_operand.vmem [shape: bf16[64,27], index: 1, kind: input, shape index: {}]   ;;  %s11458_s2 = inlined_call_operand.vmem [shape: f32[64,1], index: 2, kind: input, shape index: {}]   ;;  %s11459_s3 = inlined_call_operand.vmem [shape: f32[2,64,14,14], index: 3, kind: output, shape index: {}]  }
   0x1   :  { %s7721_s14 = smov 0  }
   0x2 LB: > { %s25_s15 = sadd.s32 1, %s7682_s13  ;;  %p7412_p0 = scmp.ge.s32.totalorder %s7686_s14, 1  ;;  %s7686_s14 = sphi %s7721_s14, %s13_s14   ;;  %s7682_s13 = sphi %s7719_s13, %s11901_s13   ;;  %s7678_s12 = sphi %s7717_s12, %s11900_s12  }
   0x3   : > { %p27_p1 = scmp.ge.s32.totalorder %s25_s15, 2  ;;  %p151_p2 = scmp.lt.s32.totalorder %s7686_s14, 3 }
   0x5   : > { %s11903_s15 = smov (%p27_p1, %s25_s15), 0  ;;  %p152_p3 = pnand %p7412_p0, %p151_p2 }
   0x6   : > { %v206_v0 = vld [vmem:[%s11458_s2 + $0x10] sm:$0xff] (!%p152_p3)  ;;  %v204_v1 = vld [vmem:[%s11458_s2] sm:$0xff] (!%p152_p3)  ;;  %v7692_v2 = vmov (!%p152_p3), 0   ;;  %v207_v3 = vld [vmem:[%s11458_s2 + $0x18] sm:$0xff] (!%p152_p3)  ;;  %p179_p4 = scmp.lt.s32.totalorder (!%p152_p3), %s7678_s12, 1 }
   0x7   : > { %155 = sbr.rel (%p152_p3) target bundleno = 988 (0x3dc), region = 32  ;;  %7647 = vset.pattern.permute.xlu1 (!%p152_p3), %v7692_v2  ;;  %7646 = vset.pattern.permute.xlu0 (!%p152_p3), %v7692_v2  ;;  %v205_v4 = vld [vmem:[%s11458_s2 + $0x8] sm:$0xff] (!%p152_p3)  ;;  %v208_v6 = vld [vmem:[%s11458_s2 + $0x20] sm:$0xff] (!%p152_p3)  ;;  %v211_v7 = vld [vmem:[%s11458_s2 + $0x38] sm:$0xff] (!%p152_p3) }
   0x8   : > { %224 = vperm.xlu1 (!%p152_p3), %7647, %v206_v0   ;;  %214 = vperm.xlu0 (!%p152_p3), %7646, %v204_v1   ;;  %v209_v5 = vld [vmem:[%s11458_s2 + $0x28] sm:$0xff] (!%p152_p3)  ;;  %v210_v8 = vld [vmem:[%s11458_s2 + $0x30] sm:$0xff] (!%p152_p3)  ;;  %v7772_v9 = vld [vmem:[%s11457_s1] sm:$0xf] (!%p152_p3) }
   0x9   : > { %11484 = vst [vmem:[#allocation2_spill] sm:$0xff] (!%p152_p3), %v7772_v9  ;;  %v7777_v10 = vld [vmem:[%s11457_s1 + $0x4] sm:$0xf] (!%p152_p3)  ;;  %v7782_v11 = vld [vmem:[%s11457_s1 + $0x8] sm:$0xf] (!%p152_p3) }
   0xa   : > { %11485 = vst [vmem:[#allocation3_spill] sm:$0xff] (!%p152_p3), %v7777_v10  ;;  %11486 = vst [vmem:[#allocation4_spill] sm:$0xff] (!%p152_p3), %v7782_v11  ;;  %v7787_v12 = vld [vmem:[%s11457_s1 + $0xc] sm:$0xf] (!%p152_p3)  ;;  %v7792_v13 = vld [vmem:[%s11457_s1 + $0x10] sm:$0xf] (!%p152_p3) }
   0xb   : > { %11487 = vst [vmem:[#allocation5_spill] sm:$0xff] (!%p152_p3), %v7787_v12  ;;  %11488 = vst [vmem:[#allocation6_spill] sm:$0xff] (!%p152_p3), %v7792_v13  ;;  %v7797_v14 = vld [vmem:[%s11457_s1 + $0x14] sm:$0xf] (!%p152_p3)  ;;  %v7802_v15 = vld [vmem:[%s11457_s1 + $0x18] sm:$0xf] (!%p152_p3) }
   0xc   : > { %229 = vperm.xlu1 (!%p152_p3), %7647, %v207_v3   ;;  %219 = vperm.xlu0 (!%p152_p3), %7646, %v205_v4   ;;  %11489 = vst [vmem:[#allocation7_spill] sm:$0xff] (!%p152_p3), %v7797_v14  ;;  %11490 = vst [vmem:[#allocation8_spill] sm:$0xff] (!%p152_p3), %v7802_v15  ;;  %v7807_v16 = vld [vmem:[%s11457_s1 + $0x1c] sm:$0xf] (!%p152_p3) }
   0xd   : > { %11491 = vst [vmem:[#allocation9_spill] sm:$0xff] (!%p152_p3), %v7807_v16 }
   0xe   : > { %s11905_s12 = smov (!%p179_p4, %s7678_s12), 1 }
   0xf   : > { %s7608_s5 = smul.u32 36, %s11905_s12  ;;  %s7463_s6 = sshll.u32 %s11905_s12, 10 }
  0x10   : > { %239 = vperm.xlu1 %7647, %v209_v5   ;;  %234 = vperm.xlu0 %7646, %v208_v6   ;;  %s7767_s16 = scalar_lea.vmem %s11459_s3, %s7463_s6 }
  0x11   : > { %s7762_s9 = scalar_lea.vmem %s11456_s0, %s7608_s5  ;;  %s7825_s5 = smov 0  }
  0x14   : > { %249 = vperm.xlu1 %7647, %v211_v7   ;;  %244 = vperm.xlu0 %7646, %v210_v8  }
  0x87   : > { %v7809_v17 = vpop.permute.xlu1 %224  ;;  %v7811_v18 = vpop.permute.xlu0 %214 }
  0x88   : > { %11492 = vst [vmem:[#allocation10_spill] sm:$0xff] %v7809_v17  ;;  %11493 = vst [vmem:[#allocation11_spill] sm:$0xff] %v7811_v18 }
  0x8b   : > { %v7813_v19 = vpop.permute.xlu1 %229  ;;  %v7815_v20 = vpop.permute.xlu0 %219 }
  0x8c   : > { %11494 = vst [vmem:[#allocation12_spill] sm:$0xff] %v7813_v19  ;;  %11495 = vst [vmem:[#allocation13_spill] sm:$0xff] %v7815_v20 }
  0x8f   : > { %v7817_v21 = vpop.permute.xlu1 %239  ;;  %v7819_v22 = vpop.permute.xlu0 %234 }
  0x90   : > { %11496 = vst [vmem:[#allocation14_spill] sm:$0xff] %v7817_v21  ;;  %11497 = vst [vmem:[#allocation15_spill] sm:$0xff] %v7819_v22 }
  0x93   : > { %v7821_v23 = vpop.permute.xlu1 %249  ;;  %v7823_v24 = vpop.permute.xlu0 %244 }
  0x94   : > { %11498 = vst [vmem:[#allocation16_spill] sm:$0xff] %v7821_v23  ;;  %11499 = vst [vmem:[#allocation17_spill] sm:$0xff] %v7823_v24 }
  0x95 LB: >> { %v11500_v19 = vld [vmem:[#allocation12_spill] sm:$0xff]  ;;  %v11501_v17 = vld [vmem:[#allocation10_spill] sm:$0xff]  ;;  %v11502_v18 = vld [vmem:[#allocation11_spill] sm:$0xff]  ;;  %s7416_s6 = sshll.u32 %s7690_s5, 3  ;;  %s7693_s11 = smov 127   ;;  %vm381_vm0 = vcmask 220160   ;;  %s7690_s5 = sphi %s7825_s5, %s257_s5  }
  0x96   : >> { %v11507_v20 = vld [vmem:[#allocation13_spill] sm:$0xff]  ;;  %s260_s7 = sshra.s32 %s7416_s6, 3  ;;  %s7694_s17 = smov 126   ;;  %v11508_v10 = vld [vmem:[#allocation3_spill] sm:$0xff]  ;;  %v11509_v9 = vld [vmem:[#allocation2_spill] sm:$0xff]  ;;  %vm326_vm1 = vcmask 1041408  }
  0x97   : >> { %v11503_v21 = vld [vmem:[#allocation14_spill] sm:$0xff]  ;;  %v11505_v22 = vld [vmem:[#allocation15_spill] sm:$0xff]  ;;  %s7417_s8 = sshll.u32 %s260_s7, 2  ;;  %v7919_v1 = vcombine.low %v11509_v9, %v11508_v10  ;;  %vm327_vm2 = vsmask.f32 1280  ;;  %vm335_vm3 = vcmask 1044480   ;;  %s10831_s18 = scalar_lea.vmem %s7767_s16, %s7416_s6 }
  0x98   : >> { %s7834_s10 = scalar_lea.vmem %s7762_s9, %s7417_s8  ;;  %vm336_vm4 = vsmask.f32 4352  ;;  %vm8064_vm5 = vmand %vm326_vm1, %vm327_vm2  ;;  %vm330_vm6 = vcmask 1042432   ;;  %vm344_vm7 = vcmask 1047552   ;;  %vm345_vm8 = vsmask.f32 7424 }
  0x99   : >> { %v7837_v25 = vld [vmem:[%s7834_s10] sm:$0xf]  ;;  %v266_v26 = vld [vmem:[%s7834_s10 + $0xc] sm:$0xf]  ;;  %v7841_v27 = vld [vmem:[%s7834_s10 + $0x18] sm:$0xf]  ;;  %7516 = vmatprep.mubr.msk.bf16.mxu0 %vm381_vm0, %v7919_v1  ;;  %7528 = vmatprep.mubr.msk.bf16.mxu1 %vm381_vm0, %v7919_v1 }
  0x9a   : >> { %v7845_v28 = vcombine.low %v7837_v25, %v7837_v25  ;;  %v7847_v29 = vcombine.low %v266_v26, %v266_v26  ;;  %v7850_v30 = vld [vmem:[%s7834_s10 + $0x10] sm:$0x1]  ;;  %v7868_v37 = vcombine.low %v7841_v27, %v7841_v27  ;;  %vm8069_vm9 = vmand %vm335_vm3, %vm336_vm4  ;;  %vm339_vm10 = vcmask 1045504   ;;  %v11518_v12 = vld [vmem:[#allocation5_spill] sm:$0xff]  ;;  %s257_s5 = sadd.s32 1, %s7690_s5  }
  0x9b   : >> { %v11504_v23 = vld [vmem:[#allocation16_spill] sm:$0xff]  ;;  %v11506_v24 = vld [vmem:[#allocation17_spill] sm:$0xff]  ;;  %v7853_v31 = vcombine.low %v266_v26, %v7850_v30  ;;  %vm8077_vm11 = vmand %vm344_vm7, %vm345_vm8  ;;  %vm354_vm12 = vsmask.f32 2304  ;;  %vm348_vm13 = vcmask 1040384   ;;  %vm357_vm15 = vcmask 1043456  }
  0x9c   : >> { %v931_v32 = vrot.slane %v7845_v28, 7  ;;  %v284_v33 = vrot.slane %v7845_v28, 5  ;;  %v7858_v34 = vshll.u32 %v7847_v29, 16  ;;  %v7861_v35 = vshrl.u32 %v7845_v28, 16  ;;  %vm8098_vm14 = vmand %vm330_vm6, %vm354_vm12  ;;  %v11519_v11 = vld [vmem:[#allocation4_spill] sm:$0xff]  ;;  %v11520_v14 = vld [vmem:[#allocation7_spill] sm:$0xff] }
  0x9d   : >> { %v7864_v36 = vshll.u32 %v7845_v28, 16  ;;  %v299_v40 = vrot.slane %v7847_v29, 2  ;;  %v7878_v41 = vshrl.u32 %v7847_v29, 16  ;;  %v7886_v48 = vshrl.u32 %v7868_v37, 16  ;;  %v11521_v13 = vld [vmem:[#allocation6_spill] sm:$0xff]  ;;  %v11522_v16 = vld [vmem:[#allocation9_spill] sm:$0xff] }
  0x9e   : >> { %932 = vrot.lane.b32.xlu1 %v931_v32, %s7693_s11  ;;  %285 = vrot.lane.b32.xlu0 %v284_v33, %s7694_s17  ;;  %v302_v38 = vrot.slane %v7858_v34, 1  ;;  %v1464_v39 = vrot.slane %v7858_v34, 2  ;;  %v935_v42 = vrot.slane %v7861_v35, 5  ;;  %v276_v44 = vrot.slane %v7861_v35, 6  ;;  %v11523_v15 = vld [vmem:[#allocation8_spill] sm:$0xff]  ;;  %p254_p5 = scmp.ge.s32.totalorder %s257_s5, 2  }
  0x9f   : >> { %v936_v43 = vrot.slane %v7864_v36, 6  ;;  %v279_v45 = vrot.slane %v7864_v36, 7  ;;  %v942_v47 = vrot.slane %v7858_v34, 3  ;;  %v941_v51 = vrot.slane %v7878_v41, 2 }
  0xa0   : >> { %v7648_v46 = vpack.i.bf16 %v1464_v39, %v302_v38  ;;  %v7894_v52 = vshll.u32 %v7868_v37, 16  ;;  %v303_v54 = vor.u32 %v302_v38, %v7878_v41  ;;  %v316_v55 = vrot.slane %v7886_v48, 5 }
  0xa1   : >> { %v937_v49 = vor.u32 %v936_v43, %v935_v42  ;;  %v280_v50 = vor.u32 %v279_v45, %v276_v44  ;;  %v7900_v53 = vor.u32 %v942_v47, %v941_v51  ;;  %v946_v57 = vrot.slane %v7847_v29, 1 }
  0xa2   : >> { %7649 = vrot.lane.b32.xlu1 %v7648_v46, %s7694_s17  ;;  %300 = vrot.lane.b32.xlu0 %v299_v40, %s7693_s11  ;;  %v319_v56 = vrot.slane %v7894_v52, 6  ;;  %v952_v59 = vrot.slane %v7868_v37, 6  ;;  %v1449_v60 = vrot.slane %v7861_v35, 7  ;;  %v956_v61 = vrot.slane %v7886_v48, 4 }
  0xa3   : >> { %v957_v62 = vrot.slane %v7894_v52, 5  ;;  %v1967_v63 = vrot.slane %v7861_v35, 1  ;;  %v1968_v0 = vrot.slane %v7864_v36, 2  ;;  %v1983_v5 = vrot.slane %v7894_v52, 1 }
  0xa4   : >> { %v320_v58 = vor.u32 %v319_v56, %v316_v55  ;;  %v1450_v2 = vor.u32 %v1449_v60, %v7864_v36  ;;  %v1454_v6 = vrot.slane %v7845_v28, 6  ;;  %v1461_v8 = vrot.slane %v7847_v29, 3 }
  0xa5   : >> { %v958_v3 = vor.u32 %v957_v62, %v956_v61  ;;  %v7927_v4 = vor.u32 %v1968_v0, %v1967_v63  ;;  %v7938_v7 = vor.u32 %v1983_v5, %v7886_v48  ;;  %v293_v26 = vrot.slane %v7878_v41, 3  ;;  %v265_v63 = vld [vmem:[%s7834_s10 + $0x4] sm:$0x1] }
  0xa6   : >> { %938 = vrot.lane.b32.xlu1 %v937_v49, %s7694_s17  ;;  %281 = vrot.lane.b32.xlu0 %v280_v50, %s7693_s11  ;;  %v296_v33 = vrot.slane %v7858_v34, 4  ;;  %v1465_v38 = vrot.slane %v7878_v41, 1  ;;  %v1472_v42 = vrot.slane %v7886_v48, 6  ;;  %v1473_v43 = vrot.slane %v7894_v52, 7 }
  0xa7   : >> { %v2986_v49 = vrot.slane %v7861_v35, 2  ;;  %v2987_v51 = vrot.slane %v7864_v36, 3  ;;  %v2484_v55 = vrot.slane %v7858_v34, 6  ;;  %v928_v60 = vrot.slane %v7864_v36, 1 }
  0xa8   : >> { %v7951_v44 = vor.u32 %v296_v33, %v293_v26  ;;  %v1466_v45 = vor.u32 %v1465_v38, %v1464_v39  ;;  %v1474_v46 = vor.u32 %v1473_v43, %v1472_v42  ;;  %v312_v39 = vrot.slane %v7868_v37, 7 }
  0xa9   : >> { %v7960_v56 = vor.u32 %v2987_v51, %v2986_v49  ;;  %v7976_v61 = vor.u32 %v928_v60, %v7861_v35  ;;  %v3002_v62 = vrot.slane %v7886_v48, 1  ;;  %v3003_v36 = vrot.slane %v7894_v52, 2 }
  0xaa   : >> { %944 = vrot.lane.b32.xlu1 %v7900_v53, %s7693_s11  ;;  %306 = vrot.lane.b32.xlu0 %v303_v54, %s7694_s17  ;;  %v2483_v54 = vrot.slane %v7878_v41, 5  ;;  %v1457_v0 = vrot.slane %v7878_v41, 4  ;;  %v8000_v5 = vcombine.low %v7837_v25, %v265_v63 }
  0xab   : >> { %v7990_v35 = vor.u32 %v3003_v36, %v3002_v62 }
  0xac   : >> { %v3505_v26 = vshll.u32 %v8000_v5, 16 }
  0xae   : >> { %947 = vrot.lane.b32.xlu1 %v946_v57, %s7694_s17  ;;  %321 = vrot.lane.b32.xlu0 %v320_v58, %s7693_s11  ;;  %v1478_v57 = vrot.slane %v7868_v37, 5  ;;  %v4041_v43 = vrot.slane %v3505_v26, 4  ;;  %v4048_v51 = vrot.slane %v3505_v26, 1 }
  0xb2   : >> { %953 = vrot.lane.b32.xlu1 %v952_v59, %s7693_s11  ;;  %324 = vrot.lane.b32.xlu0 %v7868_v37, %s7694_s17 }
  0xb6   : >> { %1451 = vrot.lane.b32.xlu1 %v1450_v2, %s7693_s11  ;;  %959 = vrot.lane.b32.xlu0 %v958_v3, %s7694_s17  ;;  %v1458_v3 = vrot.slane %v7858_v34, 5 }
  0xb8   : >> { %v8012_v41 = vor.u32 %v1458_v3, %v1457_v0 }
  0xba   : >> { %1971 = vrot.lane.b32.xlu1 %v7845_v28, %s7693_s11  ;;  %1455 = vrot.lane.b32.xlu0 %v1454_v6, %s7694_s17  ;;  %v3521_v6 = vshll.u32 %v7853_v31, 16 }
  0xbc   : >> { %v3523_v38 = vrot.slane %v3521_v6, 7  ;;  %v3529_v36 = vrot.slane %v3521_v6, 4 }
  0xbe   : >> { %1462 = vrot.lane.b32.xlu1 %v1461_v8, %s7693_s11  ;;  %1974 = vrot.lane.b32.xlu0 %v280_v50, %s7694_s17  ;;  %v7962_v50 = vor.u32 %v2484_v55, %v2483_v54 }
  0xc2   : >> { %1978 = vrot.lane.b32.xlu1 %v7951_v44, %s7693_s11  ;;  %1469 = vrot.lane.b32.xlu0 %v1466_v45, %s7694_s17 }
  0xc6   : >> { %1980 = vrot.lane.b32.xlu1 %v299_v40, %s7694_s17  ;;  %1475 = vrot.lane.b32.xlu0 %v1474_v46, %s7693_s11  ;;  %v1447_v40 = vrot.slane %v7845_v28, 1 }
  0xca   : >> { %1985 = vrot.lane.b32.xlu1 %v312_v39, %s7693_s11  ;;  %1479 = vrot.lane.b32.xlu0 %v1478_v57, %s7694_s17  ;;  %v3526_v57 = vrot.slane %v7853_v31, 5 }
  0xce   : >> { %2478 = vrot.lane.b32.xlu1 %v7976_v61, %s7693_s11  ;;  %1988 = vrot.lane.b32.xlu0 %v320_v58, %s7694_s17  ;;  %v950_v58 = vrot.slane %v7886_v48, 7 }
  0xd0   : >> { %v8010_v48 = vor.u32 %v950_v58, %v7894_v52  ;;  %v3507_v52 = vrot.slane %v3505_v26, 2  ;;  %v4055_v58 = vrot.slane %v3521_v6, 6 }
  0xd2   : >> { %2990 = vrot.lane.b32.xlu1 %v1447_v40, %s7693_s11  ;;  %2481 = vrot.lane.b32.xlu0 %v931_v32, %s7694_s17  ;;  %v3518_v32 = vshrl.u32 %v7853_v31, 16 }
  0xd4   : >> { %v3520_v33 = vrot.slane %v3518_v32, 6  ;;  %v4054_v63 = vrot.slane %v3518_v32, 5  ;;  %v3530_v0 = vrot.slane %v3518_v32, 3  ;;  %v7456_v32 = vcombine.low %v7850_v30, %v7850_v30 }
  0xd6   : >> { %2487 = vrot.lane.b32.xlu1 %v7847_v29, %s7693_s11  ;;  %2993 = vrot.lane.b32.xlu0 %v1450_v2, %s7694_s17  ;;  %v3502_v2 = vshrl.u32 %v8000_v5, 16  ;;  %v8016_v45 = vor.u32 %v3523_v38, %v3520_v33  ;;  %v3531_v26 = vor.u32 %v3530_v0, %v3529_v36 }
  0xd8   : >> { %v4040_v42 = vrot.slane %v3502_v2, 3 }
  0xda   : >> { %2491 = vrot.lane.b32.xlu1 %v7900_v53, %s7694_s17  ;;  %2489 = vrot.lane.b32.xlu0 %v942_v47, %s7694_s17  ;;  %v8022_v34 = vor.u32 %v4041_v43, %v4040_v42  ;;  %v3504_v47 = vrot.slane %v3502_v2, 1  ;;  %v269_v53 = vld [vmem:[%s7834_s10 + $0x1c] sm:$0x1] }
  0xdb   : >> { %v8033_v54 = vcombine.low %v7841_v27, %v269_v53 }
  0xdc   : >> { %v3508_v49 = vor.u32 %v3507_v52, %v3504_v47 }
  0xdd   : >> { %v3542_v55 = vshrl.u32 %v8033_v54, 16  ;;  %v3551_v6 = vrot.slane %v8033_v54, 7  ;;  %v4068_v43 = vrot.slane %v8033_v54, 1 }
  0xde   : >> { %2495 = vrot.lane.b32.xlu1 %v8010_v48, %s7693_s11  ;;  %2997 = vrot.lane.b32.xlu0 %v8012_v41, %s7693_s11 }
  0xdf   : >> { %v4065_v60 = vrot.slane %v3542_v55, 2  ;;  %v4072_v42 = vrot.slane %v3542_v55, 7 }
  0xe2   : >> { %2498 = vrot.lane.b32.xlu1 %v952_v59, %s7694_s17  ;;  %2999 = vrot.lane.b32.xlu0 %v1461_v8, %s7694_s17  ;;  %v4049_v59 = vor.u32 %v4048_v51, %v3502_v2  ;;  %v4044_v8 = vrot.slane %v8000_v5, 2  ;;  %v4056_v2 = vor.u32 %v4055_v58, %v4054_v63 }
  0xe6   : >> { %3008 = vrot.lane.b32.xlu1 %v1474_v46, %s7694_s17  ;;  %3005 = vrot.lane.b32.xlu0 %v7868_v37, %s7693_s11  ;;  %v3544_v46 = vshll.u32 %v8033_v54, 16 }
  0xe8   : >> { %v4066_v62 = vrot.slane %v3544_v46, 3  ;;  %v3546_v33 = vrot.slane %v3544_v46, 1  ;;  %v4073_v47 = vor.u32 %v4072_v42, %v3544_v46 }
  0xea   : >> { %3512 = vrot.lane.b32.xlu1 %v8000_v5, %s7694_s17  ;;  %3509 = vrot.lane.b32.xlu0 %v3508_v49, %s7693_s11  ;;  %v8044_v3 = vor.u32 %v4066_v62, %v4065_v60  ;;  %v3547_v38 = vor.u32 %v3546_v33, %v3542_v55 }
  0xee   : >> { %4050 = vrot.lane.b32.xlu1 %v4049_v59, %s7694_s17  ;;  %4045 = vrot.lane.b32.xlu0 %v4044_v8, %s7693_s11 }
  0xf2   : >> { %3532 = vrot.lane.b32.xlu1 %v3529_v36, %s7694_s17  ;;  %3527 = vrot.lane.b32.xlu0 %v3526_v57, %s7693_s11 }
  0xf6   : >> { %4057 = vrot.lane.b32.xlu1 %v4056_v2, %s7693_s11  ;;  %3534 = vrot.lane.b32.xlu0 %v3531_v26, %s7694_s17 }
  0xfa   : >> { %4060 = vrot.lane.b32.xlu1 %v7847_v29, %s7694_s17  ;;  %3548 = vrot.lane.b32.xlu0 %v3547_v38, %s7693_s11 }
  0xfe   : >> { %3552 = vrot.lane.b32.xlu1 %v3551_v6, %s7694_s17  ;;  %4062 = vrot.lane.b32.xlu0 %v7456_v32, %s7694_s17  ;;  %v7695_v6 = vmov 65535  }
  0xff   : >> { %v395_v32 = vsel %vm335_vm3, 4294967295, %v7695_v6 }
 0x102   : >> { %4069 = vrot.lane.b32.xlu0 %v4068_v43, %s7693_s11  ;;  %4074 = vrot.lane.b32.xlu1 %v4073_v47, %s7694_s17 }
 0x110   : >> { %v933_v52 = vpop.permute.xlu1 %932  ;;  %v286_v53 = vpop.permute.xlu0 %285 }
 0x111   : >> { %v961_v62 = vsel %vm8064_vm5, %v7976_v61, %v933_v52  ;;  %v8108_v52 = vsel %vm339_vm10, %v395_v32, 0  ;;  %v8146_v32 = vcombine.low %v11523_v15, %v11522_v16 }
 0x114   : >> { %v8061_v49 = vpop.permute.xlu1 %7649  ;;  %v301_v51 = vpop.permute.xlu0 %300 }
 0x115   : >> { %v7651_v36 = vunpack.i.l.bf16 %v8061_v49 }
 0x118   : >> { %v939_v59 = vpop.permute.xlu1 %938  ;;  %v282_v8 = vpop.permute.xlu0 %281 }
 0x119   : >> { %v329_v46 = vsel %vm8064_vm5, %v7837_v25, %v282_v8  ;;  %v964_v58 = vsel %vm330_vm6, %v961_v62, %v939_v59 }
 0x11a   : >> { %v333_v57 = vsel %vm330_vm6, %v329_v46, %v286_v53  ;;  %v966_v61 = vsel %vm8069_vm9, %v964_v58, %v7847_v29 }
 0x11b   : >> { %v338_v63 = vsel %vm8069_vm9, %v333_v57, %v7951_v44 }
 0x11c   : >> { %v945_v25 = vpop.permute.xlu1 %944  ;;  %v307_v0 = vpop.permute.xlu0 %306  ;;  %v342_v2 = vsel %vm339_vm10, %v338_v63, %v301_v51  ;;  %v8120_v63 = vcombine.low %v11519_v11, %v11518_v12 }
 0x11d   : >> { %v347_v26 = vsel %vm8077_vm11, %v342_v2, %v7651_v36  ;;  %v969_v33 = vsel %vm339_vm10, %v966_v61, %v945_v25  ;;  %v351_v47 = vsel %vm348_vm13, %v307_v0, %v312_v39  ;;  %v8125_v25 = vcombine.low %v11521_v13, %v11520_v14 }
 0x11e   : >> { %7512 = vmatprep.subr.bf16.mxu0 %v347_v26 }
 0x11f   : >> { %7513 = vmatpush3.bf16.msra.mxu0 %v347_v26 }
 0x120   : >> { %v948_v44 = vpop.permute.xlu1 %947  ;;  %v322_v38 = vpop.permute.xlu0 %321 }
 0x121   : >> { %v971_v43 = vsel %vm8077_vm11, %v969_v33, %v948_v44  ;;  %v356_v53 = vsel %vm8098_vm14, %v351_v47, %v322_v38  ;;  %v974_v57 = vsel %vm348_vm13, %v948_v44, %v8010_v48  ;;  %v7652_v33 = vunpack.i.h.bf16 %v8061_v49 }
 0x122   : >> { %7524 = vmatprep.subr.bf16.mxu1 %v971_v43 }
 0x123   : >> { %7525 = vmatpush3.bf16.msra.mxu1 %v971_v43  ;;  %v1976_v43 = vrot.slane %v7847_v29, 5 }
 0x124   : >> { %v954_v51 = vpop.permute.xlu1 %953  ;;  %v325_v59 = vpop.permute.xlu0 %324 }
 0x125   : >> { %v360_v8 = vsel %vm357_vm15, %v356_v53, %v325_v59  ;;  %v976_v62 = vsel %vm8098_vm14, %v974_v57, %v954_v51 }
 0x126   : >> { %v397_v46 = vand.u32 %v8108_v52, %v360_v8 }
 0x128   : >> { %v1452_v39 = vpop.permute.xlu1 %1451  ;;  %7514 = vmatprep.subr.bf16.mxu0 %v397_v46  ;;  %v960_v36 = vpop.permute.xlu0 %959 }
 0x129   : >> { %v979_v58 = vsel %vm357_vm15, %v976_v62, %v960_v36  ;;  %7515 = vmatpush3.bf16.msra.mxu0 %v397_v46  ;;  %v1481_v48 = vsel %vm8064_vm5, %v1447_v40, %v1452_v39 }
 0x12a   : >> { %v980_v0 = vand.u32 %v979_v58, %v8108_v52 }
 0x12c   : >> { %v1972_v2 = vpop.permute.xlu1 %1971  ;;  %7526 = vmatprep.subr.bf16.mxu1 %v980_v0  ;;  %v1456_v26 = vpop.permute.xlu0 %1455  ;;  %7517 = vmatmul.mubr.msk.bf16.vlgmr.msra.gmra.mrb[0].mxu0 %vm381_vm0, %v8120_v63 }
 0x12d   : >> { %v1484_v61 = vsel %vm330_vm6, %v1481_v48, %v1456_v26  ;;  %7527 = vmatpush3.bf16.msra.mxu1 %v980_v0  ;;  %7520 = vmatprep.mubr.msk.bf16.mxu0 %vm381_vm0, %v8125_v25 }
 0x12e   : >> { %v1486_v38 = vsel %vm8069_vm9, %v1484_v61, %v8012_v41  ;;  %v1990_v41 = vsel %vm8064_vm5, %v7927_v4, %v1972_v2  ;;  %v2476_v61 = vrot.slane %v7845_v28, 2 }
 0x130   : >> { %v1463_v44 = vpop.permute.xlu1 %1462  ;;  %v1975_v40 = vpop.permute.xlu0 %1974  ;;  %7529 = vmatmul.mubr.msk.bf16.vlgmr.msra.gmra.mrb[0].mxu1 %vm381_vm0, %v8120_v63 }
 0x131   : >> { %v1489_v6 = vsel %vm339_vm10, %v1486_v38, %v1463_v44  ;;  %7532 = vmatprep.mubr.msk.bf16.mxu1 %vm381_vm0, %v8125_v25  ;;  %v1993_v47 = vsel %vm330_vm6, %v1990_v41, %v1975_v40 }
 0x132   : >> { %v1491_v49 = vsel %vm8077_vm11, %v1489_v6, %v7652_v33  ;;  %v1995_v59 = vsel %vm8069_vm9, %v1993_v47, %v1976_v43 }
 0x133   : >> { %7536 = vmatprep.subr.bf16.mxu0 %v1491_v49 }
 0x134   : >> { %v1979_v53 = vpop.permute.xlu1 %1978  ;;  %7537 = vmatpush3.bf16.msra.mxu0 %v1491_v49  ;;  %v1470_v51 = vpop.permute.xlu0 %1469 }
 0x135   : >> { %7521 = vmatmul.mubr.msk.bf16.gmra.mrb[4].mxu0 %vm381_vm0, %v8146_v32  ;;  %v1998_v8 = vsel %vm339_vm10, %v1995_v59, %v1979_v53  ;;  %v1494_v62 = vsel %vm348_vm13, %v1470_v51, %v7841_v27 }
 0x136   : >> { %7540 = vmatprep.mubr.msk.bf16.mxu0 %vm381_vm0, %v7919_v1 }
 0x138   : >> { %v1981_v4 = vpop.permute.xlu1 %1980  ;;  %v1476_v46 = vpop.permute.xlu0 %1475  ;;  %7533 = vmatmul.mubr.msk.bf16.gmra.mrb[4].mxu1 %vm381_vm0, %v8146_v32 }
 0x139   : >> { %v2000_v57 = vsel %vm8077_vm11, %v1998_v8, %v1981_v4  ;;  %7552 = vmatprep.mubr.msk.bf16.mxu1 %vm381_vm0, %v7919_v1  ;;  %v1496_v39 = vsel %vm8098_vm14, %v1494_v62, %v1476_v46  ;;  %v2003_v2 = vsel %vm348_vm13, %v1981_v4, %v7938_v7  ;;  %v2494_v8 = vrot.slane %v7868_v37, 1 }
 0x13a   : >> { %7548 = vmatprep.subr.bf16.mxu1 %v2000_v57  ;;  %v2995_v4 = vrot.slane %v7847_v29, 6 }
 0x13b   : >> { %7549 = vmatpush3.bf16.msra.mxu1 %v2000_v57 }
 0x13c   : >> { %v1986_v36 = vpop.permute.xlu1 %1985  ;;  %v1480_v58 = vpop.permute.xlu0 %1479 }
 0x13d   : >> { %v1499_v0 = vsel %vm357_vm15, %v1496_v39, %v1480_v58  ;;  %v2005_v26 = vsel %vm8098_vm14, %v2003_v2, %v1986_v36 }
 0x13e   : >> { %v1500_v48 = vand.u32 %v1499_v0, %v8108_v52 }
 0x140   : >> { %v2479_v33 = vpop.permute.xlu1 %2478  ;;  %7538 = vmatprep.subr.bf16.mxu0 %v1500_v48  ;;  %v1989_v27 = vpop.permute.xlu0 %1988 }
 0x141   : >> { %v2008_v44 = vsel %vm357_vm15, %v2005_v26, %v1989_v27  ;;  %7539 = vmatpush3.bf16.msra.mxu0 %v1500_v48  ;;  %v2500_v40 = vsel %vm8064_vm5, %v2476_v61, %v2479_v33 }
 0x142   : >> { %v2009_v38 = vand.u32 %v2008_v44, %v8108_v52 }
 0x144   : >> { %v2991_v6 = vpop.permute.xlu1 %2990  ;;  %7550 = vmatprep.subr.bf16.mxu1 %v2009_v38  ;;  %v2482_v49 = vpop.permute.xlu0 %2481  ;;  %7541 = vmatmul.mubr.msk.bf16.vlgmr.msra.gmra.mrb[8].mxu0 %vm381_vm0, %v8120_v63 }
 0x145   : >> { %v2503_v7 = vsel %vm330_vm6, %v2500_v40, %v2482_v49  ;;  %7551 = vmatpush3.bf16.msra.mxu1 %v2009_v38  ;;  %7544 = vmatprep.mubr.msk.bf16.mxu0 %vm381_vm0, %v8125_v25  ;;  %v3499_v38 = vrot.slane %v8000_v5, 3 }
 0x146   : >> { %v2505_v28 = vsel %vm8069_vm9, %v2503_v7, %v7962_v50  ;;  %v3010_v50 = vsel %vm8064_vm5, %v7960_v56, %v2991_v6  ;;  %v4052_v7 = vrot.slane %v7853_v31, 7 }
 0x148   : >> { %v2488_v41 = vpop.permute.xlu1 %2487  ;;  %v2994_v43 = vpop.permute.xlu0 %2993  ;;  %7553 = vmatmul.mubr.msk.bf16.vlgmr.msra.gmra.mrb[8].mxu1 %vm381_vm0, %v8120_v63 }
 0x149   : >> { %7556 = vmatprep.mubr.msk.bf16.mxu1 %vm381_vm0, %v8125_v25  ;;  %v2508_v47 = vsel %vm339_vm10, %v2505_v28, %v2488_v41  ;;  %v3013_v46 = vsel %vm330_vm6, %v3010_v50, %v2994_v43 }
 0x14a   : >> { %v3015_v56 = vsel %vm8069_vm9, %v3013_v46, %v2995_v4 }
 0x14c   : >> { %v2492_v53 = vpop.permute.xlu1 %2491  ;;  %v2490_v51 = vpop.permute.xlu0 %2489  ;;  %7545 = vmatmul.mubr.msk.bf16.gmra.mrb[12].mxu0 %vm381_vm0, %v8146_v32 }
 0x14d   : >> { %v2510_v59 = vsel %vm8077_vm11, %v2508_v47, %v2490_v51  ;;  %7564 = vmatprep.mubr.msk.bf16.mxu0 %vm381_vm0, %v7919_v1  ;;  %v2513_v39 = vsel %vm348_vm13, %v2492_v53, %v2494_v8 }
 0x14e   : >> { %7560 = vmatprep.subr.bf16.mxu0 %v2510_v59 }
 0x14f   : >> { %7561 = vmatpush3.bf16.msra.mxu0 %v2510_v59 }
 0x150   : >> { %v2496_v57 = vpop.permute.xlu1 %2495  ;;  %v2998_v62 = vpop.permute.xlu0 %2997  ;;  %7557 = vmatmul.mubr.msk.bf16.gmra.mrb[12].mxu1 %vm381_vm0, %v8146_v32 }
 0x151   : >> { %7576 = vmatprep.mubr.msk.bf16.mxu1 %vm381_vm0, %v7919_v1  ;;  %v2515_v37 = vsel %vm8098_vm14, %v2513_v39, %v2496_v57  ;;  %v3018_v29 = vsel %vm339_vm10, %v3015_v56, %v2998_v62 }
 0x154   : >> { %v2499_v36 = vpop.permute.xlu1 %2498  ;;  %v3000_v58 = vpop.permute.xlu0 %2999 }
 0x155   : >> { %v2518_v0 = vsel %vm357_vm15, %v2515_v37, %v2499_v36  ;;  %v3020_v48 = vsel %vm8077_vm11, %v3018_v29, %v3000_v58  ;;  %v3023_v26 = vsel %vm348_vm13, %v3000_v58, %v7990_v35 }
 0x156   : >> { %v2519_v2 = vand.u32 %v2518_v0, %v8108_v52  ;;  %7572 = vmatprep.subr.bf16.mxu1 %v3020_v48 }
 0x157   : >> { %7573 = vmatpush3.bf16.msra.mxu1 %v3020_v48 }
 0x158   : >> { %v3009_v61 = vpop.permute.xlu1 %3008  ;;  %7562 = vmatprep.subr.bf16.mxu0 %v2519_v2  ;;  %v3006_v33 = vpop.permute.xlu0 %3005 }
 0x159   : >> { %v3025_v27 = vsel %vm8098_vm14, %v3023_v26, %v3006_v33  ;;  %7563 = vmatpush3.bf16.msra.mxu0 %v2519_v2 }
 0x15a   : >> { %v3028_v44 = vsel %vm357_vm15, %v3025_v27, %v3009_v61 }
 0x15b   : >> { %v3029_v40 = vand.u32 %v3028_v44, %v8108_v52 }
 0x15c   : >> { %v3513_v6 = vpop.permute.xlu1 %3512  ;;  %7565 = vmatmul.mubr.msk.bf16.vlgmr.msra.gmra.mrb[16].mxu0 %vm381_vm0, %v8120_v63  ;;  %v3510_v49 = vpop.permute.xlu0 %3509 }
 0x15d   : >> { %7574 = vmatprep.subr.bf16.mxu1 %v3029_v40  ;;  %7568 = vmatprep.mubr.msk.bf16.mxu0 %vm381_vm0, %v8125_v25  ;;  %v3554_v35 = vsel %vm8064_vm5, %v3499_v38, %v3510_v49 }
 0x15e   : >> { %7575 = vmatpush3.bf16.msra.mxu1 %v3029_v40  ;;  %v3557_v5 = vsel %vm330_vm6, %v3554_v35, %v3513_v6 }
 0x15f   : >> { %v3559_v30 = vsel %vm8069_vm9, %v3557_v5, %v8016_v45  ;;  %v3540_v45 = vrot.slane %v8033_v54, 2 }
 0x160   : >> { %v4051_v28 = vpop.permute.xlu1 %4050  ;;  %v4046_v41 = vpop.permute.xlu0 %4045 }
 0x161   : >> { %v4076_v43 = vsel %vm8064_vm5, %v8022_v34, %v4046_v41  ;;  %7577 = vmatmul.mubr.msk.bf16.vlgmr.msra.gmra.mrb[16].mxu1 %vm381_vm0, %v8120_v63 }
 0x162   : >> { %v4079_v47 = vsel %vm330_vm6, %v4076_v43, %v4051_v28  ;;  %7580 = vmatprep.mubr.msk.bf16.mxu1 %vm381_vm0, %v8125_v25 }
 0x163   : >> { %v4081_v53 = vsel %vm8069_vm9, %v4079_v47, %v4052_v7 }
 0x164   : >> { %v3533_v31 = vpop.permute.xlu1 %3532  ;;  %7569 = vmatmul.mubr.msk.bf16.gmra.mrb[20].mxu0 %vm381_vm0, %v8146_v32  ;;  %v3528_v34 = vpop.permute.xlu0 %3527 }
 0x165   : >> { %v3562_v51 = vsel %vm339_vm10, %v3559_v30, %v3528_v34  ;;  %7588 = vmatprep.mubr.msk.bf16.mxu0 %vm381_vm0, %v7919_v1 }
 0x166   : >> { %v3564_v59 = vsel %vm8077_vm11, %v3562_v51, %v3533_v31 }
 0x167   : >> { %7584 = vmatprep.subr.bf16.mxu0 %v3564_v59 }
 0x168   : >> { %v4058_v50 = vpop.permute.xlu1 %4057  ;;  %7585 = vmatpush3.bf16.msra.mxu0 %v3564_v59  ;;  %v3535_v8 = vpop.permute.xlu0 %3534 }
 0x169   : >> { %7581 = vmatmul.mubr.msk.bf16.gmra.mrb[20].mxu1 %vm381_vm0, %v8146_v32  ;;  %v4084_v55 = vsel %vm339_vm10, %v4081_v53, %v4058_v50  ;;  %v3567_v62 = vsel %vm348_vm13, %v3535_v8, %v3540_v45 }
 0x16a   : >> { %7600 = vmatprep.mubr.msk.bf16.mxu1 %vm381_vm0, %v7919_v1 }
 0x16c   : >> { %v4061_v4 = vpop.permute.xlu1 %4060  ;;  %v3549_v46 = vpop.permute.xlu0 %3548 }
 0x16d   : >> { %v4086_v57 = vsel %vm8077_vm11, %v4084_v55, %v4061_v4  ;;  %v3569_v39 = vsel %vm8098_vm14, %v3567_v62, %v3549_v46 }
 0x16e   : >> { %7596 = vmatprep.subr.bf16.mxu1 %v4086_v57 }
 0x16f   : >> { %7597 = vmatpush3.bf16.msra.mxu1 %v4086_v57 }
 0x170   : >> { %v3553_v56 = vpop.permute.xlu1 %3552  ;;  %v4063_v37 = vpop.permute.xlu0 %4062 }
 0x171   : >> { %v3572_v1 = vsel %vm357_vm15, %v3569_v39, %v3553_v56  ;;  %v4089_v29 = vsel %vm348_vm13, %v4063_v37, %v8044_v3  ;;  %v7696_v3 = vmov 1966171168  }
 0x172   : >> { %v3573_v54 = vand.u32 %v3572_v1, %v8108_v52  ;;  %v474_v42 = vunpack.c.l.s4 %v7696_v3 }
 0x174   : >> { %7586 = vmatprep.subr.bf16.mxu0 %v3573_v54  ;;  %v4070_v36 = vpop.permute.xlu0 %4069  ;;  %v4075_v60 = vpop.permute.xlu1 %4074  ;;  %v475_v2 = vunpack.c.0.s8 %v474_v42 }
 0x175   : >> { %v4091_v58 = vsel %vm8098_vm14, %v4089_v29, %v4070_v36  ;;  %7587 = vmatpush3.bf16.msra.mxu0 %v3573_v54 }
 0x176   : >> { %v4094_v0 = vsel %vm357_vm15, %v4091_v58, %v4075_v60 }
 0x177   : >> { %v4095_v48 = vand.u32 %v4094_v0, %v8108_v52  ;;  %v476_v52 = vlaneseq }
 0x178   : >> { %7589 = vmatmul.mubr.msk.bf16.vlgmr.msra.gmra.mrb[24].mxu0 %vm381_vm0, %v8120_v63 }
 0x179   : >> { %7598 = vmatprep.subr.bf16.mxu1 %v4095_v48  ;;  %7592 = vmatprep.mubr.msk.bf16.mxu0 %vm381_vm0, %v8125_v25  ;;  %v477_v26 = vshrl.u32 %v476_v52, 7 }
 0x17a   : >> { %7599 = vmatpush3.bf16.msra.mxu1 %v4095_v48 }
 0x17b   : >> { %v8291_v27 = vsub.s32 %v475_v2, %v477_v26  ;;  %v8297_v28 = vsub.s32 0, %v477_v26 }
 0x17d   : >> { %7601 = vmatmul.mubr.msk.bf16.vlgmr.msra.gmra.mrb[24].mxu1 %vm381_vm0, %v8120_v63 }
 0x17e   : >> { %7604 = vmatprep.mubr.msk.bf16.mxu1 %vm381_vm0, %v8125_v25 }
 0x180   : >> { %7593 = vmatmul.mubr.msk.bf16.gmra.mrb[28].mxu0 %vm381_vm0, %v8146_v32 }
 0x185   : >> { %7605 = vmatmul.mubr.msk.bf16.gmra.mrb[28].mxu1 %vm381_vm0, %v8146_v32  ;;  %vm7187_vm0 = vcmask 1046528  }
 0x1ff   : >> { %v7518_v61 = vpop.f32.mrb[0].mxu0 }
 0x200   : >> { %v442_v33 = vadd.f32 %v7518_v61, %v11501_v17  ;;  %v433_v63 = vpop.f32.mrb[1].mxu0 }
 0x201   : >> { %v434_v44 = vadd.f32 %v433_v63, %v11502_v18  ;;  %v7519_v25 = vpop.f32.mrb[2].mxu0 }
 0x202   : >> { %v570_v38 = vcombine.high %v442_v33, %v442_v33  ;;  %v577_v40 = vrot.slane %v442_v33, %v8291_v27  ;;  %v445_v6 = vadd.f32 %v7519_v25, %v11500_v19  ;;  %v436_v32 = vpop.f32.mrb[3].mxu0 }
 0x203   : >> { %v472_v49 = vcombine.high %v434_v44, %v434_v44  ;;  %v479_v35 = vrot.slane %v434_v44, %v8291_v27  ;;  %v7530_v7 = vpop.f32.mrb[0].mxu1  ;;  %v8300_v41 = vadd.f32 %v436_v32, %v11507_v20 }
 0x204   : >> { %v584_v5 = vrot.slane %v570_v38, %v8291_v27  ;;  %v585_v43 = vcombine.high %v577_v40, %v577_v40  ;;  %v8304_v47 = vrot.slane %v577_v40, %v8291_v27  ;;  %v1025_v53 = vadd.f32 %v7530_v7, %v11501_v17  ;;  %v1016_v31 = vpop.f32.mrb[1].mxu1 }
 0x205   : >> { %v486_v30 = vrot.slane %v472_v49, %v8291_v27  ;;  %v487_v34 = vcombine.high %v479_v35, %v479_v35  ;;  %v8309_v51 = vrot.slane %v479_v35, %v8291_v27  ;;  %v619_v59 = vcombine.high %v445_v6, %v445_v6  ;;  %v8311_v50 = vpop.f32.mrb[2].mxu1 }
 0x206   : >> { %v586_v8 = vcombine.high %v584_v5, %v584_v5  ;;  %v600_v45 = vrot.slane %v584_v5, %v8291_v27  ;;  %v607_v55 = vrot.slane %v585_v43, %v8291_v27  ;;  %v615_v4 = vcombine.high %v8304_v47, %v8304_v47  ;;  %v8317_v46 = vpop.f32.mrb[3].mxu1 }
 0x207   : >> { %v488_v57 = vcombine.high %v486_v30, %v486_v30  ;;  %v8320_v62 = vrot.slane %v486_v30, %v8291_v27  ;;  %v8323_v39 = vrot.slane %v487_v34, %v8291_v27  ;;  %v1153_v29 = vcombine.high %v1025_v53, %v1025_v53 }
 0x208   : >> { %v614_v37 = vrot.slane %v586_v8, %v8291_v27  ;;  %v616_v1 = vcombine.high %v600_v45, %v600_v45  ;;  %v617_v54 = vcombine.high %v607_v55, %v607_v55  ;;  %v7522_v36 = vpop.f32.mrb[4].mxu0  ;;  %v1160_v48 = vrot.slane %v1025_v53, %v8291_v27 }
 0x209   : >> { %v8329_v60 = vrot.slane %v488_v57, %v8291_v27  ;;  %v8336_v3 = vpop.f32.mrb[5].mxu0  ;;  %v1167_v52 = vrot.slane %v1153_v29, %v8291_v27  ;;  %v626_v2 = vrot.slane %v445_v6, %v8291_v27  ;;  %v633_v26 = vrot.slane %v619_v59, %v8291_v27 }
 0x20a   : >> { %v618_v42 = vcombine.high %v614_v37, %v614_v37  ;;  %v8341_v61 = vpop.f32.mrb[6].mxu0  ;;  %v1168_v63 = vcombine.high %v1160_v48, %v1160_v48  ;;  %v1176_v44 = vrot.slane %v1160_v48, %v8291_v27  ;;  %v1017_v25 = vadd.f32 %v1016_v31, %v11502_v18 }
 0x20b   : >> { %v8347_v38 = vpop.f32.mrb[4].mxu1  ;;  %v8349_v40 = vpop.f32.mrb[7].mxu0  ;;  %v1169_v32 = vcombine.high %v1167_v52, %v1167_v52  ;;  %v1183_v49 = vrot.slane %v1167_v52, %v8291_v27  ;;  %v634_v6 = vcombine.high %v626_v2, %v626_v2  ;;  %v635_v35 = vcombine.high %v633_v26, %v633_v26 }
 0x20c   : >> { %v8352_v7 = vpop.f32.mrb[5].mxu1  ;;  %v1190_v5 = vrot.slane %v1168_v63, %v8291_v27  ;;  %v1198_v43 = vcombine.high %v1176_v44, %v1176_v44  ;;  %v4629_v53 = vrot.slane %v1176_v44, %v8297_v28  ;;  %v8357_v30 = vrot.slane %v626_v2, %v8291_v27 }
 0x20d   : >> { %v8359_v31 = vpop.f32.mrb[6].mxu1  ;;  %v1197_v34 = vrot.slane %v1169_v32, %v8291_v27  ;;  %v1199_v59 = vcombine.high %v1183_v49, %v1183_v49  ;;  %v4645_v8 = vrot.slane %v1183_v49, %v8297_v28  ;;  %v8364_v57 = vrot.slane %v633_v26, %v8291_v27 }
 0x20e   : >> { %v8366_v29 = vpop.f32.mrb[7].mxu1  ;;  %v1200_v48 = vcombine.high %v1190_v5, %v1190_v5  ;;  %v4633_v52 = vrot.slane %v1190_v5, %v8297_v28  ;;  %v4637_v63 = vrot.slane %v1198_v43, %v8297_v28  ;;  %v8372_v2 = vsel %vm348_vm13, %v8304_v47, %v4629_v53 }
 0x20f   : >> { %v1201_v44 = vcombine.high %v1197_v34, %v1197_v34  ;;  %v4649_v32 = vrot.slane %v1197_v34, %v8297_v28  ;;  %v4653_v33 = vrot.slane %v1199_v59, %v8297_v28  ;;  %v8377_v49 = vsel %vm348_vm13, %v600_v45, %v4645_v8 }
 0x210   : >> { %v4641_v26 = vrot.slane %v1200_v48, %v8297_v28  ;;  %v8381_v58 = vsel %vm348_vm13, %v607_v55, %v4633_v52  ;;  %v8384_v5 = vsel %vm348_vm13, %v615_v4, %v4637_v63  ;;  %v8387_v43 = vrot.slane %v634_v6, %v8291_v27 }
 0x211   : >> { %v4657_v47 = vrot.slane %v1201_v44, %v8297_v28  ;;  %v8391_v53 = vsel %vm348_vm13, %v614_v37, %v4649_v32  ;;  %v8394_v34 = vsel %vm348_vm13, %v616_v1, %v4653_v33  ;;  %v8397_v45 = vrot.slane %v635_v35, %v8291_v27 }
 0x212   : >> { %v8400_v55 = vsel %vm348_vm13, %v617_v54, %v4641_v26  ;;  %v1055_v33 = vcombine.high %v1017_v25, %v1017_v25  ;;  %v1062_v35 = vrot.slane %v1017_v25, %v8291_v27  ;;  %v521_v54 = vcombine.high %v8300_v41, %v8300_v41 }
 0x213   : >> { %v8409_v37 = vsel %vm348_vm13, %v618_v42, %v4657_v47  ;;  %v528_v8 = vrot.slane %v8300_v41, %v8291_v27  ;;  %v1028_v48 = vadd.f32 %v8311_v50, %v11500_v19  ;;  %v8421_v52 = vadd.f32 %v7522_v36, %v11506_v24 }
 0x214   : >> { %v1069_v42 = vrot.slane %v1055_v33, %v8291_v27  ;;  %v1070_v63 = vcombine.high %v1062_v35, %v1062_v35  ;;  %v1078_v44 = vrot.slane %v1062_v35, %v8291_v27  ;;  %v8427_v25 = vadd.f32 %v8317_v46, %v11507_v20 }
 0x215   : >> { %v535_v32 = vrot.slane %v521_v54, %v8291_v27  ;;  %v536_v26 = vcombine.high %v528_v8, %v528_v8  ;;  %v8431_v41 = vrot.slane %v528_v8, %v8291_v27  ;;  %v1202_v47 = vcombine.high %v1028_v48, %v1028_v48 }
 0x216   : >> { %v1071_v36 = vcombine.high %v1069_v42, %v1069_v42  ;;  %v1085_v1 = vrot.slane %v1069_v42, %v8291_v27  ;;  %v1092_v33 = vrot.slane %v1070_v63, %v8291_v27  ;;  %v1100_v59 = vcombine.high %v1078_v44, %v1078_v44 }
 0x217   : >> { %v8433_v50 = vpop.f32.mrb[8].mxu0  ;;  %v4565_v46 = vrot.slane %v1078_v44, %v8297_v28  ;;  %v537_v6 = vcombine.high %v535_v32, %v535_v32  ;;  %v8441_v54 = vrot.slane %v535_v32, %v8291_v27  ;;  %v8444_v8 = vrot.slane %v536_v26, %v8291_v27 }
 0x218   : >> { %v8437_v35 = vpop.f32.mrb[9].mxu0  ;;  %v1099_v0 = vrot.slane %v1071_v36, %v8291_v27  ;;  %v1101_v56 = vcombine.high %v1085_v1, %v1085_v1  ;;  %v1102_v42 = vcombine.high %v1092_v33, %v1092_v33  ;;  %v4569_v63 = vrot.slane %v1092_v33, %v8297_v28 }
 0x219   : >> { %v8446_v4 = vpop.f32.mrb[10].mxu0  ;;  %v4573_v10 = vrot.slane %v1100_v59, %v8297_v28  ;;  %v4581_v44 = vrot.slane %v1085_v1, %v8297_v28  ;;  %v8456_v32 = vsel %vm348_vm13, %v8309_v51, %v4565_v46  ;;  %v8459_v26 = vrot.slane %v537_v6, %v8291_v27 }
 0x21a   : >> { %v8450_v9 = vpop.f32.mrb[11].mxu0  ;;  %v1103_v36 = vcombine.high %v1099_v0, %v1099_v0  ;;  %v4577_v12 = vrot.slane %v1102_v42, %v8297_v28  ;;  %v4585_v33 = vrot.slane %v1099_v0, %v8297_v28  ;;  %v4589_v13 = vrot.slane %v1101_v56, %v8297_v28 }
 0x21b   : >> { %11524 = vst [vmem:[#allocation18_spill] sm:$0xff] %v8450_v9  ;;  %v8461_v11 = vpop.f32.mrb[8].mxu1  ;;  %v8470_v59 = vsel %vm348_vm13, %v8323_v39, %v4569_v63  ;;  %v11525_v1 = vcombine.high %v8309_v51, %v8309_v51  ;;  %v8480_v46 = vsel %vm348_vm13, %v8320_v62, %v4581_v44  ;;  %v11527_v63 = vcombine.high %v8323_v39, %v8323_v39 }
 0x21c   : >> { %v8466_v14 = vpop.f32.mrb[9].mxu1  ;;  %v4593_v42 = vrot.slane %v1103_v36, %v8297_v28  ;;  %v11529_v51 = vcombine.high %v8320_v62, %v8320_v62  ;;  %v11532_v62 = vcombine.high %v8329_v60, %v8329_v60  ;;  %v766_v36 = vcombine.high %v8421_v52, %v8421_v52 }
 0x21d   : >> { %v8476_v6 = vsel %vm348_vm13, %v11525_v1, %v4573_v10  ;;  %v8484_v56 = vpop.f32.mrb[10].mxu1  ;;  %v8491_v15 = vsel %vm348_vm13, %v11527_v63, %v4577_v12  ;;  %v8495_v10 = vsel %vm348_vm13, %v8329_v60, %v4585_v33  ;;  %v1209_v33 = vrot.slane %v1028_v48, %v8291_v27 }
 0x21e   : >> { %11526 = vst [vmem:[#allocation19_spill] sm:$0xff] %v8484_v56  ;;  %11528 = vst [vmem:[#allocation20_spill] sm:$0xff] %v8491_v15  ;;  %v8501_v44 = vsel %vm348_vm13, %v11529_v51, %v4589_v13  ;;  %v8503_v1 = vpop.f32.mrb[11].mxu1  ;;  %v8518_v13 = vsel %vm348_vm13, %v11532_v62, %v4593_v42  ;;  %v1216_v51 = vrot.slane %v1202_v47, %v8291_v27 }
 0x21f   : >> { %11530 = vst [vmem:[#allocation21_spill] sm:$0xff] %v8503_v1  ;;  %v8512_v63 = vpop.f32.mrb[12].mxu0  ;;  %11533 = vst [vmem:[#allocation23_spill] sm:$0xff] %v8518_v13  ;;  %v773_v39 = vrot.slane %v8421_v52, %v8291_v27  ;;  %v1217_v12 = vcombine.high %v1209_v33, %v1209_v33  ;;  %v1225_v48 = vrot.slane %v1209_v33, %v8291_v27 }
 0x220   : >> { %11531 = vst [vmem:[#allocation22_spill] sm:$0xff] %v8512_v63  ;;  %v8525_v0 = vpop.f32.mrb[13].mxu0  ;;  %v1104_v16 = vcombine.high %v8427_v25, %v8427_v25  ;;  %v1111_v60 = vrot.slane %v8427_v25, %v8291_v27  ;;  %v1218_v47 = vcombine.high %v1216_v51, %v1216_v51  ;;  %v1232_v62 = vrot.slane %v1216_v51, %v8291_v27 }
 0x221   : >> { %11534 = vst [vmem:[#allocation24_spill] sm:$0xff] %v8525_v0  ;;  %v8532_v42 = vpop.f32.mrb[14].mxu0  ;;  %v780_v63 = vrot.slane %v766_v36, %v8291_v27  ;;  %v781_v1 = vcombine.high %v773_v39, %v773_v39  ;;  %v1239_v52 = vrot.slane %v1217_v12, %v8291_v27  ;;  %v1247_v0 = vcombine.high %v1225_v48, %v1225_v48 }
 0x222   : >> { %11535 = vst [vmem:[#allocation25_spill] sm:$0xff] %v8532_v42  ;;  %v4661_v56 = vrot.slane %v1225_v48, %v8297_v28  ;;  %v8539_v33 = vrot.slane %v773_v39, %v8291_v27  ;;  %v1246_v25 = vrot.slane %v1218_v47, %v8291_v27  ;;  %v1248_v20 = vcombine.high %v1232_v62, %v1232_v62 }
 0x223   : >> { %v8541_v9 = vpop.f32.mrb[12].mxu1  ;;  %v4677_v42 = vrot.slane %v1232_v62, %v8297_v28  ;;  %v782_v13 = vcombine.high %v780_v63, %v780_v63  ;;  %v1249_v51 = vcombine.high %v1239_v52, %v1239_v52  ;;  %v4665_v36 = vrot.slane %v1239_v52, %v8297_v28 }
 0x224   : >> { %11536 = vst [vmem:[#allocation26_spill] sm:$0xff] %v8541_v9  ;;  %v4669_v15 = vrot.slane %v1247_v0, %v8297_v28  ;;  %v8549_v12 = vsel %vm348_vm13, %v8357_v30, %v4661_v56  ;;  %v1250_v48 = vcombine.high %v1246_v25, %v1246_v25  ;;  %v4681_v39 = vrot.slane %v1246_v25, %v8297_v28 }
 0x225   : >> { %v4685_v9 = vrot.slane %v1248_v20, %v8297_v28  ;;  %v8555_v47 = vsel %vm348_vm13, %v8364_v57, %v4677_v42  ;;  %v4673_v62 = vrot.slane %v1249_v51, %v8297_v28  ;;  %v8560_v52 = vsel %vm348_vm13, %v8387_v43, %v4665_v36 }
 0x226   : >> { %v11537_v0 = vcombine.high %v8357_v30, %v8357_v30  ;;  %v8569_v25 = vrot.slane %v780_v63, %v8291_v27  ;;  %v4689_v20 = vrot.slane %v1250_v48, %v8297_v28  ;;  %v8574_v42 = vsel %vm348_vm13, %v8397_v45, %v4681_v39 }
 0x227   : >> { %11538 = vst [vmem:[#allocation27_spill] sm:$0xff] %v8574_v42  ;;  %v11539_v51 = vcombine.high %v8364_v57, %v8364_v57  ;;  %v8583_v30 = vrot.slane %v781_v1, %v8291_v27  ;;  %v8592_v48 = vrot.slane %v782_v13, %v8291_v27  ;;  %v11544_v1 = vcombine.high %v8397_v45, %v8397_v45  ;;  %v8634_v42 = vpop.f32.mrb[15].mxu0 }
 0x228   : >> { %v8566_v56 = vsel %vm348_vm13, %v11537_v0, %v4669_v15  ;;  %v11541_v15 = vcombine.high %v8387_v43, %v8387_v43  ;;  %v1118_v13 = vrot.slane %v1104_v16, %v8291_v27  ;;  %v450_v57 = vadd.f32 %v8336_v3, %v11505_v22  ;;  %11546 = vst [vmem:[#allocation32_spill] sm:$0xff] %v8634_v42 }
 0x229   : >> { %v8580_v36 = vsel %vm348_vm13, %v11539_v51, %v4685_v9  ;;  %v8598_v9 = vpop.f32.mrb[13].mxu1  ;;  %v8604_v0 = vsel %vm348_vm13, %v11544_v1, %v4689_v20  ;;  %v1041_v45 = vadd.f32 %v8347_v38, %v11506_v24  ;;  %v461_v16 = vadd.f32 %v8341_v61, %v11504_v23 }
 0x22a   : >> { %11540 = vst [vmem:[#allocation28_spill] sm:$0xff] %v8580_v36  ;;  %v8589_v63 = vsel %vm348_vm13, %v11541_v15, %v4673_v62  ;;  %11543 = vst [vmem:[#allocation30_spill] sm:$0xff] %v8598_v9  ;;  %v1119_v62 = vcombine.high %v1111_v60, %v1111_v60  ;;  %v1127_v15 = vrot.slane %v1111_v60, %v8291_v27 }
 0x22b   : >> { %11542 = vst [vmem:[#allocation29_spill] sm:$0xff] %v8589_v63  ;;  %11545 = vst [vmem:[#allocation31_spill] sm:$0xff] %v8604_v0  ;;  %v1120_v39 = vcombine.high %v1118_v13, %v1118_v13  ;;  %v1134_v20 = vrot.slane %v1118_v13, %v8291_v27  ;;  %v668_v51 = vcombine.high %v450_v57, %v450_v57 }
 0x22c   : >> { %v1141_v1 = vrot.slane %v1119_v62, %v8291_v27  ;;  %v1149_v43 = vcombine.high %v1127_v15, %v1127_v15  ;;  %v4597_v9 = vrot.slane %v1127_v15, %v8297_v28  ;;  %v675_v60 = vrot.slane %v450_v57, %v8291_v27 }
 0x22d   : >> { %v1148_v0 = vrot.slane %v1120_v39, %v8291_v27  ;;  %v1150_v3 = vcombine.high %v1134_v20, %v1134_v20  ;;  %v4613_v13 = vrot.slane %v1134_v20, %v8297_v28  ;;  %v682_v61 = vrot.slane %v668_v51, %v8291_v27 }
 0x22e   : >> { %v1151_v36 = vcombine.high %v1141_v1, %v1141_v1  ;;  %v4601_v38 = vrot.slane %v1141_v1, %v8297_v28  ;;  %v4605_v24 = vrot.slane %v1149_v43, %v8297_v28  ;;  %v8628_v62 = vsel %vm348_vm13, %v8431_v41, %v4597_v9 }
 0x22f   : >> { %v1152_v15 = vcombine.high %v1148_v0, %v1148_v0  ;;  %v4617_v57 = vrot.slane %v1148_v0, %v8297_v28  ;;  %v4621_v39 = vrot.slane %v1150_v3, %v8297_v28  ;;  %v11547_v20 = vcombine.high %v8431_v41, %v8431_v41 }
 0x230   : >> { %v4609_v63 = vrot.slane %v1151_v36, %v8297_v28  ;;  %v8638_v43 = vsel %vm348_vm13, %v8444_v8, %v4601_v38  ;;  %v8648_v51 = vsel %vm348_vm13, %v8441_v54, %v4613_v13  ;;  %v683_v36 = vcombine.high %v675_v60, %v675_v60 }
 0x231   : >> { %v8644_v9 = vsel %vm348_vm13, %v11547_v20, %v4605_v24  ;;  %11549 = vst [vmem:[#allocation34_spill] sm:$0xff] %v8648_v51  ;;  %v4625_v0 = vrot.slane %v1152_v15, %v8297_v28  ;;  %v11550_v1 = vcombine.high %v8444_v8, %v8444_v8  ;;  %v8659_v38 = vsel %vm348_vm13, %v8459_v26, %v4617_v57 }
 0x232   : >> { %11548 = vst [vmem:[#allocation33_spill] sm:$0xff] %v8644_v9  ;;  %11552 = vst [vmem:[#allocation36_spill] sm:$0xff] %v8659_v38  ;;  %v11553_v24 = vcombine.high %v8441_v54, %v8441_v54  ;;  %v684_v13 = vcombine.high %v682_v61, %v682_v61  ;;  %v8668_v20 = vrot.slane %v675_v60, %v8291_v27 }
 0x233   : >> { %v8655_v3 = vsel %vm348_vm13, %v11550_v1, %v4609_v63  ;;  %v8671_v15 = vrot.slane %v682_v61, %v8291_v27  ;;  %v8674_v8 = vrot.slane %v683_v36, %v8291_v27  ;;  %v11555_v63 = vcombine.high %v8459_v26, %v8459_v26 }
 0x234   : >> { %11551 = vst [vmem:[#allocation35_spill] sm:$0xff] %v8655_v3  ;;  %v8665_v41 = vsel %vm348_vm13, %v11553_v24, %v4621_v39  ;;  %v1349_v54 = vcombine.high %v1041_v45, %v1041_v45  ;;  %v1356_v39 = vrot.slane %v1041_v45, %v8291_v27  ;;  %v815_v1 = vcombine.high %v461_v16, %v461_v16 }
 0x235   : >> { %11554 = vst [vmem:[#allocation37_spill] sm:$0xff] %v8665_v41  ;;  %v8680_v57 = vsel %vm348_vm13, %v11555_v63, %v4625_v0  ;;  %v8684_v24 = vrot.slane %v684_v13, %v8291_v27  ;;  %v822_v45 = vrot.slane %v461_v16, %v8291_v27  ;;  %v1033_v60 = vadd.f32 %v8352_v7, %v11505_v22 }
 0x236   : >> { %11556 = vst [vmem:[#allocation38_spill] sm:$0xff] %v8680_v57  ;;  %v1363_v26 = vrot.slane %v1349_v54, %v8291_v27  ;;  %v1364_v0 = vcombine.high %v1356_v39, %v1356_v39  ;;  %v1372_v63 = vrot.slane %v1356_v39, %v8291_v27  ;;  %v829_v42 = vrot.slane %v815_v1, %v8291_v27  ;;  %v8704_v39 = vpop.f32.mrb[14].mxu1 }
 0x237   : >> { %v453_v61 = vadd.f32 %v8349_v40, %v11503_v21  ;;  %11557 = vst [vmem:[#allocation39_spill] sm:$0xff] %v8704_v39  ;;  %v830_v3 = vcombine.high %v822_v45, %v822_v45  ;;  %v8708_v1 = vrot.slane %v822_v45, %v8291_v27 }
 0x238   : >> { %v1365_v57 = vcombine.high %v1363_v26, %v1363_v26  ;;  %v1379_v36 = vrot.slane %v1363_v26, %v8291_v27  ;;  %v1386_v54 = vrot.slane %v1364_v0, %v8291_v27  ;;  %v1394_v41 = vcombine.high %v1372_v63, %v1372_v63 }
 0x239   : >> { %v4757_v16 = vrot.slane %v1372_v63, %v8297_v28  ;;  %v831_v13 = vcombine.high %v829_v42, %v829_v42  ;;  %v8719_v63 = vrot.slane %v829_v42, %v8291_v27 }
 0x23a   : >> { %v1393_v7 = vrot.slane %v1365_v57, %v8291_v27  ;;  %v1395_v22 = vcombine.high %v1379_v36, %v1379_v36  ;;  %v1396_v9 = vcombine.high %v1386_v54, %v1386_v54  ;;  %v4761_v40 = vrot.slane %v1386_v54, %v8297_v28 }
 0x23b   : >> { %v4765_v26 = vrot.slane %v1394_v41, %v8297_v28  ;;  %v4773_v0 = vrot.slane %v1379_v36, %v8297_v28  ;;  %v8716_v39 = vsel %vm348_vm13, %v8539_v33, %v4757_v16  ;;  %v11558_v41 = vcombine.high %v8539_v33, %v8539_v33 }
 0x23c   : >> { %v1397_v38 = vcombine.high %v1393_v7, %v1393_v7  ;;  %v4769_v45 = vrot.slane %v1396_v9, %v8297_v28  ;;  %v4777_v57 = vrot.slane %v1393_v7, %v8297_v28  ;;  %v4781_v51 = vrot.slane %v1395_v22, %v8297_v28 }
 0x23d   : >> { %v8726_v54 = vsel %vm348_vm13, %v8583_v30, %v4761_v40  ;;  %v8732_v36 = vsel %vm348_vm13, %v11558_v41, %v4765_v26  ;;  %v8736_v42 = vsel %vm348_vm13, %v8569_v25, %v4773_v0  ;;  %v8739_v9 = vrot.slane %v830_v3, %v8291_v27 }
 0x23e   : >> { %11559 = vst [vmem:[#allocation40_spill] sm:$0xff] %v8736_v42  ;;  %v4785_v16 = vrot.slane %v1397_v38, %v8297_v28  ;;  %v11560_v22 = vcombine.high %v8583_v30, %v8583_v30  ;;  %v8750_v33 = vsel %vm348_vm13, %v8592_v48, %v4777_v57  ;;  %v11563_v40 = vcombine.high %v8569_v25, %v8569_v25  ;;  %v8781_v30 = vpop.f32.mrb[15].mxu1 }
 0x23f   : >> { %11562 = vst [vmem:[#allocation42_spill] sm:$0xff] %v8750_v33  ;;  %v8759_v3 = vrot.slane %v831_v13, %v8291_v27  ;;  %v1258_v57 = vrot.slane %v1033_v60, %v8291_v27  ;;  %v717_v13 = vcombine.high %v453_v61, %v453_v61  ;;  %v1036_v0 = vadd.f32 %v8366_v29, %v11503_v21 }
 0x240   : >> { %v8746_v7 = vsel %vm348_vm13, %v11560_v22, %v4769_v45  ;;  %v8756_v26 = vsel %vm348_vm13, %v11563_v40, %v4781_v51  ;;  %v11565_v45 = vcombine.high %v8592_v48, %v8592_v48  ;;  %v1251_v51 = vcombine.high %v1033_v60, %v1033_v60  ;;  %11567 = vst [vmem:[#allocation45_spill] sm:$0xff] %v8781_v30 }
 0x241   : >> { %11561 = vst [vmem:[#allocation41_spill] sm:$0xff] %v8746_v7  ;;  %11564 = vst [vmem:[#allocation43_spill] sm:$0xff] %v8756_v26  ;;  %v724_v22 = vrot.slane %v453_v61, %v8291_v27  ;;  %v1044_v40 = vadd.f32 %v8359_v31, %v11504_v23  ;;  %v731_v60 = vrot.slane %v717_v13, %v8291_v27 }
 0x242   : >> { %v8771_v25 = vsel %vm348_vm13, %v11565_v45, %v4785_v16  ;;  %v1265_v48 = vrot.slane %v1251_v51, %v8291_v27  ;;  %v1266_v16 = vcombine.high %v1258_v57, %v1258_v57  ;;  %v1274_v45 = vrot.slane %v1258_v57, %v8291_v27 }
 0x243   : >> { %11566 = vst [vmem:[#allocation44_spill] sm:$0xff] %v8771_v25  ;;  %v732_v38 = vcombine.high %v724_v22, %v724_v22  ;;  %v8787_v41 = vrot.slane %v724_v22, %v8291_v27  ;;  %v1398_v61 = vcombine.high %v1044_v40, %v1044_v40  ;;  %v1405_v25 = vrot.slane %v1044_v40, %v8291_v27 }
 0x244   : >> { %v1267_v31 = vcombine.high %v1265_v48, %v1265_v48  ;;  %v1281_v23 = vrot.slane %v1265_v48, %v8291_v27  ;;  %v1288_v29 = vrot.slane %v1266_v16, %v8291_v27  ;;  %v1296_v30 = vcombine.high %v1274_v45, %v1274_v45 }
 0x245   : >> { %v4693_v51 = vrot.slane %v1274_v45, %v8297_v28  ;;  %v733_v21 = vcombine.high %v731_v60, %v731_v60  ;;  %v8794_v57 = vrot.slane %v731_v60, %v8291_v27  ;;  %v8797_v13 = vrot.slane %v732_v38, %v8291_v27 }
 0x246   : >> { %v1295_v22 = vrot.slane %v1267_v31, %v8291_v27  ;;  %v1297_v7 = vcombine.high %v1281_v23, %v1281_v23  ;;  %v1298_v26 = vcombine.high %v1288_v29, %v1288_v29  ;;  %v4697_v40 = vrot.slane %v1288_v29, %v8297_v28 }
 0x247   : >> { %v4701_v48 = vrot.slane %v1296_v30, %v8297_v28  ;;  %v4709_v16 = vrot.slane %v1281_v23, %v8297_v28  ;;  %v8805_v45 = vsel %vm348_vm13, %v8668_v20, %v4693_v51  ;;  %v8808_v60 = vrot.slane %v733_v21, %v8291_v27 }
 0x248   : >> { %v1299_v33 = vcombine.high %v1295_v22, %v1295_v22  ;;  %v4705_v38 = vrot.slane %v1298_v26, %v8297_v28  ;;  %v4713_v31 = vrot.slane %v1295_v22, %v8297_v28  ;;  %v4717_v42 = vrot.slane %v1297_v7, %v8297_v28 }
 0x249   : >> { %v8815_v29 = vsel %vm348_vm13, %v8674_v8, %v4697_v40  ;;  %v11568_v23 = vcombine.high %v8668_v20, %v8668_v20  ;;  %v8825_v21 = vsel %vm348_vm13, %v8671_v15, %v4709_v16  ;;  %v11570_v7 = vcombine.high %v8674_v8, %v8674_v8 }
 0x24a   : >> { %v4721_v51 = vrot.slane %v1299_v33, %v8297_v28  ;;  %v8838_v20 = vsel %vm348_vm13, %v8684_v24, %v4713_v31  ;;  %v11572_v40 = vcombine.high %v8671_v15, %v8671_v15  ;;  %v11574_v31 = vcombine.high %v8684_v24, %v8684_v24 }
 0x24b   : >> { %v8821_v30 = vsel %vm348_vm13, %v11568_v23, %v4701_v48  ;;  %v8834_v22 = vsel %vm348_vm13, %v11570_v7, %v4705_v38  ;;  %v1412_v38 = vrot.slane %v1398_v61, %v8291_v27  ;;  %v1413_v15 = vcombine.high %v1405_v25, %v1405_v25 }
 0x24c   : >> { %11569 = vst [vmem:[#allocation46_spill] sm:$0xff] %v8821_v30  ;;  %11571 = vst [vmem:[#allocation47_spill] sm:$0xff] %v8834_v22  ;;  %v8844_v48 = vsel %vm348_vm13, %v11572_v40, %v4717_v42  ;;  %v8857_v23 = vsel %vm348_vm13, %v11574_v31, %v4721_v51  ;;  %v1421_v42 = vrot.slane %v1405_v25, %v8291_v27 }
 0x24d   : >> { %11573 = vst [vmem:[#allocation48_spill] sm:$0xff] %v8844_v48  ;;  %11575 = vst [vmem:[#allocation49_spill] sm:$0xff] %v8857_v23  ;;  %v1300_v7 = vcombine.high %v1036_v0, %v1036_v0  ;;  %v1414_v40 = vcombine.high %v1412_v38, %v1412_v38  ;;  %v1428_v16 = vrot.slane %v1412_v38, %v8291_v27  ;;  %v8869_v48 = vpop.f32.mrb[16].mxu0 }
 0x24e   : >> { %v1307_v33 = vrot.slane %v1036_v0, %v8291_v27  ;;  %v1545_v8 = vadd.f32 %v8433_v50, %v11501_v17  ;;  %v1435_v61 = vrot.slane %v1413_v15, %v8291_v27  ;;  %v1443_v26 = vcombine.high %v1421_v42, %v1421_v42  ;;  %11576 = vst [vmem:[#allocation50_spill] sm:$0xff] %v8869_v48  ;;  %v8883_v30 = vpop.f32.mrb[17].mxu0 }
 0x24f   : >> { %v4789_v24 = vrot.slane %v1421_v42, %v8297_v28  ;;  %v1314_v51 = vrot.slane %v1300_v7, %v8291_v27  ;;  %v1442_v31 = vrot.slane %v1414_v40, %v8291_v27  ;;  %v1444_v23 = vcombine.high %v1428_v16, %v1428_v16  ;;  %11577 = vst [vmem:[#allocation51_spill] sm:$0xff] %v8883_v30 }
 0x250   : >> { %v4805_v25 = vrot.slane %v1428_v16, %v8297_v28  ;;  %v1315_v22 = vcombine.high %v1307_v33, %v1307_v33  ;;  %v1445_v38 = vcombine.high %v1435_v61, %v1435_v61  ;;  %v4793_v0 = vrot.slane %v1435_v61, %v8297_v28 }
 0x251   : >> { %v4797_v50 = vrot.slane %v1443_v26, %v8297_v28  ;;  %v8875_v15 = vsel %vm348_vm13, %v8708_v1, %v4789_v24  ;;  %v1446_v42 = vcombine.high %v1442_v31, %v1442_v31  ;;  %v4809_v7 = vrot.slane %v1442_v31, %v8297_v28 }
 0x252   : >> { %v4813_v40 = vrot.slane %v1444_v23, %v8297_v28  ;;  %v8881_v16 = vsel %vm348_vm13, %v8719_v63, %v4805_v25  ;;  %v4801_v48 = vrot.slane %v1445_v38, %v8297_v28  ;;  %v8888_v26 = vsel %vm348_vm13, %v8739_v9, %v4793_v0 }
 0x253   : >> { %v11578_v61 = vcombine.high %v8708_v1, %v8708_v1  ;;  %v1316_v31 = vcombine.high %v1314_v51, %v1314_v51  ;;  %v4817_v23 = vrot.slane %v1446_v42, %v8297_v28  ;;  %v8899_v25 = vsel %vm348_vm13, %v8759_v3, %v4809_v7 }
 0x254   : >> { %11579 = vst [vmem:[#allocation52_spill] sm:$0xff] %v8899_v25  ;;  %v11580_v38 = vcombine.high %v8719_v63, %v8719_v63  ;;  %v1323_v0 = vrot.slane %v1307_v33, %v8291_v27  ;;  %v11582_v1 = vcombine.high %v8739_v9, %v8739_v9  ;;  %v1330_v42 = vrot.slane %v1314_v51, %v8291_v27 }
 0x255   : >> { %v8894_v24 = vsel %vm348_vm13, %v11578_v61, %v4797_v50  ;;  %v1337_v61 = vrot.slane %v1315_v22, %v8291_v27  ;;  %v1344_v7 = vrot.slane %v1316_v31, %v8291_v27  ;;  %v11583_v63 = vcombine.high %v8759_v3, %v8759_v3 }
 0x256   : >> { %v8905_v30 = vsel %vm348_vm13, %v11580_v38, %v4813_v40  ;;  %v8912_v50 = vsel %vm348_vm13, %v11582_v1, %v4801_v48  ;;  %v1345_v38 = vcombine.high %v1323_v0, %v1323_v0  ;;  %v4725_v33 = vrot.slane %v1323_v0, %v8297_v28 }
 0x257   : >> { %11581 = vst [vmem:[#allocation53_spill] sm:$0xff] %v8905_v30  ;;  %v8921_v40 = vsel %vm348_vm13, %v11583_v63, %v4817_v23  ;;  %v1673_v30 = vcombine.high %v1545_v8, %v1545_v8  ;;  %v1346_v9 = vcombine.high %v1330_v42, %v1330_v42  ;;  %v1347_v25 = vcombine.high %v1337_v61, %v1337_v61  ;;  %v8932_v23 = vpop.f32.mrb[18].mxu0 }
 0x258   : >> { %11584 = vst [vmem:[#allocation54_spill] sm:$0xff] %v8921_v40  ;;  %v1348_v48 = vcombine.high %v1344_v7, %v1344_v7  ;;  %v4729_v1 = vrot.slane %v1337_v61, %v8297_v28  ;;  %v4733_v51 = vrot.slane %v1345_v38, %v8297_v28  ;;  %v4741_v22 = vrot.slane %v1330_v42, %v8297_v28 }
 0x259   : >> { %v4745_v31 = vrot.slane %v1344_v7, %v8297_v28  ;;  %v8930_v3 = vsel %vm348_vm13, %v8787_v41, %v4725_v33  ;;  %11585 = vst [vmem:[#allocation55_spill] sm:$0xff] %v8932_v23  ;;  %v4737_v0 = vrot.slane %v1347_v25, %v8297_v28  ;;  %v4749_v63 = vrot.slane %v1346_v9, %v8297_v28  ;;  %v8994_v23 = vpop.f32.mrb[19].mxu0 }
 0x25a   : >> { %v4753_v40 = vrot.slane %v1348_v48, %v8297_v28  ;;  %v8939_v61 = vsel %vm348_vm13, %v8797_v13, %v4729_v1  ;;  %v11586_v42 = vcombine.high %v8787_v41, %v8787_v41  ;;  %v8949_v38 = vsel %vm348_vm13, %v8794_v57, %v4741_v22  ;;  %11592 = vst [vmem:[#allocation58_spill] sm:$0xff] %v8994_v23  ;;  %v9038_v23 = vpop.f32.mrb[16].mxu1 }
 0x25b   : >> { %v8953_v25 = vsel %vm348_vm13, %v8808_v60, %v4745_v31  ;;  %v1680_v33 = vrot.slane %v1545_v8, %v8291_v27  ;;  %v11587_v9 = vcombine.high %v8797_v13, %v8797_v13  ;;  %v11589_v41 = vcombine.high %v8794_v57, %v8794_v57  ;;  %11593 = vst [vmem:[#allocation59_spill] sm:$0xff] %v9038_v23 }
 0x25c   : >> { %v8945_v7 = vsel %vm348_vm13, %v11586_v42, %v4733_v51  ;;  %v11590_v51 = vcombine.high %v8808_v60, %v8808_v60  ;;  %v1687_v8 = vrot.slane %v1673_v30, %v8291_v27  ;;  %v2054_v57 = vadd.f32 %v8461_v11, %v11501_v17 }
 0x25d   : >> { %v8960_v48 = vsel %vm348_vm13, %v11587_v9, %v4737_v0  ;;  %v8966_v1 = vsel %vm348_vm13, %v11589_v41, %v4749_v63  ;;  %v1688_v31 = vcombine.high %v1680_v33, %v1680_v33  ;;  %v1696_v13 = vrot.slane %v1680_v33, %v8291_v27 }
 0x25e   : >> { %11588 = vst [vmem:[#allocation56_spill] sm:$0xff] %v8960_v48  ;;  %v8972_v22 = vsel %vm348_vm13, %v11590_v51, %v4753_v40  ;;  %v1537_v0 = vadd.f32 %v8437_v35, %v11502_v18  ;;  %v1689_v42 = vcombine.high %v1687_v8, %v1687_v8  ;;  %v1703_v63 = vrot.slane %v1687_v8, %v8291_v27 }
 0x25f   : >> { %11591 = vst [vmem:[#allocation57_spill] sm:$0xff] %v8972_v22  ;;  %v8983_v60 = vadd.f32 %v8446_v4, %v11500_v19  ;;  %v8987_v40 = vadd.f32 %v8466_v14, %v11502_v18  ;;  %v1710_v30 = vrot.slane %v1688_v31, %v8291_v27  ;;  %v1718_v33 = vcombine.high %v1696_v13, %v1696_v13 }
 0x260   : >> { %v4949_v9 = vrot.slane %v1696_v13, %v8297_v28  ;;  %v1575_v35 = vcombine.high %v1537_v0, %v1537_v0  ;;  %v1717_v41 = vrot.slane %v1689_v42, %v8291_v27  ;;  %v1719_v11 = vcombine.high %v1703_v63, %v1703_v63 }
 0x261   : >> { %v4965_v51 = vrot.slane %v1703_v63, %v8297_v28  ;;  %v1582_v8 = vrot.slane %v1537_v0, %v8291_v27  ;;  %v1720_v4 = vcombine.high %v1710_v30, %v1710_v30  ;;  %v4953_v22 = vrot.slane %v1710_v30, %v8297_v28 }
 0x262   : >> { %v4957_v14 = vrot.slane %v1718_v33, %v8297_v28  ;;  %v9000_v31 = vsel %vm326_vm1, %v8372_v2, %v4949_v9  ;;  %v1721_v13 = vcombine.high %v1717_v41, %v1717_v41  ;;  %v4969_v18 = vrot.slane %v1717_v41, %v8297_v28 }
 0x263   : >> { %v4973_v42 = vrot.slane %v1719_v11, %v8297_v28  ;;  %v9006_v63 = vsel %vm326_vm1, %v8377_v49, %v4965_v51  ;;  %v4961_v0 = vrot.slane %v1720_v4, %v8297_v28  ;;  %v9011_v30 = vsel %vm326_vm1, %v8381_v58, %v4953_v22 }
 0x264   : >> { %v9015_v33 = vsel %vm326_vm1, %v8384_v5, %v4957_v14  ;;  %v1589_v2 = vrot.slane %v1575_v35, %v8291_v27  ;;  %v4977_v9 = vrot.slane %v1721_v13, %v8297_v28  ;;  %v6888_v41 = vsel %vm326_vm1, %v8391_v53, %v4969_v18 }
 0x265   : >> { %v6889_v49 = vsel %vm326_vm1, %v8394_v34, %v4973_v42  ;;  %v1590_v11 = vcombine.high %v1582_v8, %v1582_v8  ;;  %v9025_v51 = vsel %vm326_vm1, %v8400_v55, %v4961_v0  ;;  %v1598_v22 = vrot.slane %v1582_v8, %v8291_v27 }
 0x266   : >> { %v1591_v58 = vcombine.high %v1589_v2, %v1589_v2  ;;  %v1605_v5 = vrot.slane %v1589_v2, %v8291_v27  ;;  %v6890_v35 = vsel %vm326_vm1, %v8409_v37, %v4977_v9  ;;  %v2182_v14 = vcombine.high %v2054_v57, %v2054_v57 }
 0x267   : >> { %v1612_v4 = vrot.slane %v1590_v11, %v8291_v27  ;;  %v2189_v18 = vrot.slane %v2054_v57, %v8291_v27  ;;  %v1620_v34 = vcombine.high %v1598_v22, %v1598_v22  ;;  %v4885_v55 = vrot.slane %v1598_v22, %v8297_v28 }
 0x268   : >> { %v1619_v53 = vrot.slane %v1591_v58, %v8291_v27  ;;  %v1621_v13 = vcombine.high %v1605_v5, %v1605_v5  ;;  %v4901_v8 = vrot.slane %v1605_v5, %v8297_v28  ;;  %v2196_v2 = vrot.slane %v2182_v14, %v8291_v27 }
 0x269   : >> { %v1622_v42 = vcombine.high %v1612_v4, %v1612_v4  ;;  %v4889_v0 = vrot.slane %v1612_v4, %v8297_v28  ;;  %v4893_v9 = vrot.slane %v1620_v34, %v8297_v28  ;;  %v9046_v22 = vsel %vm326_vm1, %v8456_v32, %v4885_v55 }
 0x26a   : >> { %v1623_v37 = vcombine.high %v1619_v53, %v1619_v53  ;;  %v4905_v57 = vrot.slane %v1619_v53, %v8297_v28  ;;  %v4909_v11 = vrot.slane %v1621_v13, %v8297_v28  ;;  %v9054_v4 = vsel %vm326_vm1, %v8480_v46, %v4901_v8 }
 0x26b   : >> { %v4897_v58 = vrot.slane %v1622_v42, %v8297_v28  ;;  %v9050_v5 = vsel %vm326_vm1, %v8470_v59, %v4889_v0  ;;  %v9059_v53 = vsel %vm326_vm1, %v8476_v6, %v4893_v9  ;;  %v11594_v59 = vld [vmem:[#allocation20_spill] sm:$0xff]  ;;  %v2197_v46 = vcombine.high %v2189_v18, %v2189_v18  ;;  %v11595_v0 = vld [vmem:[#allocation23_spill] sm:$0xff] }
 0x26c   : >> { %v4913_v14 = vrot.slane %v1623_v37, %v8297_v28  ;;  %v9063_v34 = vsel %vm326_vm1, %v8495_v10, %v4905_v57  ;;  %v9067_v32 = vsel %vm326_vm1, %v8501_v44, %v4909_v11  ;;  %v2198_v55 = vcombine.high %v2196_v2, %v2196_v2 }
 0x26d   : >> { %v9071_v13 = vsel %vm326_vm1, %v11594_v59, %v4897_v58  ;;  %v2205_v42 = vrot.slane %v2189_v18, %v8291_v27  ;;  %v2212_v8 = vrot.slane %v2196_v2, %v8291_v27  ;;  %v1722_v10 = vcombine.high %v8983_v60, %v8983_v60  ;;  %v9088_v2 = vpop.f32.mrb[17].mxu1 }
 0x26e   : >> { %v9076_v6 = vsel %vm326_vm1, %v11595_v0, %v4913_v14  ;;  %v1729_v44 = vrot.slane %v8983_v60, %v8291_v27  ;;  %v2219_v37 = vrot.slane %v2197_v46, %v8291_v27  ;;  %v2226_v9 = vrot.slane %v2198_v55, %v8291_v27  ;;  %11596 = vst [vmem:[#allocation20_spill] sm:$0xff] %v9088_v2 }
 0x26f   : >> { %v2227_v57 = vcombine.high %v2205_v42, %v2205_v42  ;;  %v5269_v11 = vrot.slane %v2205_v42, %v8297_v28  ;;  %v2228_v18 = vcombine.high %v2212_v8, %v2212_v8  ;;  %v5285_v58 = vrot.slane %v2212_v8, %v8297_v28 }
 0x270   : >> { %v1736_v14 = vrot.slane %v1722_v10, %v8291_v27  ;;  %v1737_v59 = vcombine.high %v1729_v44, %v1729_v44  ;;  %v2229_v0 = vcombine.high %v2219_v37, %v2219_v37  ;;  %v2230_v23 = vcombine.high %v2226_v9, %v2226_v9 }
 0x271   : >> { %v5273_v48 = vrot.slane %v2219_v37, %v8297_v28  ;;  %v5277_v60 = vrot.slane %v2227_v57, %v8297_v28  ;;  %v5289_v46 = vrot.slane %v2226_v9, %v8297_v28  ;;  %v5293_v55 = vrot.slane %v2228_v18, %v8297_v28 }
 0x272   : >> { %v9096_v42 = vsel %vm330_vm6, %v9000_v31, %v5269_v11  ;;  %v9100_v8 = vsel %vm330_vm6, %v9006_v63, %v5285_v58  ;;  %v5281_v10 = vrot.slane %v2229_v0, %v8297_v28  ;;  %v5297_v2 = vrot.slane %v2230_v23, %v8297_v28 }
 0x273   : >> { %v9106_v37 = vsel %vm330_vm6, %v9011_v30, %v5273_v48  ;;  %v9110_v9 = vsel %vm330_vm6, %v9015_v33, %v5277_v60  ;;  %v9113_v57 = vsel %vm330_vm6, %v6888_v41, %v5289_v46  ;;  %v9116_v31 = vsel %vm330_vm6, %v6889_v49, %v5293_v55 }
 0x274   : >> { %11597 = vst [vmem:[#allocation23_spill] sm:$0xff] %v9110_v9  ;;  %11598 = vst [vmem:[#allocation60_spill] sm:$0xff] %v9113_v57  ;;  %v1738_v63 = vcombine.high %v1736_v14, %v1736_v14  ;;  %v1745_v11 = vrot.slane %v1729_v44, %v8291_v27  ;;  %v9121_v23 = vsel %vm330_vm6, %v9025_v51, %v5281_v10 }
 0x275   : >> { %11599 = vst [vmem:[#allocation61_spill] sm:$0xff] %v9116_v31  ;;  %11600 = vst [vmem:[#allocation62_spill] sm:$0xff] %v9121_v23  ;;  %v9124_v48 = vsel %vm330_vm6, %v6890_v35, %v5297_v2  ;;  %v1752_v30 = vrot.slane %v1736_v14, %v8291_v27  ;;  %v1759_v33 = vrot.slane %v1737_v59, %v8291_v27 }
 0x276   : >> { %11601 = vst [vmem:[#allocation63_spill] sm:$0xff] %v9124_v48  ;;  %v1766_v41 = vrot.slane %v1738_v63, %v8291_v27  ;;  %v1767_v18 = vcombine.high %v1745_v11, %v1745_v11  ;;  %v4981_v49 = vrot.slane %v1745_v11, %v8297_v28  ;;  %v2084_v58 = vcombine.high %v8987_v40, %v8987_v40  ;;  %v9150_v11 = vpop.f32.mrb[18].mxu1 }
 0x277   : >> { %v1768_v44 = vcombine.high %v1752_v30, %v1752_v30  ;;  %v1769_v0 = vcombine.high %v1759_v33, %v1759_v33  ;;  %v4985_v51 = vrot.slane %v1759_v33, %v8297_v28  ;;  %v4997_v60 = vrot.slane %v1752_v30, %v8297_v28  ;;  %11602 = vst [vmem:[#allocation64_spill] sm:$0xff] %v9150_v11  ;;  %v11603_v33 = vld [vmem:[#allocation27_spill] sm:$0xff] }
 0x278   : >> { %v1770_v35 = vcombine.high %v1766_v41, %v1766_v41  ;;  %v4989_v2 = vrot.slane %v1767_v18, %v8297_v28  ;;  %v5001_v14 = vrot.slane %v1766_v41, %v8297_v28  ;;  %v9138_v59 = vsel %vm326_vm1, %v8549_v12, %v4981_v49  ;;  %v11604_v18 = vld [vmem:[#allocation29_spill] sm:$0xff] }
 0x279   : >> { %v4993_v46 = vrot.slane %v1769_v0, %v8297_v28  ;;  %v5005_v55 = vrot.slane %v1768_v44, %v8297_v28  ;;  %v9144_v10 = vsel %vm326_vm1, %v8560_v52, %v4985_v51  ;;  %v9148_v63 = vsel %vm326_vm1, %v8555_v47, %v4997_v60  ;;  %v11605_v47 = vld [vmem:[#allocation28_spill] sm:$0xff]  ;;  %v11606_v51 = vld [vmem:[#allocation13_spill] sm:$0xff] }
 0x27a   : >> { %v5009_v30 = vrot.slane %v1770_v35, %v8297_v28  ;;  %v9155_v12 = vsel %vm326_vm1, %v8566_v56, %v4989_v2  ;;  %v9159_v41 = vsel %vm326_vm1, %v11603_v33, %v5001_v14  ;;  %v2091_v52 = vrot.slane %v8987_v40, %v8291_v27  ;;  %v11607_v56 = vld [vmem:[#allocation18_spill] sm:$0xff]  ;;  %v11608_v35 = vld [vmem:[#allocation31_spill] sm:$0xff] }
 0x27b   : >> { %v9165_v49 = vsel %vm326_vm1, %v11604_v18, %v4993_v46  ;;  %v9169_v44 = vsel %vm326_vm1, %v11605_v47, %v5005_v55  ;;  %v2098_v0 = vrot.slane %v2084_v58, %v8291_v27  ;;  %v1540_v60 = vadd.f32 %v11607_v56, %v11606_v51  ;;  %v11609_v33 = vld [vmem:[#allocation19_spill] sm:$0xff] }
 0x27c   : >> { %v9176_v2 = vsel %vm326_vm1, %v11608_v35, %v5009_v30  ;;  %v2099_v14 = vcombine.high %v2091_v52, %v2091_v52  ;;  %v2107_v40 = vrot.slane %v2091_v52, %v8291_v27  ;;  %v2057_v46 = vadd.f32 %v11609_v33, %v11500_v19 }
 0x27d   : >> { %v2100_v18 = vcombine.high %v2098_v0, %v2098_v0  ;;  %v2114_v11 = vrot.slane %v2098_v0, %v8291_v27  ;;  %v1624_v55 = vcombine.high %v1540_v60, %v1540_v60  ;;  %v1631_v47 = vrot.slane %v1540_v60, %v8291_v27 }
 0x27e   : >> { %v2121_v58 = vrot.slane %v2099_v14, %v8291_v27  ;;  %v2129_v48 = vcombine.high %v2107_v40, %v2107_v40  ;;  %v5205_v56 = vrot.slane %v2107_v40, %v8297_v28  ;;  %v2231_v23 = vcombine.high %v2057_v46, %v2057_v46  ;;  %v9194_v14 = vpop.f32.mrb[20].mxu0 }
 0x27f   : >> { %v2128_v30 = vrot.slane %v2100_v18, %v8291_v27  ;;  %v2130_v35 = vcombine.high %v2114_v11, %v2114_v11  ;;  %v5221_v52 = vrot.slane %v2114_v11, %v8297_v28  ;;  %v1638_v31 = vrot.slane %v1624_v55, %v8291_v27  ;;  %11611 = vst [vmem:[#allocation29_spill] sm:$0xff] %v9194_v14  ;;  %v11625_v14 = vld [vmem:[#allocation38_spill] sm:$0xff] }
 0x280   : >> { %v2131_v33 = vcombine.high %v2121_v58, %v2121_v58  ;;  %v5209_v57 = vrot.slane %v2121_v58, %v8297_v28  ;;  %v5213_v0 = vrot.slane %v2129_v48, %v8297_v28  ;;  %v9192_v60 = vsel %vm330_vm6, %v9046_v22, %v5205_v56 }
 0x281   : >> { %11610 = vst [vmem:[#allocation27_spill] sm:$0xff] %v9192_v60  ;;  %v2132_v40 = vcombine.high %v2128_v30, %v2128_v30  ;;  %v5225_v9 = vrot.slane %v2128_v30, %v8297_v28  ;;  %v5229_v18 = vrot.slane %v2130_v35, %v8297_v28  ;;  %v9200_v11 = vsel %vm330_vm6, %v9054_v4, %v5221_v52 }
 0x282   : >> { %11612 = vst [vmem:[#allocation28_spill] sm:$0xff] %v9200_v11  ;;  %v5217_v55 = vrot.slane %v2131_v33, %v8297_v28  ;;  %v9205_v48 = vsel %vm330_vm6, %v9050_v5, %v5209_v57  ;;  %v9209_v22 = vsel %vm330_vm6, %v9059_v53, %v5213_v0  ;;  %v1639_v58 = vcombine.high %v1631_v47, %v1631_v47 }
 0x283   : >> { %11613 = vst [vmem:[#allocation18_spill] sm:$0xff] %v9205_v48  ;;  %11614 = vst [vmem:[#allocation31_spill] sm:$0xff] %v9209_v22  ;;  %v5233_v56 = vrot.slane %v2132_v40, %v8297_v28  ;;  %v9214_v30 = vsel %vm330_vm6, %v9063_v34, %v5225_v9  ;;  %v9218_v4 = vsel %vm330_vm6, %v9067_v32, %v5229_v18 }
 0x284   : >> { %11615 = vst [vmem:[#allocation19_spill] sm:$0xff] %v9214_v30  ;;  %11616 = vst [vmem:[#allocation65_spill] sm:$0xff] %v9218_v4  ;;  %v1640_v35 = vcombine.high %v1638_v31, %v1638_v31  ;;  %v9222_v5 = vsel %vm330_vm6, %v9071_v13, %v5217_v55  ;;  %v1647_v57 = vrot.slane %v1631_v47, %v8291_v27 }
 0x285   : >> { %11617 = vst [vmem:[#allocation66_spill] sm:$0xff] %v9222_v5  ;;  %v1654_v53 = vrot.slane %v1638_v31, %v8291_v27  ;;  %v1661_v52 = vrot.slane %v1639_v58, %v8291_v27  ;;  %v9229_v33 = vsel %vm330_vm6, %v9076_v6, %v5233_v56  ;;  %v2238_v32 = vrot.slane %v2057_v46, %v8291_v27 }
 0x286   : >> { %11618 = vst [vmem:[#allocation67_spill] sm:$0xff] %v9229_v33  ;;  %v1668_v34 = vrot.slane %v1640_v35, %v8291_v27  ;;  %v2245_v9 = vrot.slane %v2231_v23, %v8291_v27  ;;  %v1669_v0 = vcombine.high %v1647_v57, %v1647_v57  ;;  %v4917_v18 = vrot.slane %v1647_v57, %v8297_v28  ;;  %v9245_v35 = vpop.f32.mrb[19].mxu1  ;;  %v11628_v33 = vld [vmem:[#allocation22_spill] sm:$0xff] }
 0x287   : >> { %v1670_v40 = vcombine.high %v1654_v53, %v1654_v53  ;;  %v1671_v13 = vcombine.high %v1661_v52, %v1661_v52  ;;  %v4921_v31 = vrot.slane %v1661_v52, %v8297_v28  ;;  %v4933_v55 = vrot.slane %v1654_v53, %v8297_v28  ;;  %11619 = vst [vmem:[#allocation68_spill] sm:$0xff] %v9245_v35  ;;  %v11620_v53 = vld [vmem:[#allocation34_spill] sm:$0xff] }
 0x288   : >> { %v1672_v47 = vcombine.high %v1668_v34, %v1668_v34  ;;  %v4937_v58 = vrot.slane %v1668_v34, %v8297_v28  ;;  %v4925_v6 = vrot.slane %v1669_v0, %v8297_v28  ;;  %v9243_v23 = vsel %vm326_vm1, %v8628_v62, %v4917_v18  ;;  %v11621_v0 = vld [vmem:[#allocation36_spill] sm:$0xff]  ;;  %v11623_v18 = vld [vmem:[#allocation35_spill] sm:$0xff] }
 0x289   : >> { %v4929_v56 = vrot.slane %v1671_v13, %v8297_v28  ;;  %v4941_v46 = vrot.slane %v1670_v40, %v8297_v28  ;;  %v9250_v52 = vsel %vm326_vm1, %v8638_v43, %v4921_v31  ;;  %v9254_v34 = vsel %vm326_vm1, %v11620_v53, %v4933_v55  ;;  %v11622_v40 = vld [vmem:[#allocation33_spill] sm:$0xff] }
 0x28a   : >> { %v4945_v57 = vrot.slane %v1672_v47, %v8297_v28  ;;  %v9258_v13 = vsel %vm326_vm1, %v11621_v0, %v4937_v58  ;;  %v9262_v62 = vsel %vm326_vm1, %v11622_v40, %v4925_v6  ;;  %v11624_v47 = vld [vmem:[#allocation37_spill] sm:$0xff]  ;;  %v2246_v31 = vcombine.high %v2238_v32, %v2238_v32 }
 0x28b   : >> { %v9266_v35 = vsel %vm326_vm1, %v11623_v18, %v4929_v56  ;;  %v9270_v43 = vsel %vm326_vm1, %v11624_v47, %v4941_v46  ;;  %v2247_v53 = vcombine.high %v2245_v9, %v2245_v9  ;;  %v2254_v58 = vrot.slane %v2238_v32, %v8291_v27  ;;  %v11626_v40 = vld [vmem:[#allocation21_spill] sm:$0xff]  ;;  %v11629_v46 = vld [vmem:[#allocation15_spill] sm:$0xff]  ;;  %v11630_v47 = vld [vmem:[#allocation24_spill] sm:$0xff] }
 0x28c   : >> { %v9274_v55 = vsel %vm326_vm1, %v11625_v14, %v4945_v57  ;;  %v2261_v0 = vrot.slane %v2245_v9, %v8291_v27  ;;  %v2268_v6 = vrot.slane %v2246_v31, %v8291_v27  ;;  %v2049_v56 = vadd.f32 %v11626_v40, %v11606_v51  ;;  %v11627_v18 = vld [vmem:[#allocation17_spill] sm:$0xff] }
 0x28d   : >> { %v1561_v4 = vadd.f32 %v11628_v33, %v11627_v18  ;;  %v1553_v5 = vadd.f32 %v11630_v47, %v11629_v46  ;;  %v2275_v30 = vrot.slane %v2247_v53, %v8291_v27  ;;  %v2276_v14 = vcombine.high %v2254_v58, %v2254_v58  ;;  %v9292_v47 = vpop.f32.mrb[21].mxu0 }
 0x28e   : >> { %v2277_v57 = vcombine.high %v2261_v0, %v2261_v0  ;;  %v5301_v22 = vrot.slane %v2254_v58, %v8297_v28  ;;  %v2278_v32 = vcombine.high %v2268_v6, %v2268_v6  ;;  %v5305_v9 = vrot.slane %v2268_v6, %v8297_v28  ;;  %11631 = vst [vmem:[#allocation34_spill] sm:$0xff] %v9292_v47 }
 0x28f   : >> { %v5317_v31 = vrot.slane %v2261_v0, %v8297_v28  ;;  %v2133_v11 = vcombine.high %v2049_v56, %v2049_v56  ;;  %v2279_v48 = vcombine.high %v2275_v30, %v2275_v30  ;;  %v5309_v40 = vrot.slane %v2276_v14, %v8297_v28 }
 0x290   : >> { %v5321_v33 = vrot.slane %v2275_v30, %v8297_v28  ;;  %v5325_v60 = vrot.slane %v2277_v57, %v8297_v28  ;;  %v5313_v53 = vrot.slane %v2278_v32, %v8297_v28  ;;  %v9297_v58 = vsel %vm330_vm6, %v9138_v59, %v5301_v22 }
 0x291   : >> { %v9301_v6 = vsel %vm330_vm6, %v9144_v10, %v5305_v9  ;;  %v9305_v0 = vsel %vm330_vm6, %v9148_v63, %v5317_v31  ;;  %v5329_v30 = vrot.slane %v2279_v48, %v8297_v28  ;;  %v9310_v14 = vsel %vm330_vm6, %v9155_v12, %v5309_v40 }
 0x292   : >> { %v9314_v57 = vsel %vm330_vm6, %v9159_v41, %v5321_v33  ;;  %v9318_v59 = vsel %vm330_vm6, %v9169_v44, %v5325_v60  ;;  %v9322_v10 = vsel %vm330_vm6, %v9165_v49, %v5313_v53  ;;  %v2140_v63 = vrot.slane %v2049_v56, %v8291_v27 }
 0x293   : >> { %11632 = vst [vmem:[#allocation36_spill] sm:$0xff] %v9314_v57  ;;  %11633 = vst [vmem:[#allocation33_spill] sm:$0xff] %v9318_v59  ;;  %v2147_v48 = vrot.slane %v2133_v11, %v8291_v27  ;;  %v1869_v22 = vcombine.high %v1561_v4, %v1561_v4  ;;  %v9328_v12 = vsel %vm330_vm6, %v9176_v2, %v5329_v30  ;;  %v9341_v30 = vpop.f32.mrb[22].mxu0 }
 0x294   : >> { %11634 = vst [vmem:[#allocation35_spill] sm:$0xff] %v9322_v10  ;;  %11635 = vst [vmem:[#allocation37_spill] sm:$0xff] %v9328_v12  ;;  %v1876_v41 = vrot.slane %v1561_v4, %v8291_v27  ;;  %v1771_v32 = vcombine.high %v1553_v5, %v1553_v5  ;;  %v9332_v9 = vrot.slane %v1553_v5, %v8291_v27 }
 0x295   : >> { %v2148_v44 = vcombine.high %v2140_v63, %v2140_v63  ;;  %v2149_v60 = vcombine.high %v2147_v48, %v2147_v48  ;;  %v2156_v49 = vrot.slane %v2140_v63, %v8291_v27  ;;  %v2163_v31 = vrot.slane %v2147_v48, %v8291_v27  ;;  %11636 = vst [vmem:[#allocation38_spill] sm:$0xff] %v9341_v30 }
 0x296   : >> { %v1883_v56 = vrot.slane %v1869_v22, %v8291_v27  ;;  %v1884_v11 = vcombine.high %v1876_v41, %v1876_v41  ;;  %v1892_v40 = vrot.slane %v1876_v41, %v8291_v27  ;;  %v1785_v2 = vrot.slane %v1771_v32, %v8291_v27 }
 0x297   : >> { %v2170_v33 = vrot.slane %v2148_v44, %v8291_v27  ;;  %v2177_v4 = vrot.slane %v2149_v60, %v8291_v27  ;;  %v2178_v53 = vcombine.high %v2156_v49, %v2156_v49  ;;  %v2179_v5 = vcombine.high %v2163_v31, %v2163_v31 }
 0x298   : >> { %v5237_v47 = vrot.slane %v2156_v49, %v8297_v28  ;;  %v5253_v63 = vrot.slane %v2163_v31, %v8297_v28  ;;  %v1885_v48 = vcombine.high %v1883_v56, %v1883_v56  ;;  %v1899_v22 = vrot.slane %v1883_v56, %v8291_v27 }
 0x299   : >> { %v2180_v12 = vcombine.high %v2170_v33, %v2170_v33  ;;  %v2181_v59 = vcombine.high %v2177_v4, %v2177_v4  ;;  %v5241_v41 = vrot.slane %v2170_v33, %v8297_v28  ;;  %v5245_v32 = vrot.slane %v2178_v53, %v8297_v28 }
 0x29a   : >> { %v5257_v44 = vrot.slane %v2177_v4, %v8297_v28  ;;  %v5261_v60 = vrot.slane %v2179_v5, %v8297_v28  ;;  %v9352_v30 = vsel %vm330_vm6, %v9243_v23, %v5237_v47  ;;  %v9356_v49 = vsel %vm330_vm6, %v9254_v34, %v5253_v63 }
 0x29b   : >> { %11637 = vst [vmem:[#allocation21_spill] sm:$0xff] %v9352_v30  ;;  %11638 = vst [vmem:[#allocation22_spill] sm:$0xff] %v9356_v49  ;;  %v5249_v31 = vrot.slane %v2180_v12, %v8297_v28  ;;  %v5265_v56 = vrot.slane %v2181_v59, %v8297_v28  ;;  %v9362_v33 = vsel %vm330_vm6, %v9250_v52, %v5241_v41 }
 0x29c   : >> { %11639 = vst [vmem:[#allocation24_spill] sm:$0xff] %v9362_v33  ;;  %v9366_v4 = vsel %vm330_vm6, %v9262_v62, %v5245_v32  ;;  %v9370_v23 = vsel %vm330_vm6, %v9258_v13, %v5257_v44  ;;  %v9374_v34 = vsel %vm330_vm6, %v9270_v43, %v5261_v60  ;;  %v1906_v47 = vrot.slane %v1884_v11, %v8291_v27  ;;  %v9402_v60 = vpop.f32.mrb[23].mxu0 }
 0x29d   : >> { %11640 = vst [vmem:[#allocation69_spill] sm:$0xff] %v9366_v4  ;;  %11641 = vst [vmem:[#allocation70_spill] sm:$0xff] %v9370_v23  ;;  %v1913_v59 = vrot.slane %v1885_v48, %v8291_v27  ;;  %v9380_v52 = vsel %vm330_vm6, %v9266_v35, %v5249_v31  ;;  %v9384_v62 = vsel %vm330_vm6, %v9274_v55, %v5265_v56  ;;  %v11646_v31 = vld [vmem:[#allocation40_spill] sm:$0xff] }
 0x29e   : >> { %11642 = vst [vmem:[#allocation71_spill] sm:$0xff] %v9374_v34  ;;  %11643 = vst [vmem:[#allocation72_spill] sm:$0xff] %v9380_v52  ;;  %v1914_v12 = vcombine.high %v1892_v40, %v1892_v40  ;;  %v1915_v53 = vcombine.high %v1899_v22, %v1899_v22  ;;  %v1916_v13 = vcombine.high %v1906_v47, %v1906_v47 }
 0x29f   : >> { %11644 = vst [vmem:[#allocation73_spill] sm:$0xff] %v9384_v62  ;;  %v1917_v5 = vcombine.high %v1913_v59, %v1913_v59  ;;  %v5077_v63 = vrot.slane %v1892_v40, %v8297_v28  ;;  %v5081_v43 = vrot.slane %v1906_v47, %v8297_v28  ;;  %v5093_v48 = vrot.slane %v1899_v22, %v8297_v28  ;;  %v11647_v47 = vld [vmem:[#allocation42_spill] sm:$0xff] }
 0x2a0   : >> { %v5085_v11 = vrot.slane %v1914_v12, %v8297_v28  ;;  %v5097_v41 = vrot.slane %v1913_v59, %v8297_v28  ;;  %v5101_v35 = vrot.slane %v1915_v53, %v8297_v28  ;;  %v5089_v32 = vrot.slane %v1916_v13, %v8297_v28  ;;  %11645 = vst [vmem:[#allocation74_spill] sm:$0xff] %v9402_v60  ;;  %v11650_v13 = vld [vmem:[#allocation44_spill] sm:$0xff] }
 0x2a1   : >> { %v5105_v55 = vrot.slane %v1917_v5, %v8297_v28  ;;  %v9396_v44 = vsel %vm326_vm1, %v8716_v39, %v5077_v63  ;;  %v9400_v40 = vsel %vm326_vm1, %v8726_v54, %v5081_v43  ;;  %v9410_v56 = vsel %vm326_vm1, %v11646_v31, %v5093_v48  ;;  %v11648_v39 = vld [vmem:[#allocation43_spill] sm:$0xff]  ;;  %v11649_v54 = vld [vmem:[#allocation41_spill] sm:$0xff]  ;;  %v11651_v48 = vld [vmem:[#allocation26_spill] sm:$0xff] }
 0x2a2   : >> { %v9406_v22 = vsel %vm326_vm1, %v8732_v36, %v5085_v11  ;;  %v9414_v59 = vsel %vm326_vm1, %v11647_v47, %v5097_v41  ;;  %v9418_v12 = vsel %vm326_vm1, %v11648_v39, %v5101_v35  ;;  %v9422_v53 = vsel %vm326_vm1, %v11649_v54, %v5089_v32  ;;  %v11652_v35 = vld [vmem:[#allocation16_spill] sm:$0xff]  ;;  %v11653_v31 = vld [vmem:[#allocation25_spill] sm:$0xff]  ;;  %v11654_v39 = vld [vmem:[#allocation30_spill] sm:$0xff] }
 0x2a3   : >> { %v9426_v36 = vsel %vm326_vm1, %v11650_v13, %v5105_v55  ;;  %v1786_v5 = vcombine.high %v9332_v9, %v9332_v9  ;;  %v1787_v63 = vcombine.high %v1785_v2, %v1785_v2  ;;  %v1794_v43 = vrot.slane %v9332_v9, %v8291_v27  ;;  %v11655_v13 = vld [vmem:[#allocation14_spill] sm:$0xff]  ;;  %v11656_v60 = vld [vmem:[#allocation32_spill] sm:$0xff] }
 0x2a4   : >> { %v1801_v11 = vrot.slane %v1785_v2, %v8291_v27  ;;  %v2070_v41 = vadd.f32 %v11651_v48, %v11627_v18  ;;  %v1564_v32 = vadd.f32 %v11653_v31, %v11652_v35  ;;  %v9441_v54 = vadd.f32 %v11654_v39, %v11629_v46 }
 0x2a5   : >> { %v1808_v47 = vrot.slane %v1786_v5, %v8291_v27  ;;  %v1815_v55 = vrot.slane %v1787_v63, %v8291_v27  ;;  %v9445_v62 = vadd.f32 %v11656_v60, %v11655_v13  ;;  %v1816_v9 = vcombine.high %v1794_v43, %v1794_v43 }
 0x2a6   : >> { %v1817_v2 = vcombine.high %v1801_v11, %v1801_v11  ;;  %v5013_v52 = vrot.slane %v1794_v43, %v8297_v28  ;;  %v5029_v48 = vrot.slane %v1801_v11, %v8297_v28 }
 0x2a7   : >> { %v1818_v18 = vcombine.high %v1808_v47, %v1808_v47  ;;  %v1819_v31 = vcombine.high %v1815_v55, %v1815_v55  ;;  %v5017_v5 = vrot.slane %v1808_v47, %v8297_v28  ;;  %v5033_v63 = vrot.slane %v1815_v55, %v8297_v28 }
 0x2a8   : >> { %v5021_v34 = vrot.slane %v1816_v9, %v8297_v28  ;;  %v5037_v39 = vrot.slane %v1817_v2, %v8297_v28  ;;  %v9455_v60 = vsel %vm326_vm1, %v8805_v45, %v5013_v52  ;;  %v9459_v46 = vsel %vm326_vm1, %v8825_v21, %v5029_v48  ;;  %v9471_v9 = vpop.f32.mrb[20].mxu1  ;;  %v11658_v45 = vld [vmem:[#allocation46_spill] sm:$0xff]  ;;  %v11659_v21 = vld [vmem:[#allocation48_spill] sm:$0xff] }
 0x2a9   : >> { %v5025_v43 = vrot.slane %v1818_v18, %v8297_v28  ;;  %v5041_v11 = vrot.slane %v1819_v31, %v8297_v28  ;;  %v9465_v47 = vsel %vm326_vm1, %v8815_v29, %v5017_v5  ;;  %v9469_v55 = vsel %vm326_vm1, %v8838_v20, %v5033_v63  ;;  %11657 = vst [vmem:[#allocation40_spill] sm:$0xff] %v9471_v9  ;;  %v11660_v31 = vld [vmem:[#allocation47_spill] sm:$0xff]  ;;  %v11661_v5 = vld [vmem:[#allocation49_spill] sm:$0xff] }
 0x2aa   : >> { %v9475_v52 = vsel %vm326_vm1, %v11658_v45, %v5021_v34  ;;  %v9479_v2 = vsel %vm326_vm1, %v11659_v21, %v5037_v39  ;;  %v2378_v18 = vcombine.high %v2070_v41, %v2070_v41  ;;  %v2385_v48 = vrot.slane %v2070_v41, %v8291_v27 }
 0x2ab   : >> { %v9484_v29 = vsel %vm326_vm1, %v11660_v31, %v5025_v43  ;;  %v9488_v20 = vsel %vm326_vm1, %v11661_v5, %v5041_v11  ;;  %v1918_v63 = vcombine.high %v1564_v32, %v1564_v32  ;;  %v1925_v9 = vrot.slane %v1564_v32, %v8291_v27 }
 0x2ac   : >> { %v2392_v34 = vrot.slane %v2378_v18, %v8291_v27  ;;  %v2393_v45 = vcombine.high %v2385_v48, %v2385_v48  ;;  %v2401_v39 = vrot.slane %v2385_v48, %v8291_v27  ;;  %v2280_v21 = vcombine.high %v9441_v54, %v9441_v54 }
 0x2ad   : >> { %v1932_v41 = vrot.slane %v1918_v63, %v8291_v27  ;;  %v1933_v23 = vcombine.high %v1925_v9, %v1925_v9  ;;  %v1941_v43 = vrot.slane %v1925_v9, %v8291_v27  ;;  %v2287_v11 = vrot.slane %v9441_v54, %v8291_v27  ;;  %v9504_v63 = vpop.f32.mrb[21].mxu1 }
 0x2ae   : >> { %v2394_v31 = vcombine.high %v2392_v34, %v2392_v34  ;;  %v2408_v5 = vrot.slane %v2392_v34, %v8291_v27  ;;  %v2415_v32 = vrot.slane %v2393_v45, %v8291_v27  ;;  %v2423_v18 = vcombine.high %v2401_v39, %v2401_v39  ;;  %11662 = vst [vmem:[#allocation42_spill] sm:$0xff] %v9504_v63 }
 0x2af   : >> { %v5397_v4 = vrot.slane %v2401_v39, %v8297_v28  ;;  %v1934_v48 = vcombine.high %v1932_v41, %v1932_v41  ;;  %v1948_v33 = vrot.slane %v1932_v41, %v8291_v27  ;;  %v1955_v49 = vrot.slane %v1933_v23, %v8291_v27 }
 0x2b0   : >> { %v2422_v9 = vrot.slane %v2394_v31, %v8291_v27  ;;  %v2424_v30 = vcombine.high %v2408_v5, %v2408_v5  ;;  %v2425_v10 = vcombine.high %v2415_v32, %v2415_v32  ;;  %v5401_v54 = vrot.slane %v2415_v32, %v8297_v28 }
 0x2b1   : >> { %v5405_v34 = vrot.slane %v2423_v18, %v8297_v28  ;;  %v5413_v45 = vrot.slane %v2408_v5, %v8297_v28  ;;  %v9512_v39 = vsel %vm330_vm6, %v9396_v44, %v5397_v4  ;;  %v1962_v41 = vrot.slane %v1934_v48, %v8291_v27 }
 0x2b2   : >> { %v2426_v57 = vcombine.high %v2422_v9, %v2422_v9  ;;  %v5409_v23 = vrot.slane %v2425_v10, %v8297_v28  ;;  %v5417_v63 = vrot.slane %v2422_v9, %v8297_v28  ;;  %v5421_v31 = vrot.slane %v2424_v30, %v8297_v28 }
 0x2b3   : >> { %v9520_v32 = vsel %vm330_vm6, %v9400_v40, %v5401_v54  ;;  %v9524_v5 = vsel %vm330_vm6, %v9406_v22, %v5405_v34  ;;  %v9528_v4 = vsel %vm330_vm6, %v9410_v56, %v5413_v45  ;;  %v1963_v44 = vcombine.high %v1941_v43, %v1941_v43 }
 0x2b4   : >> { %v5425_v18 = vrot.slane %v2426_v57, %v8297_v28  ;;  %v9533_v10 = vsel %vm330_vm6, %v9422_v53, %v5409_v23  ;;  %v9537_v30 = vsel %vm330_vm6, %v9414_v59, %v5417_v63  ;;  %v9541_v40 = vsel %vm330_vm6, %v9418_v12, %v5421_v31  ;;  %v9551_v63 = vpop.f32.mrb[22].mxu1  ;;  %v11665_v31 = vld [vmem:[#allocation52_spill] sm:$0xff] }
 0x2b5   : >> { %v1964_v22 = vcombine.high %v1948_v33, %v1948_v33  ;;  %v1965_v48 = vcombine.high %v1955_v49, %v1955_v49  ;;  %v1966_v9 = vcombine.high %v1962_v41, %v1962_v41  ;;  %v5109_v56 = vrot.slane %v1941_v43, %v8297_v28  ;;  %11664 = vst [vmem:[#allocation41_spill] sm:$0xff] %v9551_v63 }
 0x2b6   : >> { %v9546_v57 = vsel %vm330_vm6, %v9426_v36, %v5425_v18  ;;  %v5113_v53 = vrot.slane %v1955_v49, %v8297_v28  ;;  %v5117_v54 = vrot.slane %v1963_v44, %v8297_v28  ;;  %v5125_v59 = vrot.slane %v1948_v33, %v8297_v28  ;;  %v11666_v44 = vld [vmem:[#allocation53_spill] sm:$0xff]  ;;  %v11667_v18 = vld [vmem:[#allocation54_spill] sm:$0xff] }
 0x2b7   : >> { %11663 = vst [vmem:[#allocation43_spill] sm:$0xff] %v9546_v57  ;;  %v5121_v12 = vrot.slane %v1965_v48, %v8297_v28  ;;  %v5129_v34 = vrot.slane %v1962_v41, %v8297_v28  ;;  %v5133_v45 = vrot.slane %v1964_v22, %v8297_v28  ;;  %v5137_v43 = vrot.slane %v1966_v9, %v8297_v28 }
 0x2b8   : >> { %v9559_v36 = vsel %vm326_vm1, %v8875_v15, %v5109_v56  ;;  %v9563_v49 = vsel %vm326_vm1, %v8888_v26, %v5113_v53  ;;  %v9567_v33 = vsel %vm326_vm1, %v8894_v24, %v5117_v54  ;;  %v9571_v23 = vsel %vm326_vm1, %v8881_v16, %v5125_v59  ;;  %v11668_v56 = vld [vmem:[#allocation39_spill] sm:$0xff]  ;;  %v11669_v54 = vld [vmem:[#allocation45_spill] sm:$0xff] }
 0x2b9   : >> { %v9575_v41 = vsel %vm326_vm1, %v8912_v50, %v5121_v12  ;;  %v9579_v15 = vsel %vm326_vm1, %v11665_v31, %v5129_v34  ;;  %v9583_v26 = vsel %vm326_vm1, %v11666_v44, %v5133_v45  ;;  %v9587_v24 = vsel %vm326_vm1, %v11667_v18, %v5137_v43  ;;  %v11670_v12 = vld [vmem:[#allocation50_spill] sm:$0xff] }
 0x2ba   : >> { %v2294_v22 = vrot.slane %v2280_v21, %v8291_v27  ;;  %v2295_v16 = vcombine.high %v2287_v11, %v2287_v11  ;;  %v2303_v48 = vrot.slane %v2287_v11, %v8291_v27  ;;  %v1820_v50 = vcombine.high %v9445_v62, %v9445_v62 }
 0x2bb   : >> { %v1827_v9 = vrot.slane %v9445_v62, %v8291_v27  ;;  %v2073_v53 = vadd.f32 %v11668_v56, %v11652_v35  ;;  %v9599_v59 = vadd.f32 %v11669_v54, %v11655_v13  ;;  %v9603_v34 = vadd.f32 %v11670_v12, %v11501_v17  ;;  %v9618_v35 = vpop.f32.mrb[23].mxu1 }
 0x2bc   : >> { %v2296_v21 = vcombine.high %v2294_v22, %v2294_v22  ;;  %v2310_v11 = vrot.slane %v2294_v22, %v8291_v27  ;;  %v2317_v45 = vrot.slane %v2295_v16, %v8291_v27  ;;  %v2325_v43 = vcombine.high %v2303_v48, %v2303_v48  ;;  %11671 = vst [vmem:[#allocation44_spill] sm:$0xff] %v9618_v35 }
 0x2bd   : >> { %v5333_v31 = vrot.slane %v2303_v48, %v8297_v28  ;;  %v1834_v62 = vrot.slane %v1820_v50, %v8291_v27  ;;  %v1835_v44 = vcombine.high %v1827_v9, %v1827_v9  ;;  %v1843_v18 = vrot.slane %v1827_v9, %v8291_v27 }
 0x2be   : >> { %v2324_v56 = vrot.slane %v2296_v21, %v8291_v27  ;;  %v2326_v54 = vcombine.high %v2310_v11, %v2310_v11  ;;  %v2327_v63 = vcombine.high %v2317_v45, %v2317_v45  ;;  %v5337_v12 = vrot.slane %v2317_v45, %v8297_v28 }
 0x2bf   : >> { %v5341_v13 = vrot.slane %v2325_v43, %v8297_v28  ;;  %v5349_v22 = vrot.slane %v2310_v11, %v8297_v28  ;;  %v9616_v16 = vsel %vm330_vm6, %v9455_v60, %v5333_v31  ;;  %v1836_v48 = vcombine.high %v1834_v62, %v1834_v62 }
 0x2c0   : >> { %v2328_v50 = vcombine.high %v2324_v56, %v2324_v56  ;;  %v5345_v9 = vrot.slane %v2327_v63, %v8297_v28  ;;  %v5353_v21 = vrot.slane %v2324_v56, %v8297_v28  ;;  %v5357_v57 = vrot.slane %v2326_v54, %v8297_v28 }
 0x2c1   : >> { %v9625_v45 = vsel %vm330_vm6, %v9465_v47, %v5337_v12  ;;  %v9629_v11 = vsel %vm330_vm6, %v9475_v52, %v5341_v13  ;;  %v9633_v60 = vsel %vm330_vm6, %v9459_v46, %v5349_v22  ;;  %v1850_v43 = vrot.slane %v1834_v62, %v8291_v27 }
 0x2c2   : >> { %11672 = vst [vmem:[#allocation26_spill] sm:$0xff] %v9625_v45  ;;  %11673 = vst [vmem:[#allocation25_spill] sm:$0xff] %v9629_v11  ;;  %v5361_v63 = vrot.slane %v2328_v50, %v8297_v28  ;;  %v9639_v31 = vsel %vm330_vm6, %v9484_v29, %v5345_v9  ;;  %v9643_v47 = vsel %vm330_vm6, %v9469_v55, %v5353_v21 }
 0x2c3   : >> { %11674 = vst [vmem:[#allocation30_spill] sm:$0xff] %v9639_v31  ;;  %11675 = vst [vmem:[#allocation32_spill] sm:$0xff] %v9643_v47  ;;  %v9647_v13 = vsel %vm330_vm6, %v9479_v2, %v5357_v57  ;;  %v1857_v52 = vrot.slane %v1835_v44, %v8291_v27  ;;  %v1864_v46 = vrot.slane %v1836_v48, %v8291_v27  ;;  %v11729_v31 = vld [vmem:[#allocation71_spill] sm:$0xff] }
 0x2c4   : >> { %11676 = vst [vmem:[#allocation46_spill] sm:$0xff] %v9647_v13  ;;  %v1865_v56 = vcombine.high %v1843_v18, %v1843_v18  ;;  %v1866_v62 = vcombine.high %v1850_v43, %v1850_v43  ;;  %v9653_v54 = vsel %vm330_vm6, %v9488_v20, %v5361_v63  ;;  %v5045_v29 = vrot.slane %v1843_v18, %v8297_v28  ;;  %v11732_v13 = vld [vmem:[#allocation73_spill] sm:$0xff] }
 0x2c5   : >> { %11677 = vst [vmem:[#allocation48_spill] sm:$0xff] %v9653_v54  ;;  %v5061_v12 = vrot.slane %v1850_v43, %v8297_v28  ;;  %v2427_v55 = vcombine.high %v2073_v53, %v2073_v53  ;;  %v1867_v22 = vcombine.high %v1857_v52, %v1857_v52  ;;  %v1868_v50 = vcombine.high %v1864_v46, %v1864_v46 }
 0x2c6   : >> { %v5049_v2 = vrot.slane %v1857_v52, %v8297_v28  ;;  %v5053_v57 = vrot.slane %v1865_v56, %v8297_v28  ;;  %v5065_v44 = vrot.slane %v1864_v46, %v8297_v28  ;;  %v5069_v48 = vrot.slane %v1866_v62, %v8297_v28  ;;  %v11678_v56 = vld [vmem:[#allocation56_spill] sm:$0xff] }
 0x2c7   : >> { %v9663_v9 = vsel %vm326_vm1, %v8930_v3, %v5045_v29  ;;  %v9667_v20 = vsel %vm326_vm1, %v8949_v38, %v5061_v12  ;;  %v5057_v18 = vrot.slane %v1867_v22, %v8297_v28  ;;  %v5073_v21 = vrot.slane %v1868_v50, %v8297_v28  ;;  %v11679_v29 = vld [vmem:[#allocation57_spill] sm:$0xff] }
 0x2c8   : >> { %v6908_v43 = vsel %vm326_vm1, %v8939_v61, %v5049_v2  ;;  %v6909_v63 = vsel %vm326_vm1, %v8945_v7, %v5053_v57  ;;  %v6912_v52 = vsel %vm326_vm1, %v8953_v25, %v5065_v44  ;;  %v6913_v3 = vsel %vm326_vm1, %v8966_v1, %v5069_v48 }
 0x2c9   : >> { %v2434_v46 = vrot.slane %v2073_v53, %v8291_v27  ;;  %v2441_v38 = vrot.slane %v2427_v55, %v8291_v27  ;;  %v6910_v62 = vsel %vm326_vm1, %v11678_v56, %v5057_v18  ;;  %v6914_v12 = vsel %vm326_vm1, %v11679_v29, %v5073_v21 }
 0x2ca   : >> { %v2329_v61 = vcombine.high %v9599_v59, %v9599_v59  ;;  %v2336_v7 = vrot.slane %v9599_v59, %v8291_v27  ;;  %v2692_v57 = vcombine.high %v9603_v34, %v9603_v34  ;;  %vm7253_vm1 = vcmask 113664  }
 0x2cb   : >> { %v2442_v25 = vcombine.high %v2434_v46, %v2434_v46  ;;  %v2443_v22 = vcombine.high %v2441_v38, %v2441_v38  ;;  %v2450_v1 = vrot.slane %v2434_v46, %v8291_v27  ;;  %v2457_v53 = vrot.slane %v2441_v38, %v8291_v27 }
 0x2cc   : >> { %v2343_v55 = vrot.slane %v2329_v61, %v8291_v27  ;;  %v2344_v50 = vcombine.high %v2336_v7, %v2336_v7  ;;  %v2352_v2 = vrot.slane %v2336_v7, %v8291_v27 }
 0x2cd   : >> { %v2464_v44 = vrot.slane %v2442_v25, %v8291_v27  ;;  %v2471_v48 = vrot.slane %v2443_v22, %v8291_v27  ;;  %v2472_v18 = vcombine.high %v2450_v1, %v2450_v1  ;;  %v2473_v59 = vcombine.high %v2457_v53, %v2457_v53 }
 0x2ce   : >> { %v5429_v21 = vrot.slane %v2450_v1, %v8297_v28  ;;  %v5445_v46 = vrot.slane %v2457_v53, %v8297_v28  ;;  %v2345_v56 = vcombine.high %v2343_v55, %v2343_v55  ;;  %v2359_v38 = vrot.slane %v2343_v55, %v8291_v27  ;;  %v9712_v53 = vpop.f32.mrb[24].mxu0 }
 0x2cf   : >> { %v2474_v29 = vcombine.high %v2464_v44, %v2464_v44  ;;  %v2475_v61 = vcombine.high %v2471_v48, %v2471_v48  ;;  %v5433_v7 = vrot.slane %v2464_v44, %v8297_v28  ;;  %v5437_v35 = vrot.slane %v2472_v18, %v8297_v28  ;;  %11682 = vst [vmem:[#allocation52_spill] sm:$0xff] %v9712_v53 }
 0x2d0   : >> { %v5449_v54 = vrot.slane %v2471_v48, %v8297_v28  ;;  %v5453_v25 = vrot.slane %v2473_v59, %v8297_v28  ;;  %v9706_v22 = vsel %vm330_vm6, %v9559_v36, %v5429_v21  ;;  %v9710_v1 = vsel %vm330_vm6, %v9571_v23, %v5445_v46  ;;  %v9734_v46 = vpop.f32.mrb[25].mxu0 }
 0x2d1   : >> { %11680 = vst [vmem:[#allocation47_spill] sm:$0xff] %v9706_v22  ;;  %11681 = vst [vmem:[#allocation49_spill] sm:$0xff] %v9710_v1  ;;  %v5441_v55 = vrot.slane %v2474_v29, %v8297_v28  ;;  %v5457_v44 = vrot.slane %v2475_v61, %v8297_v28  ;;  %v9718_v18 = vsel %vm330_vm6, %v9563_v49, %v5433_v7  ;;  %v11724_v1 = vld [vmem:[#allocation21_spill] sm:$0xff] }
 0x2d2   : >> { %11683 = vst [vmem:[#allocation53_spill] sm:$0xff] %v9718_v18  ;;  %v9722_v48 = vsel %vm330_vm6, %v9567_v33, %v5437_v35  ;;  %v9726_v36 = vsel %vm330_vm6, %v9579_v15, %v5449_v54  ;;  %v9730_v23 = vsel %vm330_vm6, %v9583_v26, %v5453_v25  ;;  %v2366_v59 = vrot.slane %v2344_v50, %v8291_v27  ;;  %v9750_v25 = vpop.f32.mrb[26].mxu0 }
 0x2d3   : >> { %11684 = vst [vmem:[#allocation54_spill] sm:$0xff] %v9722_v48  ;;  %11685 = vst [vmem:[#allocation39_spill] sm:$0xff] %v9726_v36  ;;  %v2373_v21 = vrot.slane %v2345_v56, %v8291_v27  ;;  %v9738_v49 = vsel %vm330_vm6, %v9575_v41, %v5441_v55  ;;  %v9742_v35 = vsel %vm330_vm6, %v9587_v24, %v5457_v44 }
 0x2d4   : >> { %11686 = vst [vmem:[#allocation45_spill] sm:$0xff] %v9730_v23  ;;  %11687 = vst [vmem:[#allocation50_spill] sm:$0xff] %v9734_v46  ;;  %v2374_v33 = vcombine.high %v2352_v2, %v2352_v2  ;;  %v2375_v15 = vcombine.high %v2359_v38, %v2359_v38  ;;  %v2376_v54 = vcombine.high %v2366_v59, %v2366_v59 }
 0x2d5   : >> { %11688 = vst [vmem:[#allocation56_spill] sm:$0xff] %v9738_v49  ;;  %11689 = vst [vmem:[#allocation57_spill] sm:$0xff] %v9742_v35  ;;  %v2377_v29 = vcombine.high %v2373_v21, %v2373_v21  ;;  %v5365_v26 = vrot.slane %v2352_v2, %v8297_v28  ;;  %v5369_v50 = vrot.slane %v2366_v59, %v8297_v28 }
 0x2d6   : >> { %v5373_v56 = vrot.slane %v2374_v33, %v8297_v28  ;;  %v5381_v61 = vrot.slane %v2359_v38, %v8297_v28  ;;  %v5385_v7 = vrot.slane %v2373_v21, %v8297_v28  ;;  %v5389_v41 = vrot.slane %v2375_v15, %v8297_v28  ;;  %11690 = vst [vmem:[#allocation75_spill] sm:$0xff] %v9750_v25 }
 0x2d7   : >> { %v5377_v24 = vrot.slane %v2376_v54, %v8297_v28  ;;  %v5393_v55 = vrot.slane %v2377_v29, %v8297_v28  ;;  %v9756_v44 = vsel %vm330_vm6, %v9663_v9, %v5365_v26  ;;  %v9759_v2 = vsel %vm330_vm6, %v6908_v43, %v5369_v50  ;;  %v11699_v54 = vld [vmem:[#allocation11_spill] sm:$0xff] }
 0x2d8   : >> { %11691 = vst [vmem:[#allocation76_spill] sm:$0xff] %v9756_v44  ;;  %11692 = vst [vmem:[#allocation77_spill] sm:$0xff] %v9759_v2  ;;  %v9762_v59 = vsel %vm330_vm6, %v6909_v63, %v5373_v56  ;;  %v9766_v38 = vsel %vm330_vm6, %v9667_v20, %v5381_v61  ;;  %v9769_v21 = vsel %vm330_vm6, %v6912_v52, %v5385_v7  ;;  %v11700_v20 = vld [vmem:[#allocation51_spill] sm:$0xff] }
 0x2d9   : >> { %11693 = vst [vmem:[#allocation78_spill] sm:$0xff] %v9762_v59  ;;  %11694 = vst [vmem:[#allocation79_spill] sm:$0xff] %v9766_v38  ;;  %v9772_v33 = vsel %vm330_vm6, %v6913_v3, %v5389_v41  ;;  %v9775_v15 = vsel %vm330_vm6, %v6910_v62, %v5377_v24  ;;  %v9778_v9 = vsel %vm330_vm6, %v6914_v12, %v5393_v55  ;;  %v11701_v52 = vld [vmem:[#allocation55_spill] sm:$0xff]  ;;  %v11702_v3 = vld [vmem:[#allocation58_spill] sm:$0xff] }
 0x2da   : >> { %11695 = vst [vmem:[#allocation80_spill] sm:$0xff] %v9769_v21  ;;  %11696 = vst [vmem:[#allocation81_spill] sm:$0xff] %v9772_v33  ;;  %v2699_v43 = vrot.slane %v9603_v34, %v8291_v27  ;;  %v2706_v63 = vrot.slane %v2692_v57, %v8291_v27  ;;  %v2556_v29 = vadd.f32 %v11700_v20, %v11699_v54  ;;  %v11703_v62 = vld [vmem:[#allocation59_spill] sm:$0xff]  ;;  %v11712_v38 = vld [vmem:[#allocation18_spill] sm:$0xff] }
 0x2db   : >> { %11697 = vst [vmem:[#allocation82_spill] sm:$0xff] %v9775_v15  ;;  %11698 = vst [vmem:[#allocation83_spill] sm:$0xff] %v9778_v9  ;;  %v2567_v26 = vadd.f32 %v11701_v52, %v11500_v19  ;;  %v9789_v50 = vadd.f32 %v11702_v3, %v11606_v51  ;;  %v9793_v56 = vadd.f32 %v11703_v62, %v11501_v17  ;;  %v9801_v62 = vpop.f32.mrb[27].mxu0  ;;  %v9852_v15 = vpop.f32.mrb[24].mxu1  ;;  %v11714_v59 = vld [vmem:[#allocation31_spill] sm:$0xff] }
 0x2dc   : >> { %v2707_v12 = vcombine.high %v2699_v43, %v2699_v43  ;;  %v2708_v61 = vcombine.high %v2706_v63, %v2706_v63  ;;  %v2715_v34 = vrot.slane %v2699_v43, %v8291_v27  ;;  %v2722_v57 = vrot.slane %v2706_v63, %v8291_v27  ;;  %11704 = vst [vmem:[#allocation51_spill] sm:$0xff] %v9801_v62 }
 0x2dd   : >> { %v2594_v7 = vcombine.high %v2556_v29, %v2556_v29  ;;  %v2601_v41 = vrot.slane %v2556_v29, %v8291_v27  ;;  %v2741_v24 = vcombine.high %v2567_v26, %v2567_v26  ;;  %v2748_v55 = vrot.slane %v2567_v26, %v8291_v27  ;;  %11710 = vst [vmem:[#allocation55_spill] sm:$0xff] %v9852_v15 }
 0x2de   : >> { %v2729_v20 = vrot.slane %v2707_v12, %v8291_v27  ;;  %v2736_v52 = vrot.slane %v2708_v61, %v8291_v27  ;;  %v2737_v3 = vcombine.high %v2715_v34, %v2715_v34  ;;  %v2738_v25 = vcombine.high %v2722_v57, %v2722_v57 }
 0x2df   : >> { %v5589_v46 = vrot.slane %v2715_v34, %v8297_v28  ;;  %v5605_v43 = vrot.slane %v2722_v57, %v8297_v28  ;;  %v2608_v63 = vrot.slane %v2594_v7, %v8291_v27  ;;  %v2609_v53 = vcombine.high %v2601_v41, %v2601_v41 }
 0x2e0   : >> { %v2739_v17 = vcombine.high %v2729_v20, %v2729_v20  ;;  %v2740_v29 = vcombine.high %v2736_v52, %v2736_v52  ;;  %v5593_v9 = vrot.slane %v2729_v20, %v8297_v28  ;;  %v5597_v26 = vrot.slane %v2737_v3, %v8297_v28  ;;  %v11705_v3 = vld [vmem:[#allocation23_spill] sm:$0xff] }
 0x2e1   : >> { %v5609_v12 = vrot.slane %v2736_v52, %v8297_v28  ;;  %v5613_v61 = vrot.slane %v2738_v25, %v8297_v28  ;;  %v9812_v62 = vsel %vm357_vm15, %v9096_v42, %v5589_v46  ;;  %v9816_v34 = vsel %vm357_vm15, %v9100_v8, %v5605_v43  ;;  %v11706_v25 = vld [vmem:[#allocation60_spill] sm:$0xff]  ;;  %v11707_v46 = vld [vmem:[#allocation61_spill] sm:$0xff] }
 0x2e2   : >> { %v5601_v57 = vrot.slane %v2739_v17, %v8297_v28  ;;  %v5617_v7 = vrot.slane %v2740_v29, %v8297_v28  ;;  %v9822_v20 = vsel %vm357_vm15, %v9106_v37, %v5593_v9  ;;  %v9826_v52 = vsel %vm357_vm15, %v11705_v3, %v5597_v26  ;;  %v11708_v29 = vld [vmem:[#allocation62_spill] sm:$0xff]  ;;  %v11709_v37 = vld [vmem:[#allocation63_spill] sm:$0xff] }
 0x2e3   : >> { %v9830_v42 = vsel %vm357_vm15, %v11706_v25, %v5609_v12  ;;  %v9834_v8 = vsel %vm357_vm15, %v11707_v46, %v5613_v61  ;;  %v2610_v43 = vcombine.high %v2608_v63, %v2608_v63  ;;  %v2617_v17 = vrot.slane %v2601_v41, %v8291_v27 }
 0x2e4   : >> { %v9839_v33 = vsel %vm357_vm15, %v11708_v29, %v5601_v57  ;;  %v9843_v9 = vsel %vm357_vm15, %v11709_v37, %v5617_v7  ;;  %v2624_v26 = vrot.slane %v2608_v63, %v8291_v27  ;;  %v2631_v12 = vrot.slane %v2609_v53, %v8291_v27  ;;  %v11711_v37 = vld [vmem:[#allocation27_spill] sm:$0xff] }
 0x2e5   : >> { %v2638_v3 = vrot.slane %v2610_v43, %v8291_v27  ;;  %v2639_v25 = vcombine.high %v2617_v17, %v2617_v17  ;;  %v5525_v61 = vrot.slane %v2617_v17, %v8297_v28  ;;  %v2755_v46 = vrot.slane %v2741_v24, %v8291_v27 }
 0x2e6   : >> { %v2640_v41 = vcombine.high %v2624_v26, %v2624_v26  ;;  %v2641_v21 = vcombine.high %v2631_v12, %v2631_v12  ;;  %v5529_v57 = vrot.slane %v2631_v12, %v8297_v28  ;;  %v5541_v29 = vrot.slane %v2624_v26, %v8297_v28  ;;  %v11713_v26 = vld [vmem:[#allocation28_spill] sm:$0xff] }
 0x2e7   : >> { %v2642_v7 = vcombine.high %v2638_v3, %v2638_v3  ;;  %v5533_v63 = vrot.slane %v2639_v25, %v8297_v28  ;;  %v5545_v53 = vrot.slane %v2638_v3, %v8297_v28  ;;  %v9858_v43 = vsel %vm357_vm15, %v11711_v37, %v5525_v61  ;;  %v11715_v61 = vld [vmem:[#allocation19_spill] sm:$0xff] }
 0x2e8   : >> { %v5537_v17 = vrot.slane %v2641_v21, %v8297_v28  ;;  %v5549_v24 = vrot.slane %v2640_v41, %v8297_v28  ;;  %v9864_v12 = vsel %vm357_vm15, %v11712_v38, %v5529_v57  ;;  %v9868_v15 = vsel %vm357_vm15, %v11713_v26, %v5541_v29  ;;  %v11716_v41 = vld [vmem:[#allocation66_spill] sm:$0xff]  ;;  %v11717_v38 = vld [vmem:[#allocation65_spill] sm:$0xff]  ;;  %v11718_v26 = vld [vmem:[#allocation67_spill] sm:$0xff] }
 0x2e9   : >> { %v5553_v25 = vrot.slane %v2642_v7, %v8297_v28  ;;  %v9873_v3 = vsel %vm357_vm15, %v11714_v59, %v5533_v63  ;;  %v9877_v37 = vsel %vm357_vm15, %v11715_v61, %v5545_v53  ;;  %v2756_v21 = vcombine.high %v2748_v55, %v2748_v55 }
 0x2ea   : >> { %v9881_v2 = vsel %vm357_vm15, %v11716_v41, %v5537_v17  ;;  %v9885_v57 = vsel %vm357_vm15, %v11717_v38, %v5549_v24  ;;  %v2757_v29 = vcombine.high %v2755_v46, %v2755_v46  ;;  %v2764_v7 = vrot.slane %v2748_v55, %v8291_v27 }
 0x2eb   : >> { %v9890_v59 = vsel %vm357_vm15, %v11718_v26, %v5553_v25  ;;  %v2771_v63 = vrot.slane %v2755_v46, %v8291_v27  ;;  %v2778_v53 = vrot.slane %v2756_v21, %v8291_v27  ;;  %v2643_v61 = vcombine.high %v9789_v50, %v9789_v50  ;;  %v9902_v46 = vpop.f32.mrb[25].mxu1 }
 0x2ec   : >> { %v2785_v17 = vrot.slane %v2757_v29, %v8291_v27  ;;  %v2786_v41 = vcombine.high %v2764_v7, %v2764_v7  ;;  %v5621_v24 = vrot.slane %v2764_v7, %v8297_v28  ;;  %v2650_v38 = vrot.slane %v9789_v50, %v8291_v27  ;;  %11719 = vst [vmem:[#allocation58_spill] sm:$0xff] %v9902_v46  ;;  %v11723_v46 = vld [vmem:[#allocation37_spill] sm:$0xff] }
 0x2ed   : >> { %v2787_v55 = vcombine.high %v2771_v63, %v2771_v63  ;;  %v2788_v44 = vcombine.high %v2778_v53, %v2778_v53  ;;  %v5625_v25 = vrot.slane %v2778_v53, %v8297_v28  ;;  %v5637_v26 = vrot.slane %v2771_v63, %v8297_v28 }
 0x2ee   : >> { %v2789_v21 = vcombine.high %v2785_v17, %v2785_v17  ;;  %v5629_v35 = vrot.slane %v2786_v41, %v8297_v28  ;;  %v5641_v23 = vrot.slane %v2785_v17, %v8297_v28  ;;  %v9908_v29 = vsel %vm357_vm15, %v9297_v58, %v5621_v24  ;;  %v11720_v58 = vld [vmem:[#allocation36_spill] sm:$0xff] }
 0x2ef   : >> { %v5633_v7 = vrot.slane %v2788_v44, %v8297_v28  ;;  %v5645_v50 = vrot.slane %v2787_v55, %v8297_v28  ;;  %v9914_v53 = vsel %vm357_vm15, %v9301_v6, %v5625_v25  ;;  %v9918_v63 = vsel %vm357_vm15, %v9305_v0, %v5637_v26  ;;  %v11721_v55 = vld [vmem:[#allocation35_spill] sm:$0xff]  ;;  %v11722_v25 = vld [vmem:[#allocation33_spill] sm:$0xff] }
 0x2f0   : >> { %v5649_v41 = vrot.slane %v2789_v21, %v8297_v28  ;;  %v9923_v17 = vsel %vm357_vm15, %v9310_v14, %v5629_v35  ;;  %v9927_v24 = vsel %vm357_vm15, %v11720_v58, %v5641_v23  ;;  %v2657_v44 = vrot.slane %v2643_v61, %v8291_v27 }
 0x2f1   : >> { %v9932_v6 = vsel %vm357_vm15, %v11721_v55, %v5633_v7  ;;  %v9936_v0 = vsel %vm357_vm15, %v11722_v25, %v5645_v50  ;;  %v2658_v26 = vcombine.high %v2650_v38, %v2650_v38  ;;  %v2666_v21 = vrot.slane %v2650_v38, %v8291_v27 }
 0x2f2   : >> { %v9941_v14 = vsel %vm357_vm15, %v11723_v46, %v5649_v41  ;;  %v2659_v35 = vcombine.high %v2657_v44, %v2657_v44  ;;  %v2673_v23 = vrot.slane %v2657_v44, %v8291_v27  ;;  %v3202_v61 = vcombine.high %v9793_v56, %v9793_v56 }
 0x2f3   : >> { %v2680_v7 = vrot.slane %v2658_v26, %v8291_v27  ;;  %v2688_v58 = vcombine.high %v2666_v21, %v2666_v21  ;;  %v5557_v55 = vrot.slane %v2666_v21, %v8297_v28  ;;  %v3209_v50 = vrot.slane %v9793_v56, %v8291_v27 }
 0x2f4   : >> { %v2687_v38 = vrot.slane %v2659_v35, %v8291_v27  ;;  %v2689_v25 = vcombine.high %v2673_v23, %v2673_v23  ;;  %v5573_v46 = vrot.slane %v2673_v23, %v8297_v28  ;;  %v3216_v41 = vrot.slane %v3202_v61, %v8291_v27  ;;  %v11725_v35 = vld [vmem:[#allocation22_spill] sm:$0xff]  ;;  %v11726_v61 = vld [vmem:[#allocation24_spill] sm:$0xff] }
 0x2f5   : >> { %v2690_v36 = vcombine.high %v2680_v7, %v2680_v7  ;;  %v5561_v44 = vrot.slane %v2680_v7, %v8297_v28  ;;  %v5565_v49 = vrot.slane %v2688_v58, %v8297_v28  ;;  %v9957_v26 = vsel %vm357_vm15, %v11724_v1, %v5557_v55  ;;  %v11727_v58 = vld [vmem:[#allocation69_spill] sm:$0xff] }
 0x2f6   : >> { %v2691_v21 = vcombine.high %v2687_v38, %v2687_v38  ;;  %v5577_v48 = vrot.slane %v2687_v38, %v8297_v28  ;;  %v5581_v56 = vrot.slane %v2689_v25, %v8297_v28  ;;  %v9963_v18 = vsel %vm357_vm15, %v11725_v35, %v5573_v46  ;;  %v11728_v38 = vld [vmem:[#allocation70_spill] sm:$0xff]  ;;  %v9983_v35 = vpop.f32.mrb[26].mxu1 }
 0x2f7   : >> { %v5569_v23 = vrot.slane %v2690_v36, %v8297_v28  ;;  %v9968_v7 = vsel %vm357_vm15, %v11726_v61, %v5561_v44  ;;  %v9972_v22 = vsel %vm357_vm15, %v11727_v58, %v5565_v49  ;;  %v3217_v1 = vcombine.high %v3209_v50, %v3209_v50  ;;  %11730 = vst [vmem:[#allocation59_spill] sm:$0xff] %v9983_v35  ;;  %v11731_v44 = vld [vmem:[#allocation72_spill] sm:$0xff] }
 0x2f8   : >> { %v5585_v55 = vrot.slane %v2691_v21, %v8297_v28  ;;  %v9977_v25 = vsel %vm357_vm15, %v11728_v38, %v5577_v48  ;;  %v9981_v46 = vsel %vm357_vm15, %v11729_v31, %v5581_v56  ;;  %v3218_v36 = vcombine.high %v3216_v41, %v3216_v41  ;;  %v11733_v56 = vld [vmem:[#allocation20_spill] sm:$0xff] }
 0x2f9   : >> { %v9987_v61 = vsel %vm357_vm15, %v11731_v44, %v5569_v23  ;;  %v3225_v49 = vrot.slane %v3209_v50, %v8291_v27  ;;  %v3232_v58 = vrot.slane %v3216_v41, %v8291_v27  ;;  %v3239_v21 = vrot.slane %v3217_v1, %v8291_v27  ;;  %v11734_v35 = vld [vmem:[#allocation64_spill] sm:$0xff] }
 0x2fa   : >> { %v9994_v48 = vsel %vm357_vm15, %v11732_v13, %v5585_v55  ;;  %v3246_v31 = vrot.slane %v3218_v36, %v8291_v27  ;;  %v3066_v38 = vadd.f32 %v11733_v56, %v11699_v54  ;;  %v3077_v11 = vadd.f32 %v11734_v35, %v11500_v19 }
 0x2fb   : >> { %v3247_v23 = vcombine.high %v3225_v49, %v3225_v49  ;;  %v3248_v44 = vcombine.high %v3232_v58, %v3232_v58  ;;  %v3249_v47 = vcombine.high %v3239_v21, %v3239_v21  ;;  %v5909_v50 = vrot.slane %v3225_v49, %v8297_v28 }
 0x2fc   : >> { %v3250_v41 = vcombine.high %v3246_v31, %v3246_v31  ;;  %v5913_v1 = vrot.slane %v3239_v21, %v8297_v28  ;;  %v5925_v45 = vrot.slane %v3232_v58, %v8297_v28  ;;  %v5929_v13 = vrot.slane %v3246_v31, %v8297_v28 }
 0x2fd   : >> { %v5917_v55 = vrot.slane %v3247_v23, %v8297_v28  ;;  %v5921_v36 = vrot.slane %v3249_v47, %v8297_v28  ;;  %v5933_v56 = vrot.slane %v3248_v44, %v8297_v28  ;;  %v10010_v35 = vsel %vm335_vm3, %v9812_v62, %v5909_v50  ;;  %v10037_v23 = vpop.f32.mrb[28].mxu0  ;;  %v11744_v50 = vld [vmem:[#allocation29_spill] sm:$0xff] }
 0x2fe   : >> { %v5937_v19 = vrot.slane %v3250_v41, %v8297_v28  ;;  %v10015_v49 = vsel %vm335_vm3, %v9822_v20, %v5913_v1  ;;  %v10019_v58 = vsel %vm335_vm3, %v9816_v34, %v5925_v45  ;;  %v10023_v21 = vsel %vm335_vm3, %v9830_v42, %v5929_v13  ;;  %11741 = vst [vmem:[#allocation18_spill] sm:$0xff] %v10037_v23  ;;  %v11746_v13 = vld [vmem:[#allocation15_spill] sm:$0xff] }
 0x2ff   : >> { %11735 = vst [vmem:[#allocation23_spill] sm:$0xff] %v10015_v49  ;;  %11736 = vst [vmem:[#allocation60_spill] sm:$0xff] %v10019_v58  ;;  %v10027_v47 = vsel %vm335_vm3, %v9826_v52, %v5917_v55  ;;  %v10031_v62 = vsel %vm335_vm3, %v9839_v33, %v5921_v36  ;;  %v10035_v20 = vsel %vm335_vm3, %v9834_v8, %v5933_v56  ;;  %v11743_v33 = vld [vmem:[#allocation17_spill] sm:$0xff]  ;;  %v11745_v8 = vld [vmem:[#allocation68_spill] sm:$0xff] }
 0x300   : >> { %11737 = vst [vmem:[#allocation61_spill] sm:$0xff] %v10023_v21  ;;  %11738 = vst [vmem:[#allocation62_spill] sm:$0xff] %v10027_v47  ;;  %v3104_v31 = vcombine.high %v3066_v38, %v3066_v38  ;;  %v10041_v45 = vsel %vm335_vm3, %v9843_v9, %v5937_v19  ;;  %v3111_v34 = vrot.slane %v3066_v38, %v8291_v27  ;;  %v11747_v55 = vld [vmem:[#allocation34_spill] sm:$0xff]  ;;  %v10065_v47 = vpop.f32.mrb[27].mxu1 }
 0x301   : >> { %11739 = vst [vmem:[#allocation63_spill] sm:$0xff] %v10031_v62  ;;  %11740 = vst [vmem:[#allocation27_spill] sm:$0xff] %v10035_v20  ;;  %v3251_v42 = vcombine.high %v3077_v11, %v3077_v11  ;;  %v3258_v52 = vrot.slane %v3077_v11, %v8291_v27  ;;  %v2580_v41 = vadd.f32 %v11744_v50, %v11743_v33 }
 0x302   : >> { %11742 = vst [vmem:[#allocation28_spill] sm:$0xff] %v10041_v45  ;;  %v3118_v44 = vrot.slane %v3104_v31, %v8291_v27  ;;  %v10050_v1 = vadd.f32 %v11745_v8, %v11606_v51  ;;  %v10054_v36 = vadd.f32 %v11747_v55, %v11746_v13  ;;  %v3119_v19 = vcombine.high %v3111_v34, %v3111_v34 }
 0x303   : >> { %v3127_v9 = vrot.slane %v3111_v34, %v8291_v27  ;;  %v3265_v38 = vrot.slane %v3251_v42, %v8291_v27  ;;  %v3266_v56 = vcombine.high %v3258_v52, %v3258_v52  ;;  %v3274_v23 = vrot.slane %v3258_v52, %v8291_v27  ;;  %11748 = vst [vmem:[#allocation31_spill] sm:$0xff] %v10065_v47  ;;  %v11785_v47 = vld [vmem:[#allocation30_spill] sm:$0xff] }
 0x304   : >> { %v3120_v11 = vcombine.high %v3118_v44, %v3118_v44  ;;  %v3134_v31 = vrot.slane %v3118_v44, %v8291_v27  ;;  %v2888_v50 = vcombine.high %v2580_v41, %v2580_v41  ;;  %v3141_v45 = vrot.slane %v3119_v19, %v8291_v27 }
 0x305   : >> { %v3149_v8 = vcombine.high %v3127_v9, %v3127_v9  ;;  %v5845_v62 = vrot.slane %v3127_v9, %v8297_v28  ;;  %v3267_v20 = vcombine.high %v3265_v38, %v3265_v38  ;;  %v3281_v42 = vrot.slane %v3265_v38, %v8291_v27 }
 0x306   : >> { %v3148_v55 = vrot.slane %v3120_v11, %v8291_v27  ;;  %v3150_v21 = vcombine.high %v3134_v31, %v3134_v31  ;;  %v5861_v34 = vrot.slane %v3134_v31, %v8297_v28  ;;  %v3151_v49 = vcombine.high %v3141_v45, %v3141_v45 }
 0x307   : >> { %v5849_v44 = vrot.slane %v3141_v45, %v8297_v28  ;;  %v5853_v52 = vrot.slane %v3149_v8, %v8297_v28  ;;  %v10071_v19 = vsel %vm335_vm3, %v9858_v43, %v5845_v62  ;;  %v3288_v43 = vrot.slane %v3266_v56, %v8291_v27 }
 0x308   : >> { %v3152_v9 = vcombine.high %v3148_v55, %v3148_v55  ;;  %v5865_v58 = vrot.slane %v3148_v55, %v8297_v28  ;;  %v5869_v11 = vrot.slane %v3150_v21, %v8297_v28  ;;  %v10077_v31 = vsel %vm335_vm3, %v9868_v15, %v5861_v34 }
 0x309   : >> { %v5857_v38 = vrot.slane %v3151_v49, %v8297_v28  ;;  %v10082_v45 = vsel %vm335_vm3, %v9864_v12, %v5849_v44  ;;  %v10086_v8 = vsel %vm335_vm3, %v9873_v3, %v5853_v52  ;;  %v3295_v49 = vrot.slane %v3267_v20, %v8291_v27 }
 0x30a   : >> { %11749 = vst [vmem:[#allocation19_spill] sm:$0xff] %v10086_v8  ;;  %v5873_v62 = vrot.slane %v3152_v9, %v8297_v28  ;;  %v10092_v21 = vsel %vm335_vm3, %v9877_v37, %v5865_v58  ;;  %v10096_v15 = vsel %vm335_vm3, %v9885_v57, %v5869_v11  ;;  %v3296_v3 = vcombine.high %v3274_v23, %v3274_v23  ;;  %v10113_v9 = vpop.f32.mrb[29].mxu0 }
 0x30b   : >> { %11750 = vst [vmem:[#allocation66_spill] sm:$0xff] %v10092_v21  ;;  %11751 = vst [vmem:[#allocation65_spill] sm:$0xff] %v10096_v15  ;;  %v10101_v12 = vsel %vm335_vm3, %v9881_v2, %v5857_v38  ;;  %v3297_v55 = vcombine.high %v3281_v42, %v3281_v42  ;;  %v3298_v34 = vcombine.high %v3288_v43, %v3288_v43 }
 0x30c   : >> { %11752 = vst [vmem:[#allocation67_spill] sm:$0xff] %v10101_v12  ;;  %v10105_v56 = vsel %vm335_vm3, %v9890_v59, %v5873_v62  ;;  %v3299_v44 = vcombine.high %v3295_v49, %v3295_v49  ;;  %v5941_v37 = vrot.slane %v3274_v23, %v8297_v28  ;;  %v5945_v58 = vrot.slane %v3288_v43, %v8297_v28 }
 0x30d   : >> { %11753 = vst [vmem:[#allocation36_spill] sm:$0xff] %v10105_v56  ;;  %v5949_v57 = vrot.slane %v3296_v3, %v8297_v28  ;;  %v5953_v20 = vrot.slane %v3298_v34, %v8297_v28  ;;  %v5957_v52 = vrot.slane %v3281_v42, %v8297_v28  ;;  %v5961_v2 = vrot.slane %v3295_v49, %v8297_v28 }
 0x30e   : >> { %11754 = vst [vmem:[#allocation35_spill] sm:$0xff] %v10113_v9  ;;  %v5965_v11 = vrot.slane %v3297_v55, %v8297_v28  ;;  %v5969_v59 = vrot.slane %v3299_v44, %v8297_v28  ;;  %v10119_v38 = vsel %vm335_vm3, %v9908_v29, %v5941_v37  ;;  %v10123_v23 = vsel %vm335_vm3, %v9914_v53, %v5945_v58 }
 0x30f   : >> { %11755 = vst [vmem:[#allocation33_spill] sm:$0xff] %v10119_v38  ;;  %11756 = vst [vmem:[#allocation37_spill] sm:$0xff] %v10123_v23  ;;  %v10127_v43 = vsel %vm335_vm3, %v9923_v17, %v5949_v57  ;;  %v10131_v42 = vsel %vm335_vm3, %v9932_v6, %v5953_v20  ;;  %v10135_v62 = vsel %vm335_vm3, %v9918_v63, %v5957_v52  ;;  %v10168_v52 = vpop.f32.mrb[30].mxu0 }
 0x310   : >> { %11757 = vst [vmem:[#allocation21_spill] sm:$0xff] %v10127_v43  ;;  %11758 = vst [vmem:[#allocation22_spill] sm:$0xff] %v10131_v42  ;;  %v10139_v29 = vsel %vm335_vm3, %v9927_v24, %v5961_v2  ;;  %v10143_v53 = vsel %vm335_vm3, %v9936_v0, %v5965_v11  ;;  %v10147_v17 = vsel %vm335_vm3, %v9941_v14, %v5969_v59  ;;  %v11796_v43 = vld [vmem:[#allocation76_spill] sm:$0xff] }
 0x311   : >> { %11759 = vst [vmem:[#allocation24_spill] sm:$0xff] %v10135_v62  ;;  %11760 = vst [vmem:[#allocation69_spill] sm:$0xff] %v10139_v29  ;;  %v2895_v49 = vrot.slane %v2580_v41, %v8291_v27  ;;  %v2902_v6 = vrot.slane %v2888_v50, %v8291_v27  ;;  %v3153_v63 = vcombine.high %v10050_v1, %v10050_v1 }
 0x312   : >> { %11761 = vst [vmem:[#allocation70_spill] sm:$0xff] %v10143_v53  ;;  %11762 = vst [vmem:[#allocation71_spill] sm:$0xff] %v10147_v17  ;;  %v3160_v3 = vrot.slane %v10050_v1, %v8291_v27  ;;  %v2790_v24 = vcombine.high %v10054_v36, %v10054_v36  ;;  %v10159_v0 = vrot.slane %v10054_v36, %v8291_v27  ;;  %v11791_v17 = vld [vmem:[#allocation49_spill] sm:$0xff] }
 0x313   : >> { %v2903_v55 = vcombine.high %v2895_v49, %v2895_v49  ;;  %v2904_v14 = vcombine.high %v2902_v6, %v2902_v6  ;;  %v2911_v34 = vrot.slane %v2895_v49, %v8291_v27  ;;  %v2918_v41 = vrot.slane %v2902_v6, %v8291_v27  ;;  %11763 = vst [vmem:[#allocation72_spill] sm:$0xff] %v10168_v52 }
 0x314   : >> { %v3167_v50 = vrot.slane %v3153_v63, %v8291_v27  ;;  %v3168_v44 = vcombine.high %v3160_v3, %v3160_v3  ;;  %v3176_v37 = vrot.slane %v3160_v3, %v8291_v27  ;;  %v2804_v1 = vrot.slane %v2790_v24, %v8291_v27 }
 0x315   : >> { %v2925_v58 = vrot.slane %v2903_v55, %v8291_v27  ;;  %v2932_v57 = vrot.slane %v2904_v14, %v8291_v27  ;;  %v2933_v20 = vcombine.high %v2911_v34, %v2911_v34  ;;  %v2934_v36 = vcombine.high %v2918_v41, %v2918_v41 }
 0x316   : >> { %v5717_v2 = vrot.slane %v2911_v34, %v8297_v28  ;;  %v5733_v11 = vrot.slane %v2918_v41, %v8297_v28  ;;  %v3169_v59 = vcombine.high %v3167_v50, %v3167_v50  ;;  %v3183_v49 = vrot.slane %v3167_v50, %v8291_v27 }
 0x317   : >> { %v2935_v6 = vcombine.high %v2925_v58, %v2925_v58  ;;  %v2936_v63 = vcombine.high %v2932_v57, %v2932_v57  ;;  %v5721_v3 = vrot.slane %v2925_v58, %v8297_v28  ;;  %v5725_v24 = vrot.slane %v2933_v20, %v8297_v28 }
 0x318   : >> { %v5737_v55 = vrot.slane %v2932_v57, %v8297_v28  ;;  %v5741_v14 = vrot.slane %v2934_v36, %v8297_v28  ;;  %v10179_v52 = vsel %vm357_vm15, %v9512_v39, %v5717_v2  ;;  %v10183_v34 = vsel %vm357_vm15, %v9528_v4, %v5733_v11  ;;  %v11764_v2 = vld [vmem:[#allocation43_spill] sm:$0xff] }
 0x319   : >> { %v5729_v41 = vrot.slane %v2935_v6, %v8297_v28  ;;  %v5745_v50 = vrot.slane %v2936_v63, %v8297_v28  ;;  %v10189_v58 = vsel %vm357_vm15, %v9520_v32, %v5721_v3  ;;  %v10193_v57 = vsel %vm357_vm15, %v9524_v5, %v5725_v24 }
 0x31a   : >> { %v10197_v39 = vsel %vm357_vm15, %v9537_v30, %v5737_v55  ;;  %v10201_v4 = vsel %vm357_vm15, %v9541_v40, %v5741_v14  ;;  %v3190_v20 = vrot.slane %v3168_v44, %v8291_v27  ;;  %v3197_v36 = vrot.slane %v3169_v59, %v8291_v27 }
 0x31b   : >> { %v10207_v32 = vsel %vm357_vm15, %v9533_v10, %v5729_v41  ;;  %v10211_v5 = vsel %vm357_vm15, %v11764_v2, %v5745_v50  ;;  %v3198_v11 = vcombine.high %v3176_v37, %v3176_v37  ;;  %v3199_v6 = vcombine.high %v3183_v49, %v3183_v49  ;;  %v10229_v50 = vpop.f32.mrb[31].mxu0 }
 0x31c   : >> { %v3200_v30 = vcombine.high %v3190_v20, %v3190_v20  ;;  %v3201_v63 = vcombine.high %v3197_v36, %v3197_v36  ;;  %v5877_v3 = vrot.slane %v3176_v37, %v8297_v28  ;;  %v5881_v40 = vrot.slane %v3190_v20, %v8297_v28  ;;  %11767 = vst [vmem:[#allocation64_spill] sm:$0xff] %v10229_v50 }
 0x31d   : >> { %v5885_v44 = vrot.slane %v3198_v11, %v8297_v28  ;;  %v5893_v59 = vrot.slane %v3183_v49, %v8297_v28  ;;  %v5897_v24 = vrot.slane %v3197_v36, %v8297_v28  ;;  %v5901_v10 = vrot.slane %v3199_v6, %v8297_v28  ;;  %v11774_v6 = vld [vmem:[#allocation16_spill] sm:$0xff] }
 0x31e   : >> { %v5889_v55 = vrot.slane %v3200_v30, %v8297_v28  ;;  %v5905_v14 = vrot.slane %v3201_v63, %v8297_v28  ;;  %v10223_v41 = vsel %vm335_vm3, %v9957_v26, %v5877_v3  ;;  %v10227_v37 = vsel %vm335_vm3, %v9968_v7, %v5881_v40  ;;  %v11776_v63 = vld [vmem:[#allocation14_spill] sm:$0xff] }
 0x31f   : >> { %11765 = vst [vmem:[#allocation73_spill] sm:$0xff] %v10223_v41  ;;  %11766 = vst [vmem:[#allocation20_spill] sm:$0xff] %v10227_v37  ;;  %v10233_v49 = vsel %vm335_vm3, %v9972_v22, %v5885_v44  ;;  %v10237_v20 = vsel %vm335_vm3, %v9963_v18, %v5893_v59  ;;  %v10241_v36 = vsel %vm335_vm3, %v9977_v25, %v5897_v24  ;;  %v11777_v3 = vld [vmem:[#allocation74_spill] sm:$0xff]  ;;  %v11778_v44 = vld [vmem:[#allocation40_spill] sm:$0xff] }
 0x320   : >> { %11768 = vst [vmem:[#allocation29_spill] sm:$0xff] %v10233_v49  ;;  %11769 = vst [vmem:[#allocation68_spill] sm:$0xff] %v10237_v20  ;;  %v10245_v26 = vsel %vm335_vm3, %v9981_v46, %v5901_v10  ;;  %v10249_v7 = vsel %vm335_vm3, %v9987_v61, %v5889_v55  ;;  %v10253_v22 = vsel %vm335_vm3, %v9994_v48, %v5905_v14  ;;  %v11775_v46 = vld [vmem:[#allocation38_spill] sm:$0xff]  ;;  %v11788_v37 = vld [vmem:[#allocation47_spill] sm:$0xff] }
 0x321   : >> { %11770 = vst [vmem:[#allocation34_spill] sm:$0xff] %v10241_v36  ;;  %11771 = vst [vmem:[#allocation43_spill] sm:$0xff] %v10245_v26  ;;  %v2805_v18 = vcombine.high %v10159_v0, %v10159_v0  ;;  %v2806_v2 = vcombine.high %v2804_v1, %v2804_v1  ;;  %v2813_v25 = vrot.slane %v10159_v0, %v8291_v27  ;;  %v11779_v24 = vld [vmem:[#allocation42_spill] sm:$0xff]  ;;  %v11789_v41 = vld [vmem:[#allocation53_spill] sm:$0xff] }
 0x322   : >> { %11772 = vst [vmem:[#allocation84_spill] sm:$0xff] %v10249_v7  ;;  %11773 = vst [vmem:[#allocation85_spill] sm:$0xff] %v10253_v22  ;;  %v2820_v11 = vrot.slane %v2804_v1, %v8291_v27  ;;  %v2583_v30 = vadd.f32 %v11775_v46, %v11774_v6  ;;  %v2575_v61 = vadd.f32 %v11777_v3, %v11776_v63 }
 0x323   : >> { %v2827_v40 = vrot.slane %v2805_v18, %v8291_v27  ;;  %v2834_v48 = vrot.slane %v2806_v2, %v8291_v27  ;;  %v10268_v59 = vadd.f32 %v11778_v44, %v11743_v33  ;;  %v10272_v10 = vadd.f32 %v11779_v24, %v11746_v13  ;;  %v11780_v13 = vld [vmem:[#allocation26_spill] sm:$0xff] }
 0x324   : >> { %v2835_v0 = vcombine.high %v2813_v25, %v2813_v25  ;;  %v2836_v1 = vcombine.high %v2820_v11, %v2820_v11  ;;  %v5653_v55 = vrot.slane %v2813_v25, %v8297_v28  ;;  %v5669_v14 = vrot.slane %v2820_v11, %v8297_v28 }
 0x325   : >> { %v2837_v46 = vcombine.high %v2827_v40, %v2827_v40  ;;  %v2838_v3 = vcombine.high %v2834_v48, %v2834_v48  ;;  %v5657_v18 = vrot.slane %v2827_v40, %v8297_v28  ;;  %v5673_v2 = vrot.slane %v2834_v48, %v8297_v28  ;;  %v11781_v48 = vld [vmem:[#allocation32_spill] sm:$0xff] }
 0x326   : >> { %v5661_v50 = vrot.slane %v2835_v0, %v8297_v28  ;;  %v5677_v44 = vrot.slane %v2836_v1, %v8297_v28  ;;  %v10282_v24 = vsel %vm357_vm15, %v9616_v16, %v5653_v55  ;;  %v10286_v9 = vsel %vm357_vm15, %v9633_v60, %v5669_v14  ;;  %v10298_v1 = vpop.f32.mrb[28].mxu1  ;;  %v11783_v16 = vld [vmem:[#allocation25_spill] sm:$0xff]  ;;  %v11784_v60 = vld [vmem:[#allocation46_spill] sm:$0xff] }
 0x327   : >> { %v5665_v25 = vrot.slane %v2837_v46, %v8297_v28  ;;  %v5681_v11 = vrot.slane %v2838_v3, %v8297_v28  ;;  %v10292_v40 = vsel %vm357_vm15, %v11780_v13, %v5657_v18  ;;  %v10296_v0 = vsel %vm357_vm15, %v11781_v48, %v5673_v2  ;;  %11782 = vst [vmem:[#allocation38_spill] sm:$0xff] %v10298_v1  ;;  %v11786_v18 = vld [vmem:[#allocation48_spill] sm:$0xff] }
 0x328   : >> { %v10302_v55 = vsel %vm357_vm15, %v11783_v16, %v5661_v50  ;;  %v10306_v14 = vsel %vm357_vm15, %v11784_v60, %v5677_v44  ;;  %v2937_v46 = vcombine.high %v2583_v30, %v2583_v30  ;;  %v2944_v3 = vrot.slane %v2583_v30, %v8291_v27 }
 0x329   : >> { %v10311_v13 = vsel %vm357_vm15, %v11785_v47, %v5665_v25  ;;  %v10315_v2 = vsel %vm357_vm15, %v11786_v18, %v5681_v11  ;;  %v2839_v48 = vcombine.high %v2575_v61, %v2575_v61  ;;  %v2846_v1 = vrot.slane %v2575_v61, %v8291_v27 }
 0x32a   : >> { %v2951_v50 = vrot.slane %v2937_v46, %v8291_v27  ;;  %v2952_v16 = vcombine.high %v2944_v3, %v2944_v3  ;;  %v2960_v44 = vrot.slane %v2944_v3, %v8291_v27  ;;  %v3398_v60 = vcombine.high %v10268_v59, %v10268_v59 }
 0x32b   : >> { %v2853_v30 = vrot.slane %v2839_v48, %v8291_v27  ;;  %v2854_v33 = vcombine.high %v2846_v1, %v2846_v1  ;;  %v2862_v47 = vrot.slane %v2846_v1, %v8291_v27  ;;  %v3405_v25 = vrot.slane %v10268_v59, %v8291_v27  ;;  %v10331_v48 = vpop.f32.mrb[29].mxu1 }
 0x32c   : >> { %v2953_v11 = vcombine.high %v2951_v50, %v2951_v50  ;;  %v2967_v18 = vrot.slane %v2951_v50, %v8291_v27  ;;  %v2974_v61 = vrot.slane %v2952_v16, %v8291_v27  ;;  %v2982_v46 = vcombine.high %v2960_v44, %v2960_v44  ;;  %11787 = vst [vmem:[#allocation74_spill] sm:$0xff] %v10331_v48 }
 0x32d   : >> { %v5749_v22 = vrot.slane %v2960_v44, %v8297_v28  ;;  %v2855_v3 = vcombine.high %v2853_v30, %v2853_v30  ;;  %v2869_v7 = vrot.slane %v2853_v30, %v8291_v27  ;;  %v2876_v26 = vrot.slane %v2854_v33, %v8291_v27 }
 0x32e   : >> { %v2981_v1 = vrot.slane %v2953_v11, %v8291_v27  ;;  %v2983_v36 = vcombine.high %v2967_v18, %v2967_v18  ;;  %v2984_v49 = vcombine.high %v2974_v61, %v2974_v61  ;;  %v5753_v59 = vrot.slane %v2974_v61, %v8297_v28 }
 0x32f   : >> { %v5757_v50 = vrot.slane %v2982_v46, %v8297_v28  ;;  %v5765_v16 = vrot.slane %v2967_v18, %v8297_v28  ;;  %v10339_v44 = vsel %vm357_vm15, %v11788_v37, %v5749_v22  ;;  %v2883_v30 = vrot.slane %v2855_v3, %v8291_v27  ;;  %v11790_v46 = vld [vmem:[#allocation54_spill] sm:$0xff] }
 0x330   : >> { %v2985_v20 = vcombine.high %v2981_v1, %v2981_v1  ;;  %v5761_v33 = vrot.slane %v2984_v49, %v8297_v28  ;;  %v5769_v48 = vrot.slane %v2981_v1, %v8297_v28  ;;  %v5773_v11 = vrot.slane %v2983_v36, %v8297_v28  ;;  %v11792_v49 = vld [vmem:[#allocation56_spill] sm:$0xff]  ;;  %v11793_v36 = vld [vmem:[#allocation39_spill] sm:$0xff] }
 0x331   : >> { %v10347_v61 = vsel %vm357_vm15, %v11789_v41, %v5753_v59  ;;  %v10351_v18 = vsel %vm357_vm15, %v11790_v46, %v5757_v50  ;;  %v10355_v37 = vsel %vm357_vm15, %v11791_v17, %v5765_v16  ;;  %v2884_v22 = vcombine.high %v2862_v47, %v2862_v47  ;;  %v11794_v41 = vld [vmem:[#allocation45_spill] sm:$0xff] }
 0x332   : >> { %v5777_v3 = vrot.slane %v2985_v20, %v8297_v28  ;;  %v10360_v1 = vsel %vm357_vm15, %v11792_v49, %v5761_v33  ;;  %v10364_v53 = vsel %vm357_vm15, %v11793_v36, %v5769_v48  ;;  %v10368_v59 = vsel %vm357_vm15, %v11794_v41, %v5773_v11  ;;  %v11795_v16 = vld [vmem:[#allocation57_spill] sm:$0xff] }
 0x333   : >> { %v2885_v50 = vcombine.high %v2869_v7, %v2869_v7  ;;  %v2886_v46 = vcombine.high %v2876_v26, %v2876_v26  ;;  %v2887_v42 = vcombine.high %v2883_v30, %v2883_v30  ;;  %v5685_v17 = vrot.slane %v2862_v47, %v8297_v28 }
 0x334   : >> { %v10373_v20 = vsel %vm357_vm15, %v11795_v16, %v5777_v3  ;;  %v5689_v33 = vrot.slane %v2876_v26, %v8297_v28  ;;  %v5693_v49 = vrot.slane %v2884_v22, %v8297_v28  ;;  %v5701_v48 = vrot.slane %v2869_v7, %v8297_v28  ;;  %v11797_v3 = vld [vmem:[#allocation77_spill] sm:$0xff]  ;;  %v11798_v26 = vld [vmem:[#allocation78_spill] sm:$0xff]  ;;  %v11799_v7 = vld [vmem:[#allocation79_spill] sm:$0xff] }
 0x335   : >> { %v5697_v36 = vrot.slane %v2886_v46, %v8297_v28  ;;  %v5705_v11 = vrot.slane %v2883_v30, %v8297_v28  ;;  %v5709_v41 = vrot.slane %v2885_v50, %v8297_v28  ;;  %v5713_v29 = vrot.slane %v2887_v42, %v8297_v28  ;;  %v10398_v30 = vpop.f32.mrb[30].mxu1  ;;  %v11801_v50 = vld [vmem:[#allocation82_spill] sm:$0xff] }
 0x336   : >> { %v10384_v47 = vsel %vm357_vm15, %v11796_v43, %v5685_v17  ;;  %v10388_v16 = vsel %vm357_vm15, %v11797_v3, %v5689_v33  ;;  %v10392_v22 = vsel %vm357_vm15, %v11798_v26, %v5693_v49  ;;  %v10396_v46 = vsel %vm357_vm15, %v11799_v7, %v5701_v48  ;;  %11800 = vst [vmem:[#allocation40_spill] sm:$0xff] %v10398_v30  ;;  %v11802_v43 = vld [vmem:[#allocation80_spill] sm:$0xff]  ;;  %v11803_v33 = vld [vmem:[#allocation81_spill] sm:$0xff]  ;;  %v11804_v49 = vld [vmem:[#allocation83_spill] sm:$0xff]  ;;  %v10439_v12 = vpop.f32.mrb[31].mxu1 }
 0x337   : >> { %v10402_v42 = vsel %vm357_vm15, %v11801_v50, %v5697_v36  ;;  %v10406_v17 = vsel %vm357_vm15, %v11802_v43, %v5705_v11  ;;  %v10410_v3 = vsel %vm357_vm15, %v11803_v33, %v5709_v41  ;;  %v10414_v26 = vsel %vm357_vm15, %v11804_v49, %v5713_v29  ;;  %v11805_v50 = vld [vmem:[#allocation41_spill] sm:$0xff]  ;;  %v11806_v41 = vld [vmem:[#allocation44_spill] sm:$0xff]  ;;  %v11807_v29 = vld [vmem:[#allocation10_spill] sm:$0xff]  ;;  %11809 = vst [vmem:[#allocation42_spill] sm:$0xff] %v10439_v12 }
 0x338   : >> { %v3412_v48 = vrot.slane %v3398_v60, %v8291_v27  ;;  %v3413_v7 = vcombine.high %v3405_v25, %v3405_v25  ;;  %v3421_v30 = vrot.slane %v3405_v25, %v8291_v27  ;;  %v3300_v36 = vcombine.high %v10272_v10, %v10272_v10  ;;  %v11808_v49 = vld [vmem:[#allocation52_spill] sm:$0xff]  ;;  %v11847_v12 = vld [vmem:[#allocation33_spill] sm:$0xff] }
 0x339   : >> { %v3307_v11 = vrot.slane %v10272_v10, %v8291_v27  ;;  %v3093_v43 = vadd.f32 %v11805_v50, %v11774_v6  ;;  %v10426_v33 = vadd.f32 %v11806_v41, %v11776_v63  ;;  %v10430_v62 = vadd.f32 %v11808_v49, %v11807_v29 }
 0x33a   : >> { %v3414_v60 = vcombine.high %v3412_v48, %v3412_v48  ;;  %v3428_v25 = vrot.slane %v3412_v48, %v8291_v27  ;;  %v3435_v23 = vrot.slane %v3413_v7, %v8291_v27  ;;  %v3443_v38 = vcombine.high %v3421_v30, %v3421_v30 }
 0x33b   : >> { %v6037_v56 = vrot.slane %v3421_v30, %v8297_v28  ;;  %v3314_v10 = vrot.slane %v3300_v36, %v8291_v27  ;;  %v3315_v15 = vcombine.high %v3307_v11, %v3307_v11  ;;  %v3323_v50 = vrot.slane %v3307_v11, %v8291_v27 }
 0x33c   : >> { %v3442_v41 = vrot.slane %v3414_v60, %v8291_v27  ;;  %v3444_v63 = vcombine.high %v3428_v25, %v3428_v25  ;;  %v3445_v6 = vcombine.high %v3435_v23, %v3435_v23  ;;  %v6041_v49 = vrot.slane %v3435_v23, %v8297_v28 }
 0x33d   : >> { %v6045_v48 = vrot.slane %v3443_v38, %v8297_v28  ;;  %v6053_v7 = vrot.slane %v3428_v25, %v8297_v28  ;;  %v10445_v30 = vsel %vm335_vm3, %v10179_v52, %v6037_v56  ;;  %v3316_v36 = vcombine.high %v3314_v10, %v3314_v10 }
 0x33e   : >> { %v3446_v21 = vcombine.high %v3442_v41, %v3442_v41  ;;  %v6049_v11 = vrot.slane %v3445_v6, %v8297_v28  ;;  %v6057_v60 = vrot.slane %v3442_v41, %v8297_v28  ;;  %v6061_v8 = vrot.slane %v3444_v63, %v8297_v28 }
 0x33f   : >> { %v10452_v23 = vsel %vm335_vm3, %v10189_v58, %v6041_v49  ;;  %v10456_v38 = vsel %vm335_vm3, %v10193_v57, %v6045_v48  ;;  %v10460_v56 = vsel %vm335_vm3, %v10183_v34, %v6053_v7  ;;  %v3330_v52 = vrot.slane %v3314_v10, %v8291_v27 }
 0x340   : >> { %v6065_v6 = vrot.slane %v3446_v21, %v8297_v28  ;;  %v10466_v25 = vsel %vm335_vm3, %v10207_v32, %v6049_v11  ;;  %v10470_v58 = vsel %vm335_vm3, %v10197_v39, %v6057_v60  ;;  %v10474_v57 = vsel %vm335_vm3, %v10201_v4, %v6061_v8 }
 0x341   : >> { %v3337_v63 = vrot.slane %v3315_v15, %v8291_v27  ;;  %v3344_v34 = vrot.slane %v3316_v36, %v8291_v27  ;;  %v3345_v41 = vcombine.high %v3323_v50, %v3323_v50  ;;  %v3346_v10 = vcombine.high %v3330_v52, %v3330_v52 }
 0x342   : >> { %v10480_v21 = vsel %vm335_vm3, %v10211_v5, %v6065_v6  ;;  %v5973_v32 = vrot.slane %v3323_v50, %v8297_v28  ;;  %v5989_v49 = vrot.slane %v3330_v52, %v8297_v28  ;;  %v3447_v39 = vcombine.high %v3093_v43, %v3093_v43 }
 0x343   : >> { %v3347_v48 = vcombine.high %v3337_v63, %v3337_v63  ;;  %v3348_v7 = vcombine.high %v3344_v34, %v3344_v34  ;;  %v5977_v8 = vrot.slane %v3337_v63, %v8297_v28  ;;  %v5981_v4 = vrot.slane %v3345_v41, %v8297_v28 }
 0x344   : >> { %v5993_v15 = vrot.slane %v3344_v34, %v8297_v28  ;;  %v5997_v36 = vrot.slane %v3346_v10, %v8297_v28  ;;  %v10490_v11 = vsel %vm335_vm3, %v10282_v24, %v5973_v32  ;;  %v10494_v5 = vsel %vm335_vm3, %v10286_v9, %v5989_v49 }
 0x345   : >> { %v5985_v50 = vrot.slane %v3347_v48, %v8297_v28  ;;  %v6001_v60 = vrot.slane %v3348_v7, %v8297_v28  ;;  %v10500_v52 = vsel %vm335_vm3, %v10292_v40, %v5977_v8  ;;  %v10504_v6 = vsel %vm335_vm3, %v10302_v55, %v5981_v4 }
 0x346   : >> { %v10508_v24 = vsel %vm335_vm3, %v10296_v0, %v5993_v15  ;;  %v10512_v9 = vsel %vm335_vm3, %v10306_v14, %v5997_v36  ;;  %v3454_v63 = vrot.slane %v3093_v43, %v8291_v27  ;;  %v3461_v34 = vrot.slane %v3447_v39, %v8291_v27 }
 0x347   : >> { %11810 = vst [vmem:[#allocation26_spill] sm:$0xff] %v10508_v24  ;;  %11811 = vst [vmem:[#allocation32_spill] sm:$0xff] %v10512_v9  ;;  %v10518_v40 = vsel %vm335_vm3, %v10311_v13, %v5985_v50  ;;  %v10522_v55 = vsel %vm335_vm3, %v10315_v2, %v6001_v60  ;;  %v3349_v0 = vcombine.high %v10426_v33, %v10426_v33  ;;  %v11861_v24 = vld [vmem:[#allocation84_spill] sm:$0xff] }
 0x348   : >> { %11812 = vst [vmem:[#allocation25_spill] sm:$0xff] %v10518_v40  ;;  %11813 = vst [vmem:[#allocation46_spill] sm:$0xff] %v10522_v55  ;;  %v3356_v41 = vrot.slane %v10426_v33, %v8291_v27  ;;  %v3462_v14 = vcombine.high %v3454_v63, %v3454_v63  ;;  %v3463_v10 = vcombine.high %v3461_v34, %v3461_v34 }
 0x349   : >> { %v3470_v43 = vrot.slane %v3454_v63, %v8291_v27  ;;  %v3477_v32 = vrot.slane %v3461_v34, %v8291_v27  ;;  %v3363_v49 = vrot.slane %v3349_v0, %v8291_v27  ;;  %v3746_v2 = vcombine.high %v10430_v62, %v10430_v62 }
 0x34a   : >> { %v3364_v13 = vcombine.high %v3356_v41, %v3356_v41  ;;  %v3372_v39 = vrot.slane %v3356_v41, %v8291_v27  ;;  %v3484_v48 = vrot.slane %v3462_v14, %v8291_v27  ;;  %v3491_v7 = vrot.slane %v3463_v10, %v8291_v27 }
 0x34b   : >> { %v3492_v8 = vcombine.high %v3470_v43, %v3470_v43  ;;  %v3493_v33 = vcombine.high %v3477_v32, %v3477_v32  ;;  %v6069_v4 = vrot.slane %v3470_v43, %v8297_v28  ;;  %v6085_v15 = vrot.slane %v3477_v32, %v8297_v28 }
 0x34c   : >> { %v3365_v36 = vcombine.high %v3363_v49, %v3363_v49  ;;  %v3379_v50 = vrot.slane %v3363_v49, %v8291_v27  ;;  %v3494_v60 = vcombine.high %v3484_v48, %v3484_v48  ;;  %v3495_v63 = vcombine.high %v3491_v7, %v3491_v7 }
 0x34d   : >> { %v6073_v34 = vrot.slane %v3484_v48, %v8297_v28  ;;  %v6077_v0 = vrot.slane %v3492_v8, %v8297_v28  ;;  %v6089_v41 = vrot.slane %v3491_v7, %v8297_v28  ;;  %v6093_v14 = vrot.slane %v3493_v33, %v8297_v28 }
 0x34e   : >> { %v10545_v10 = vsel %vm335_vm3, %v10339_v44, %v6069_v4  ;;  %v10549_v43 = vsel %vm335_vm3, %v10355_v37, %v6085_v15  ;;  %v6081_v32 = vrot.slane %v3494_v60, %v8297_v28  ;;  %v6097_v49 = vrot.slane %v3495_v63, %v8297_v28 }
 0x34f   : >> { %11814 = vst [vmem:[#allocation30_spill] sm:$0xff] %v10545_v10  ;;  %11815 = vst [vmem:[#allocation48_spill] sm:$0xff] %v10549_v43  ;;  %v10555_v48 = vsel %vm335_vm3, %v10347_v61, %v6073_v34  ;;  %v10559_v7 = vsel %vm335_vm3, %v10351_v18, %v6077_v0  ;;  %v10563_v44 = vsel %vm335_vm3, %v10364_v53, %v6089_v41 }
 0x350   : >> { %11816 = vst [vmem:[#allocation47_spill] sm:$0xff] %v10555_v48  ;;  %11817 = vst [vmem:[#allocation53_spill] sm:$0xff] %v10559_v7  ;;  %v10567_v37 = vsel %vm335_vm3, %v10368_v59, %v6093_v14  ;;  %v3386_v8 = vrot.slane %v3364_v13, %v8291_v27  ;;  %v3393_v33 = vrot.slane %v3365_v36, %v8291_v27  ;;  %v11854_v7 = vld [vmem:[#allocation71_spill] sm:$0xff]  ;;  %v11855_v48 = vld [vmem:[#allocation73_spill] sm:$0xff] }
 0x351   : >> { %11818 = vst [vmem:[#allocation54_spill] sm:$0xff] %v10563_v44  ;;  %11819 = vst [vmem:[#allocation49_spill] sm:$0xff] %v10567_v37  ;;  %v10573_v61 = vsel %vm335_vm3, %v10360_v1, %v6081_v32  ;;  %v10577_v18 = vsel %vm335_vm3, %v10373_v20, %v6097_v49  ;;  %v3394_v4 = vcombine.high %v3372_v39, %v3372_v39 }
 0x352   : >> { %11820 = vst [vmem:[#allocation56_spill] sm:$0xff] %v10573_v61  ;;  %11821 = vst [vmem:[#allocation39_spill] sm:$0xff] %v10577_v18  ;;  %v3395_v15 = vcombine.high %v3379_v50, %v3379_v50  ;;  %v3396_v53 = vcombine.high %v3386_v8, %v3386_v8  ;;  %v3397_v60 = vcombine.high %v3393_v33, %v3393_v33  ;;  %v11850_v61 = vld [vmem:[#allocation21_spill] sm:$0xff] }
 0x353   : >> { %v6005_v63 = vrot.slane %v3372_v39, %v8297_v28  ;;  %v6009_v59 = vrot.slane %v3386_v8, %v8297_v28  ;;  %v6013_v13 = vrot.slane %v3394_v4, %v8297_v28  ;;  %v6021_v36 = vrot.slane %v3379_v50, %v8297_v28  ;;  %v11832_v4 = vld [vmem:[#allocation75_spill] sm:$0xff] }
 0x354   : >> { %v6025_v34 = vrot.slane %v3393_v33, %v8297_v28  ;;  %v6029_v1 = vrot.slane %v3395_v15, %v8297_v28  ;;  %v6017_v0 = vrot.slane %v3396_v53, %v8297_v28  ;;  %v6033_v20 = vrot.slane %v3397_v60, %v8297_v28  ;;  %v11831_v33 = vld [vmem:[#allocation12_spill] sm:$0xff]  ;;  %v11833_v15 = vld [vmem:[#allocation51_spill] sm:$0xff] }
 0x355   : >> { %v10589_v41 = vsel %vm335_vm3, %v10384_v47, %v6005_v63  ;;  %v10593_v39 = vsel %vm335_vm3, %v10388_v16, %v6009_v59  ;;  %v10597_v14 = vsel %vm335_vm3, %v10392_v22, %v6013_v13  ;;  %v10601_v50 = vsel %vm335_vm3, %v10396_v46, %v6021_v36 }
 0x356   : >> { %11822 = vst [vmem:[#allocation45_spill] sm:$0xff] %v10589_v41  ;;  %11823 = vst [vmem:[#allocation57_spill] sm:$0xff] %v10593_v39  ;;  %v10605_v32 = vsel %vm335_vm3, %v10406_v17, %v6025_v34  ;;  %v10609_v47 = vsel %vm335_vm3, %v10410_v3, %v6029_v1  ;;  %v10613_v16 = vsel %vm335_vm3, %v10402_v42, %v6017_v0  ;;  %v11830_v17 = vld [vmem:[#allocation50_spill] sm:$0xff]  ;;  %v11834_v42 = vld [vmem:[#allocation55_spill] sm:$0xff] }
 0x357   : >> { %11824 = vst [vmem:[#allocation76_spill] sm:$0xff] %v10597_v14  ;;  %11825 = vst [vmem:[#allocation77_spill] sm:$0xff] %v10601_v50  ;;  %v10617_v22 = vsel %vm335_vm3, %v10414_v26, %v6033_v20  ;;  %v3753_v46 = vrot.slane %v10430_v62, %v8291_v27  ;;  %v3760_v49 = vrot.slane %v3746_v2, %v8291_v27 }
 0x358   : >> { %11826 = vst [vmem:[#allocation78_spill] sm:$0xff] %v10605_v32  ;;  %11827 = vst [vmem:[#allocation79_spill] sm:$0xff] %v10609_v47  ;;  %v3610_v8 = vadd.f32 %v11830_v17, %v11699_v54  ;;  %v3621_v3 = vadd.f32 %v11832_v4, %v11831_v33  ;;  %v10628_v53 = vadd.f32 %v11833_v15, %v11606_v51  ;;  %v11836_v32 = vld [vmem:[#allocation23_spill] sm:$0xff] }
 0x359   : >> { %11828 = vst [vmem:[#allocation82_spill] sm:$0xff] %v10613_v16  ;;  %11829 = vst [vmem:[#allocation80_spill] sm:$0xff] %v10617_v22  ;;  %v10632_v60 = vadd.f32 %v11834_v42, %v11807_v29  ;;  %v3761_v26 = vcombine.high %v3753_v46, %v3753_v46  ;;  %v3762_v63 = vcombine.high %v3760_v49, %v3760_v49 }
 0x35a   : >> { %v3769_v62 = vrot.slane %v3753_v46, %v8291_v27  ;;  %v3776_v2 = vrot.slane %v3760_v49, %v8291_v27  ;;  %v3648_v59 = vcombine.high %v3610_v8, %v3610_v8  ;;  %v3655_v13 = vrot.slane %v3610_v8, %v8291_v27 }
 0x35b   : >> { %v3795_v36 = vcombine.high %v3621_v3, %v3621_v3  ;;  %v3802_v34 = vrot.slane %v3621_v3, %v8291_v27  ;;  %v3783_v1 = vrot.slane %v3761_v26, %v8291_v27  ;;  %v3790_v0 = vrot.slane %v3762_v63, %v8291_v27 }
 0x35c   : >> { %v3791_v20 = vcombine.high %v3769_v62, %v3769_v62  ;;  %v3792_v17 = vcombine.high %v3776_v2, %v3776_v2  ;;  %v6229_v29 = vrot.slane %v3769_v62, %v8297_v28  ;;  %v6245_v4 = vrot.slane %v3776_v2, %v8297_v28  ;;  %v11835_v62 = vld [vmem:[#allocation60_spill] sm:$0xff] }
 0x35d   : >> { %v3662_v46 = vrot.slane %v3648_v59, %v8291_v27  ;;  %v3663_v15 = vcombine.high %v3655_v13, %v3655_v13  ;;  %v3793_v49 = vcombine.high %v3783_v1, %v3783_v1  ;;  %v3794_v42 = vcombine.high %v3790_v0, %v3790_v0 }
 0x35e   : >> { %v6233_v8 = vrot.slane %v3783_v1, %v8297_v28  ;;  %v6237_v22 = vrot.slane %v3791_v20, %v8297_v28  ;;  %v6249_v3 = vrot.slane %v3790_v0, %v8297_v28  ;;  %v6253_v26 = vrot.slane %v3792_v17, %v8297_v28  ;;  %v11837_v20 = vld [vmem:[#allocation62_spill] sm:$0xff]  ;;  %v11838_v17 = vld [vmem:[#allocation61_spill] sm:$0xff] }
 0x35f   : >> { %v10649_v63 = vsel %vm339_vm10, %v10010_v35, %v6229_v29  ;;  %v10653_v2 = vsel %vm339_vm10, %v11835_v62, %v6245_v4  ;;  %v6241_v59 = vrot.slane %v3793_v49, %v8297_v28  ;;  %v6257_v47 = vrot.slane %v3794_v42, %v8297_v28  ;;  %v11839_v29 = vld [vmem:[#allocation27_spill] sm:$0xff] }
 0x360   : >> { %v10659_v1 = vsel %vm339_vm10, %v11836_v32, %v6233_v8  ;;  %v10663_v0 = vsel %vm339_vm10, %v11837_v20, %v6237_v22  ;;  %v10667_v35 = vsel %vm339_vm10, %v11838_v17, %v6249_v3  ;;  %v10671_v4 = vsel %vm339_vm10, %v11839_v29, %v6253_v26  ;;  %v11840_v42 = vld [vmem:[#allocation63_spill] sm:$0xff]  ;;  %v11841_v32 = vld [vmem:[#allocation28_spill] sm:$0xff] }
 0x361   : >> { %v3664_v62 = vcombine.high %v3662_v46, %v3662_v46  ;;  %v3671_v49 = vrot.slane %v3655_v13, %v8291_v27  ;;  %v10676_v16 = vsel %vm339_vm10, %v11840_v42, %v6241_v59  ;;  %v10680_v8 = vsel %vm339_vm10, %v11841_v32, %v6257_v47 }
 0x362   : >> { %v3678_v22 = vrot.slane %v3662_v46, %v8291_v27  ;;  %v3685_v3 = vrot.slane %v3663_v15, %v8291_v27  ;;  %v3809_v29 = vrot.slane %v3795_v36, %v8291_v27 }
 0x363   : >> { %v3692_v20 = vrot.slane %v3664_v62, %v8291_v27  ;;  %v3693_v17 = vcombine.high %v3671_v49, %v3671_v49  ;;  %v6165_v26 = vrot.slane %v3671_v49, %v8297_v28 }
 0x364   : >> { %v3694_v13 = vcombine.high %v3678_v22, %v3678_v22  ;;  %v3695_v50 = vcombine.high %v3685_v3, %v3685_v3  ;;  %v6169_v59 = vrot.slane %v3685_v3, %v8297_v28  ;;  %v6181_v42 = vrot.slane %v3678_v22, %v8297_v28  ;;  %v11842_v3 = vld [vmem:[#allocation19_spill] sm:$0xff] }
 0x365   : >> { %v3696_v14 = vcombine.high %v3692_v20, %v3692_v20  ;;  %v6173_v47 = vrot.slane %v3693_v17, %v8297_v28  ;;  %v6185_v46 = vrot.slane %v3692_v20, %v8297_v28  ;;  %v10693_v15 = vsel %vm339_vm10, %v10071_v19, %v6165_v26  ;;  %v11843_v19 = vld [vmem:[#allocation66_spill] sm:$0xff]  ;;  %v11844_v26 = vld [vmem:[#allocation67_spill] sm:$0xff] }
 0x366   : >> { %v6177_v62 = vrot.slane %v3695_v50, %v8297_v28  ;;  %v6189_v49 = vrot.slane %v3694_v13, %v8297_v28  ;;  %v10699_v36 = vsel %vm339_vm10, %v10082_v45, %v6169_v59  ;;  %v10703_v32 = vsel %vm339_vm10, %v10077_v31, %v6181_v42  ;;  %v11845_v45 = vld [vmem:[#allocation65_spill] sm:$0xff]  ;;  %v11846_v42 = vld [vmem:[#allocation36_spill] sm:$0xff] }
 0x367   : >> { %v6193_v22 = vrot.slane %v3696_v14, %v8297_v28  ;;  %v10708_v20 = vsel %vm339_vm10, %v11842_v3, %v6173_v47  ;;  %v10712_v17 = vsel %vm339_vm10, %v11843_v19, %v6185_v46  ;;  %v3810_v50 = vcombine.high %v3802_v34, %v3802_v34 }
 0x368   : >> { %v10716_v13 = vsel %vm339_vm10, %v11844_v26, %v6177_v62  ;;  %v10720_v59 = vsel %vm339_vm10, %v11845_v45, %v6189_v49  ;;  %v3811_v31 = vcombine.high %v3809_v29, %v3809_v29  ;;  %v3818_v14 = vrot.slane %v3802_v34, %v8291_v27 }
 0x369   : >> { %v10725_v47 = vsel %vm339_vm10, %v11846_v42, %v6193_v22  ;;  %v3825_v3 = vrot.slane %v3809_v29, %v8291_v27  ;;  %v3832_v46 = vrot.slane %v3810_v50, %v8291_v27  ;;  %v3697_v19 = vcombine.high %v10628_v53, %v10628_v53 }
 0x36a   : >> { %v3839_v62 = vrot.slane %v3811_v31, %v8291_v27  ;;  %v3840_v26 = vcombine.high %v3818_v14, %v3818_v14  ;;  %v6261_v49 = vrot.slane %v3818_v14, %v8297_v28  ;;  %v3704_v45 = vrot.slane %v10628_v53, %v8291_v27  ;;  %v11848_v53 = vld [vmem:[#allocation37_spill] sm:$0xff] }
 0x36b   : >> { %v3841_v34 = vcombine.high %v3825_v3, %v3825_v3  ;;  %v3842_v39 = vcombine.high %v3832_v46, %v3832_v46  ;;  %v6265_v22 = vrot.slane %v3832_v46, %v8297_v28  ;;  %v6277_v42 = vrot.slane %v3825_v3, %v8297_v28  ;;  %v11849_v46 = vld [vmem:[#allocation24_spill] sm:$0xff] }
 0x36c   : >> { %v3843_v29 = vcombine.high %v3839_v62, %v3839_v62  ;;  %v6269_v50 = vrot.slane %v3840_v26, %v8297_v28  ;;  %v6281_v41 = vrot.slane %v3839_v62, %v8297_v28  ;;  %v10741_v31 = vsel %vm339_vm10, %v11847_v12, %v6261_v49  ;;  %v11851_v12 = vld [vmem:[#allocation69_spill] sm:$0xff] }
 0x36d   : >> { %v6273_v14 = vrot.slane %v3842_v39, %v8297_v28  ;;  %v6285_v18 = vrot.slane %v3841_v34, %v8297_v28  ;;  %v10747_v37 = vsel %vm339_vm10, %v11848_v53, %v6265_v22  ;;  %v10751_v3 = vsel %vm339_vm10, %v11849_v46, %v6277_v42  ;;  %v11852_v34 = vld [vmem:[#allocation22_spill] sm:$0xff] }
 0x36e   : >> { %v6289_v26 = vrot.slane %v3843_v29, %v8297_v28  ;;  %v10756_v62 = vsel %vm339_vm10, %v11850_v61, %v6269_v50  ;;  %v10760_v49 = vsel %vm339_vm10, %v11851_v12, %v6281_v41  ;;  %v3711_v39 = vrot.slane %v3697_v19, %v8291_v27  ;;  %v11853_v53 = vld [vmem:[#allocation70_spill] sm:$0xff] }
 0x36f   : >> { %v10765_v22 = vsel %vm339_vm10, %v11852_v34, %v6273_v14  ;;  %v10769_v42 = vsel %vm339_vm10, %v11853_v53, %v6285_v18  ;;  %v3712_v46 = vcombine.high %v3704_v45, %v3704_v45  ;;  %v3720_v29 = vrot.slane %v3704_v45, %v8291_v27 }
 0x370   : >> { %v10774_v61 = vsel %vm339_vm10, %v11854_v7, %v6289_v26  ;;  %v3713_v50 = vcombine.high %v3711_v39, %v3711_v39  ;;  %v3727_v41 = vrot.slane %v3711_v39, %v8291_v27  ;;  %v4268_v19 = vcombine.high %v10632_v60, %v10632_v60 }
 0x371   : >> { %v3734_v14 = vrot.slane %v3712_v46, %v8291_v27  ;;  %v3742_v12 = vcombine.high %v3720_v29, %v3720_v29  ;;  %v6197_v34 = vrot.slane %v3720_v29, %v8297_v28  ;;  %v4275_v18 = vrot.slane %v10632_v60, %v8291_v27 }
 0x372   : >> { %v3741_v45 = vrot.slane %v3713_v50, %v8291_v27  ;;  %v3743_v53 = vcombine.high %v3727_v41, %v3727_v41  ;;  %v6213_v7 = vrot.slane %v3727_v41, %v8297_v28  ;;  %v4282_v26 = vrot.slane %v4268_v19, %v8291_v27  ;;  %v11856_v50 = vld [vmem:[#allocation68_spill] sm:$0xff] }
 0x373   : >> { %v3744_v44 = vcombine.high %v3734_v14, %v3734_v14  ;;  %v6201_v39 = vrot.slane %v3734_v14, %v8297_v28  ;;  %v6205_v43 = vrot.slane %v3742_v12, %v8297_v28  ;;  %v10790_v46 = vsel %vm339_vm10, %v11855_v48, %v6197_v34  ;;  %v11857_v19 = vld [vmem:[#allocation20_spill] sm:$0xff]  ;;  %v11858_v12 = vld [vmem:[#allocation29_spill] sm:$0xff] }
 0x374   : >> { %v3745_v29 = vcombine.high %v3741_v45, %v3741_v45  ;;  %v6217_v10 = vrot.slane %v3741_v45, %v8297_v28  ;;  %v6221_v60 = vrot.slane %v3743_v53, %v8297_v28  ;;  %v10796_v55 = vsel %vm339_vm10, %v11856_v50, %v6213_v7  ;;  %v11859_v53 = vld [vmem:[#allocation34_spill] sm:$0xff]  ;;  %v11860_v7 = vld [vmem:[#allocation43_spill] sm:$0xff] }
 0x375   : >> { %v6209_v41 = vrot.slane %v3744_v44, %v8297_v28  ;;  %v10801_v14 = vsel %vm339_vm10, %v11857_v19, %v6201_v39  ;;  %v10805_v48 = vsel %vm339_vm10, %v11858_v12, %v6205_v43  ;;  %v4283_v34 = vcombine.high %v4275_v18, %v4275_v18 }
 0x376   : >> { %v6225_v45 = vrot.slane %v3745_v29, %v8297_v28  ;;  %v10810_v9 = vsel %vm339_vm10, %v11859_v53, %v6217_v10  ;;  %v10814_v44 = vsel %vm339_vm10, %v11860_v7, %v6221_v60  ;;  %v4284_v50 = vcombine.high %v4282_v26, %v4282_v26  ;;  %v11862_v29 = vld [vmem:[#allocation85_spill] sm:$0xff] }
 0x377   : >> { %v10818_v39 = vsel %vm339_vm10, %v11861_v24, %v6209_v41  ;;  %v4291_v19 = vrot.slane %v4275_v18, %v8291_v27  ;;  %v4298_v43 = vrot.slane %v4282_v26, %v8291_v27  ;;  %v4305_v12 = vrot.slane %v4283_v34, %v8291_v27 }
 0x378   : >> { %v10825_v40 = vsel %vm339_vm10, %v11862_v29, %v6225_v45  ;;  %v4312_v10 = vrot.slane %v4284_v50, %v8291_v27 }
 0x379   : >> { %v4313_v60 = vcombine.high %v4291_v19, %v4291_v19  ;;  %v4314_v24 = vcombine.high %v4298_v43, %v4298_v43  ;;  %v4315_v41 = vcombine.high %v4305_v12, %v4305_v12  ;;  %v6549_v18 = vrot.slane %v4291_v19, %v8297_v28 }
 0x37a   : >> { %v4316_v26 = vcombine.high %v4312_v10, %v4312_v10  ;;  %v6553_v34 = vrot.slane %v4305_v12, %v8297_v28  ;;  %v6565_v45 = vrot.slane %v4298_v43, %v8297_v28  ;;  %v6569_v53 = vrot.slane %v4312_v10, %v8297_v28 }
 0x37b   : >> { %v6557_v7 = vrot.slane %v4313_v60, %v8297_v28  ;;  %v6561_v50 = vrot.slane %v4315_v41, %v8297_v28  ;;  %v6573_v29 = vrot.slane %v4314_v24, %v8297_v28  ;;  %v7204_v19 = vsel %vm7187_vm0, %v10649_v63, %v6549_v18  ;;  %v11866_v18 = vld [vmem:[#allocation18_spill] sm:$0xff] }
 0x37c   : >> { %v6577_v12 = vrot.slane %v4316_v26, %v8297_v28  ;;  %v7205_v43 = vsel %vm7187_vm0, %v10659_v1, %v6553_v34  ;;  %v7208_v10 = vsel %vm7187_vm0, %v10653_v2, %v6565_v45  ;;  %v7209_v60 = vsel %vm7187_vm0, %v10667_v35, %v6569_v53  ;;  %7270 = vst.msk [vmem:[%s10831_s18 + $0x100] sm:$0xff] %vm7253_vm1, %v7204_v19  ;;  %v11863_v2 = vld [vmem:[#allocation58_spill] sm:$0xff]  ;;  %v11867_v34 = vld [vmem:[#allocation31_spill] sm:$0xff]  ;;  %v11871_v19 = vld [vmem:[#allocation72_spill] sm:$0xff] }
 0x37d   : >> { %v7206_v24 = vsel %vm7187_vm0, %v10663_v0, %v6557_v7  ;;  %v7207_v63 = vsel %vm7187_vm0, %v10676_v16, %v6561_v50  ;;  %v7210_v41 = vsel %vm7187_vm0, %v10671_v4, %v6573_v29  ;;  %7271 = vst.msk [vmem:[%s10831_s18 + $0x110] sm:$0xff] %vm7253_vm1, %v7205_v43  ;;  %7274 = vst.msk [vmem:[%s10831_s18 + $0x140] sm:$0xff] %vm7253_vm1, %v7208_v10  ;;  %v11864_v16 = vld [vmem:[#allocation59_spill] sm:$0xff]  ;;  %v11865_v4 = vld [vmem:[#allocation17_spill] sm:$0xff] }
 0x37e   : >> { %7275 = vst.msk [vmem:[%s10831_s18 + $0x150] sm:$0xff] %vm7253_vm1, %v7209_v60  ;;  %v4132_v1 = vadd.f32 %v11863_v2, %v11699_v54  ;;  %v7211_v35 = vsel %vm7187_vm0, %v10680_v8, %v6577_v12  ;;  %7272 = vst.msk [vmem:[%s10831_s18 + $0x120] sm:$0xff] %vm7253_vm1, %v7206_v24  ;;  %v4143_v0 = vadd.f32 %v11864_v16, %v11831_v33  ;;  %v11868_v53 = vld [vmem:[#allocation15_spill] sm:$0xff]  ;;  %v11870_v29 = vld [vmem:[#allocation16_spill] sm:$0xff] }
 0x37f   : >> { %7273 = vst.msk [vmem:[%s10831_s18 + $0x130] sm:$0xff] %vm7253_vm1, %v7207_v63  ;;  %7276 = vst.msk [vmem:[%s10831_s18 + $0x160] sm:$0xff] %vm7253_vm1, %v7210_v41  ;;  %v3634_v26 = vadd.f32 %v11866_v18, %v11865_v4  ;;  %v10879_v45 = vadd.f32 %v11867_v34, %v11606_v51  ;;  %v11869_v7 = vld [vmem:[#allocation35_spill] sm:$0xff]  ;;  %v10890_v12 = vadd.f32 %v11871_v19, %v11870_v29 }
 0x380   : >> { %7277 = vst.msk [vmem:[%s10831_s18 + $0x170] sm:$0xff] %vm7253_vm1, %v7211_v35  ;;  %v4170_v54 = vcombine.high %v4132_v1, %v4132_v1  ;;  %v4177_v8 = vrot.slane %v4132_v1, %v8291_v27  ;;  %v10886_v50 = vadd.f32 %v11869_v7, %v11868_v53  ;;  %v4317_v33 = vcombine.high %v4143_v0, %v4143_v0 }
 0x381   : >> { %v4324_v43 = vrot.slane %v4143_v0, %v8291_v27  ;;  %v3942_v10 = vcombine.high %v3634_v26, %v3634_v26  ;;  %v10894_v51 = vrot.slane %v3634_v26, %v8291_v27 }
 0x382   : >> { %v4184_v60 = vrot.slane %v4170_v54, %v8291_v27  ;;  %v4185_v24 = vcombine.high %v4177_v8, %v4177_v8  ;;  %v4193_v63 = vrot.slane %v4177_v8, %v8291_v27  ;;  %v4331_v2 = vrot.slane %v4317_v33, %v8291_v27 }
 0x383   : >> { %v4332_v1 = vcombine.high %v4324_v43, %v4324_v43  ;;  %v4340_v35 = vrot.slane %v4324_v43, %v8291_v27  ;;  %v10903_v16 = vrot.slane %v3942_v10, %v8291_v27 }
 0x384   : >> { %v4186_v0 = vcombine.high %v4184_v60, %v4184_v60  ;;  %v4200_v18 = vrot.slane %v4184_v60, %v8291_v27  ;;  %v4207_v26 = vrot.slane %v4185_v24, %v8291_v27  ;;  %v4215_v34 = vcombine.high %v4193_v63, %v4193_v63 }
 0x385   : >> { %v6485_v54 = vrot.slane %v4193_v63, %v8297_v28  ;;  %v4333_v8 = vcombine.high %v4331_v2, %v4331_v2  ;;  %v4347_v7 = vrot.slane %v4331_v2, %v8291_v27  ;;  %v4354_v19 = vrot.slane %v4332_v1, %v8291_v27 }
 0x386   : >> { %v4214_v33 = vrot.slane %v4186_v0, %v8291_v27  ;;  %v4216_v43 = vcombine.high %v4200_v18, %v4200_v18  ;;  %v4217_v41 = vcombine.high %v4207_v26, %v4207_v26  ;;  %v6489_v10 = vrot.slane %v4207_v26, %v8297_v28 }
 0x387   : >> { %v6493_v29 = vrot.slane %v4215_v34, %v8297_v28  ;;  %v6501_v60 = vrot.slane %v4200_v18, %v8297_v28  ;;  %v7188_v24 = vsel %vm7187_vm0, %v10693_v15, %v6485_v54  ;;  %v4361_v63 = vrot.slane %v4333_v8, %v8291_v27 }
 0x388   : >> { %v4218_v2 = vcombine.high %v4214_v33, %v4214_v33  ;;  %v6497_v1 = vrot.slane %v4217_v41, %v8297_v28  ;;  %v6505_v0 = vrot.slane %v4214_v33, %v8297_v28  ;;  %v6509_v26 = vrot.slane %v4216_v43, %v8297_v28  ;;  %7254 = vst.msk [vmem:[%s10831_s18] sm:$0xff] %vm7253_vm1, %v7188_v24 }
 0x389   : >> { %v7189_v18 = vsel %vm7187_vm0, %v10699_v36, %v6489_v10  ;;  %v7190_v15 = vsel %vm7187_vm0, %v10708_v20, %v6493_v29  ;;  %v7192_v34 = vsel %vm7187_vm0, %v10703_v32, %v6501_v60  ;;  %v4362_v54 = vcombine.high %v4340_v35, %v4340_v35 }
 0x38a   : >> { %v6513_v41 = vrot.slane %v4218_v2, %v8297_v28  ;;  %v7191_v8 = vsel %vm7187_vm0, %v10716_v13, %v6497_v1  ;;  %v7193_v33 = vsel %vm7187_vm0, %v10712_v17, %v6505_v0  ;;  %v7194_v43 = vsel %vm7187_vm0, %v10720_v59, %v6509_v26  ;;  %7255 = vst.msk [vmem:[%s10831_s18 + $0x10] sm:$0xff] %vm7253_vm1, %v7189_v18 }
 0x38b   : >> { %7256 = vst.msk [vmem:[%s10831_s18 + $0x20] sm:$0xff] %vm7253_vm1, %v7190_v15  ;;  %7258 = vst.msk [vmem:[%s10831_s18 + $0x40] sm:$0xff] %vm7253_vm1, %v7192_v34  ;;  %v4363_v36 = vcombine.high %v4347_v7, %v4347_v7  ;;  %v4364_v32 = vcombine.high %v4354_v19, %v4354_v19  ;;  %v4365_v20 = vcombine.high %v4361_v63, %v4361_v63 }
 0x38c   : >> { %7257 = vst.msk [vmem:[%s10831_s18 + $0x30] sm:$0xff] %vm7253_vm1, %v7191_v8  ;;  %7259 = vst.msk [vmem:[%s10831_s18 + $0x50] sm:$0xff] %vm7253_vm1, %v7193_v33  ;;  %v6581_v17 = vrot.slane %v4340_v35, %v8297_v28  ;;  %v7195_v13 = vsel %vm7187_vm0, %v10725_v47, %v6513_v41  ;;  %v6585_v59 = vrot.slane %v4354_v19, %v8297_v28 }
 0x38d   : >> { %7260 = vst.msk [vmem:[%s10831_s18 + $0x60] sm:$0xff] %vm7253_vm1, %v7194_v43  ;;  %v6589_v29 = vrot.slane %v4362_v54, %v8297_v28  ;;  %v6597_v10 = vrot.slane %v4347_v7, %v8297_v28  ;;  %7261 = vst.msk [vmem:[%s10831_s18 + $0x70] sm:$0xff] %vm7253_vm1, %v7195_v13  ;;  %v6593_v60 = vrot.slane %v4364_v32, %v8297_v28 }
 0x38e   : >> { %v6601_v35 = vrot.slane %v4361_v63, %v8297_v28  ;;  %v6605_v47 = vrot.slane %v4363_v36, %v8297_v28  ;;  %v6609_v19 = vrot.slane %v4365_v20, %v8297_v28  ;;  %v7212_v24 = vsel %vm7187_vm0, %v10741_v31, %v6581_v17 }
 0x38f   : >> { %v7213_v7 = vsel %vm7187_vm0, %v10747_v37, %v6585_v59  ;;  %v7214_v2 = vsel %vm7187_vm0, %v10756_v62, %v6589_v29  ;;  %v7216_v1 = vsel %vm7187_vm0, %v10751_v3, %v6597_v10  ;;  %v7215_v63 = vsel %vm7187_vm0, %v10765_v22, %v6593_v60  ;;  %7278 = vst.msk [vmem:[%s10831_s18 + $0x180] sm:$0xff] %vm7253_vm1, %v7212_v24 }
 0x390   : >> { %v7217_v0 = vsel %vm7187_vm0, %v10760_v49, %v6601_v35  ;;  %v7218_v26 = vsel %vm7187_vm0, %v10769_v42, %v6605_v47  ;;  %v7219_v31 = vsel %vm7187_vm0, %v10774_v61, %v6609_v19  ;;  %7279 = vst.msk [vmem:[%s10831_s18 + $0x190] sm:$0xff] %vm7253_vm1, %v7213_v7  ;;  %7280 = vst.msk [vmem:[%s10831_s18 + $0x1a0] sm:$0xff] %vm7253_vm1, %v7214_v2 }
 0x391   : >> { %7282 = vst.msk [vmem:[%s10831_s18 + $0x1c0] sm:$0xff] %vm7253_vm1, %v7216_v1  ;;  %7281 = vst.msk [vmem:[%s10831_s18 + $0x1b0] sm:$0xff] %vm7253_vm1, %v7215_v63  ;;  %v3957_v37 = vcombine.high %v10894_v51, %v10894_v51  ;;  %v3958_v3 = vcombine.high %v10903_v16, %v10903_v16  ;;  %v3965_v62 = vrot.slane %v10894_v51, %v8291_v27 }
 0x392   : >> { %7283 = vst.msk [vmem:[%s10831_s18 + $0x1d0] sm:$0xff] %vm7253_vm1, %v7217_v0  ;;  %7284 = vst.msk [vmem:[%s10831_s18 + $0x1e0] sm:$0xff] %vm7253_vm1, %v7218_v26  ;;  %v3972_v49 = vrot.slane %v10903_v16, %v8291_v27  ;;  %v4226_v22 = vrot.slane %v10879_v45, %v8291_v27  ;;  %v11872_v42 = vcombine.high %v10879_v45, %v10879_v45 }
 0x393   : >> { %7285 = vst.msk [vmem:[%s10831_s18 + $0x1f0] sm:$0xff] %vm7253_vm1, %v7219_v31  ;;  %v3844_v18 = vcombine.high %v10886_v50, %v10886_v50  ;;  %v11009_v15 = vrot.slane %v10886_v50, %v8291_v27  ;;  %v3979_v51 = vrot.slane %v3957_v37, %v8291_v27  ;;  %v3986_v34 = vrot.slane %v3958_v3, %v8291_v27 }
 0x394   : >> { %v4233_v61 = vrot.slane %v11872_v42, %v8291_v27  ;;  %v3987_v16 = vcombine.high %v3965_v62, %v3965_v62  ;;  %v3988_v54 = vcombine.high %v3972_v49, %v3972_v49  ;;  %v6357_v41 = vrot.slane %v3965_v62, %v8297_v28 }
 0x395   : >> { %v6373_v8 = vrot.slane %v3972_v49, %v8297_v28  ;;  %v4234_v33 = vcombine.high %v4226_v22, %v4226_v22  ;;  %v3989_v43 = vcombine.high %v3979_v51, %v3979_v51  ;;  %v3990_v36 = vcombine.high %v3986_v34, %v3986_v34 }
 0x396   : >> { %v4235_v45 = vcombine.high %v4233_v61, %v4233_v61  ;;  %v6361_v32 = vrot.slane %v3979_v51, %v8297_v28  ;;  %v6365_v20 = vrot.slane %v3987_v16, %v8297_v28  ;;  %v6377_v50 = vrot.slane %v3986_v34, %v8297_v28 }
 0x397   : >> { %v6381_v17 = vrot.slane %v3988_v54, %v8297_v28  ;;  %v11021_v13 = vsel %vm339_vm10, %v10445_v30, %v6357_v41  ;;  %v11025_v59 = vsel %vm339_vm10, %v10460_v56, %v6373_v8  ;;  %v6369_v29 = vrot.slane %v3989_v43, %v8297_v28  ;;  %v11873_v41 = vld [vmem:[#allocation14_spill] sm:$0xff]  ;;  %v11874_v8 = vld [vmem:[#allocation64_spill] sm:$0xff] }
 0x398   : >> { %v6385_v10 = vrot.slane %v3990_v36, %v8297_v28  ;;  %v11031_v60 = vsel %vm339_vm10, %v10452_v23, %v6361_v32  ;;  %v11035_v35 = vsel %vm339_vm10, %v10456_v38, %v6365_v20  ;;  %v11039_v30 = vsel %vm339_vm10, %v10470_v58, %v6377_v50 }
 0x399   : >> { %v11043_v56 = vsel %vm339_vm10, %v10474_v57, %v6381_v17  ;;  %v4242_v47 = vrot.slane %v4226_v22, %v8291_v27  ;;  %v4249_v19 = vrot.slane %v4233_v61, %v8291_v27  ;;  %v11049_v23 = vsel %vm339_vm10, %v10466_v25, %v6369_v29 }
 0x39a   : >> { %v11053_v38 = vsel %vm339_vm10, %v10480_v21, %v6385_v10  ;;  %v4256_v24 = vrot.slane %v4234_v33, %v8291_v27  ;;  %v4263_v58 = vrot.slane %v4235_v45, %v8291_v27  ;;  %v3629_v33 = vadd.f32 %v11874_v8, %v11873_v41 }
 0x39b   : >> { %v4264_v7 = vcombine.high %v4242_v47, %v4242_v47  ;;  %v4265_v57 = vcombine.high %v4249_v19, %v4249_v19  ;;  %v6517_v2 = vrot.slane %v4242_v47, %v8297_v28  ;;  %v6533_v1 = vrot.slane %v4249_v19, %v8297_v28 }
 0x39c   : >> { %v4266_v63 = vcombine.high %v4256_v24, %v4256_v24  ;;  %v4267_v25 = vcombine.high %v4263_v58, %v4263_v58  ;;  %v6521_v0 = vrot.slane %v4256_v24, %v8297_v28  ;;  %v6537_v21 = vrot.slane %v4263_v58, %v8297_v28 }
 0x39d   : >> { %v6525_v26 = vrot.slane %v4264_v7, %v8297_v28  ;;  %v6541_v31 = vrot.slane %v4265_v57, %v8297_v28  ;;  %v7196_v37 = vsel %vm7187_vm0, %v10790_v46, %v6517_v2  ;;  %v7200_v3 = vsel %vm7187_vm0, %v10796_v55, %v6533_v1  ;;  %v11875_v2 = vld [vmem:[#allocation25_spill] sm:$0xff] }
 0x39e   : >> { %v6529_v62 = vrot.slane %v4266_v63, %v8297_v28  ;;  %v6545_v49 = vrot.slane %v4267_v25, %v8297_v28  ;;  %v7197_v22 = vsel %vm7187_vm0, %v10801_v14, %v6521_v0  ;;  %v7201_v42 = vsel %vm7187_vm0, %v10810_v9, %v6537_v21  ;;  %7262 = vst.msk [vmem:[%s10831_s18 + $0x80] sm:$0xff] %vm7253_vm1, %v7196_v37  ;;  %v11876_v63 = vld [vmem:[#allocation26_spill] sm:$0xff] }
 0x39f   : >> { %7266 = vst.msk [vmem:[%s10831_s18 + $0xc0] sm:$0xff] %vm7253_vm1, %v7200_v3  ;;  %v7198_v55 = vsel %vm7187_vm0, %v10805_v48, %v6525_v26  ;;  %v7202_v46 = vsel %vm7187_vm0, %v10814_v44, %v6541_v31  ;;  %7263 = vst.msk [vmem:[%s10831_s18 + $0x90] sm:$0xff] %vm7253_vm1, %v7197_v22  ;;  %v3858_v14 = vrot.slane %v3844_v18, %v8291_v27  ;;  %v11878_v31 = vld [vmem:[#allocation46_spill] sm:$0xff] }
 0x3a0   : >> { %7267 = vst.msk [vmem:[%s10831_s18 + $0xd0] sm:$0xff] %vm7253_vm1, %v7201_v42  ;;  %v3859_v9 = vcombine.high %v11009_v15, %v11009_v15  ;;  %v7199_v61 = vsel %vm7187_vm0, %v10818_v39, %v6529_v62  ;;  %v7203_v51 = vsel %vm7187_vm0, %v10825_v40, %v6545_v49  ;;  %7264 = vst.msk [vmem:[%s10831_s18 + $0xa0] sm:$0xff] %vm7253_vm1, %v7198_v55  ;;  %v11879_v49 = vld [vmem:[#allocation38_spill] sm:$0xff] }
 0x3a1   : >> { %7268 = vst.msk [vmem:[%s10831_s18 + $0xe0] sm:$0xff] %vm7253_vm1, %v7202_v46  ;;  %v3867_v48 = vrot.slane %v11009_v15, %v8291_v27  ;;  %v3991_v44 = vcombine.high %v10890_v12, %v10890_v12  ;;  %7265 = vst.msk [vmem:[%s10831_s18 + $0xb0] sm:$0xff] %vm7253_vm1, %v7199_v61  ;;  %v3860_v18 = vcombine.high %v3858_v14, %v3858_v14 }
 0x3a2   : >> { %7269 = vst.msk [vmem:[%s10831_s18 + $0xf0] sm:$0xff] %vm7253_vm1, %v7203_v51  ;;  %v3874_v39 = vrot.slane %v3858_v14, %v8291_v27  ;;  %v3881_v34 = vrot.slane %v3859_v9, %v8291_v27  ;;  %v3998_v40 = vrot.slane %v10890_v12, %v8291_v27  ;;  %v3893_v3 = vcombine.high %v3629_v33, %v3629_v33 }
 0x3a3   : >> { %v3889_v16 = vcombine.high %v3867_v48, %v3867_v48  ;;  %v6293_v54 = vrot.slane %v3867_v48, %v8297_v28  ;;  %v4005_v15 = vrot.slane %v3991_v44, %v8291_v27  ;;  %v3888_v45 = vrot.slane %v3860_v18, %v8291_v27 }
 0x3a4   : >> { %v3890_v43 = vcombine.high %v3874_v39, %v3874_v39  ;;  %v3891_v36 = vcombine.high %v3881_v34, %v3881_v34  ;;  %v6297_v32 = vrot.slane %v3881_v34, %v8297_v28  ;;  %v6309_v50 = vrot.slane %v3874_v39, %v8297_v28  ;;  %v11880_v34 = vld [vmem:[#allocation30_spill] sm:$0xff] }
 0x3a5   : >> { %v6301_v20 = vrot.slane %v3889_v16, %v8297_v28  ;;  %v11118_v12 = vsel %vm339_vm10, %v10490_v11, %v6293_v54  ;;  %v4006_v17 = vcombine.high %v3998_v40, %v3998_v40  ;;  %v3892_v29 = vcombine.high %v3888_v45, %v3888_v45  ;;  %v11881_v16 = vld [vmem:[#allocation47_spill] sm:$0xff] }
 0x3a6   : >> { %v6305_v10 = vrot.slane %v3891_v36, %v8297_v28  ;;  %v6313_v47 = vrot.slane %v3888_v45, %v8297_v28  ;;  %v6317_v19 = vrot.slane %v3890_v43, %v8297_v28  ;;  %v11125_v24 = vsel %vm339_vm10, %v10500_v52, %v6297_v32  ;;  %v11877_v52 = vld [vmem:[#allocation32_spill] sm:$0xff]  ;;  %v11884_v43 = vld [vmem:[#allocation53_spill] sm:$0xff] }
 0x3a7   : >> { %v11129_v58 = vsel %vm339_vm10, %v10504_v6, %v6301_v20  ;;  %v11133_v11 = vsel %vm339_vm10, %v10494_v5, %v6309_v50  ;;  %v4007_v7 = vcombine.high %v4005_v15, %v4005_v15  ;;  %v6321_v57 = vrot.slane %v3892_v29, %v8297_v28  ;;  %v11885_v32 = vld [vmem:[#allocation56_spill] sm:$0xff]  ;;  %v11886_v50 = vld [vmem:[#allocation49_spill] sm:$0xff]  ;;  %v11887_v29 = vld [vmem:[#allocation39_spill] sm:$0xff] }
 0x3a8   : >> { %v11138_v1 = vsel %vm339_vm10, %v11875_v2, %v6305_v10  ;;  %v11142_v25 = vsel %vm339_vm10, %v11876_v63, %v6313_v47  ;;  %v11146_v0 = vsel %vm339_vm10, %v11877_v52, %v6317_v19  ;;  %v4014_v6 = vrot.slane %v3998_v40, %v8291_v27  ;;  %v11888_v63 = vld [vmem:[#allocation74_spill] sm:$0xff] }
 0x3a9   : >> { %v4021_v5 = vrot.slane %v4005_v15, %v8291_v27  ;;  %v4028_v21 = vrot.slane %v4006_v17, %v8291_v27  ;;  %v4035_v26 = vrot.slane %v4007_v7, %v8291_v27  ;;  %v11154_v37 = vsel %vm339_vm10, %v11878_v31, %v6321_v57  ;;  %v11882_v15 = vld [vmem:[#allocation48_spill] sm:$0xff] }
 0x3aa   : >> { %v3900_v62 = vrot.slane %v3629_v33, %v8291_v27  ;;  %v4156_v22 = vadd.f32 %v11879_v49, %v11865_v4  ;;  %v4036_v42 = vcombine.high %v4014_v6, %v4014_v6  ;;  %v6389_v9 = vrot.slane %v4014_v6, %v8297_v28  ;;  %v11883_v33 = vld [vmem:[#allocation54_spill] sm:$0xff]  ;;  %v11889_v6 = vld [vmem:[#allocation16_spill] sm:$0xff] }
 0x3ab   : >> { %v4037_v55 = vcombine.high %v4021_v5, %v4021_v5  ;;  %v4038_v46 = vcombine.high %v4028_v21, %v4028_v21  ;;  %v4039_v14 = vcombine.high %v4035_v26, %v4035_v26  ;;  %v6393_v61 = vrot.slane %v4028_v21, %v8297_v28 }
 0x3ac   : >> { %v6405_v51 = vrot.slane %v4021_v5, %v8297_v28  ;;  %v6409_v48 = vrot.slane %v4035_v26, %v8297_v28  ;;  %v6397_v44 = vrot.slane %v4036_v42, %v8297_v28  ;;  %v11169_v40 = vsel %vm339_vm10, %v11880_v34, %v6389_v9  ;;  %v11890_v5 = vld [vmem:[#allocation40_spill] sm:$0xff]  ;;  %v11891_v26 = vld [vmem:[#allocation42_spill] sm:$0xff] }
 0x3ad   : >> { %v6401_v18 = vrot.slane %v4038_v46, %v8297_v28  ;;  %v6413_v39 = vrot.slane %v4037_v55, %v8297_v28  ;;  %v6417_v4 = vrot.slane %v4039_v14, %v8297_v28  ;;  %v11173_v54 = vsel %vm339_vm10, %v11881_v16, %v6393_v61 }
 0x3ae   : >> { %v11177_v8 = vsel %vm339_vm10, %v11882_v15, %v6405_v51  ;;  %v11181_v45 = vsel %vm339_vm10, %v11883_v33, %v6409_v48  ;;  %v11185_v36 = vsel %vm339_vm10, %v11884_v43, %v6397_v44  ;;  %v3907_v47 = vrot.slane %v3893_v3, %v8291_v27  ;;  %v11892_v44 = vld [vmem:[#allocation45_spill] sm:$0xff] }
 0x3af   : >> { %v11189_v20 = vsel %vm339_vm10, %v11885_v32, %v6401_v18  ;;  %v11193_v17 = vsel %vm339_vm10, %v11886_v50, %v6413_v39  ;;  %v11197_v10 = vsel %vm339_vm10, %v11887_v29, %v6417_v4  ;;  %v3908_v19 = vcombine.high %v3900_v62, %v3900_v62  ;;  %v11893_v33 = vld [vmem:[#allocation57_spill] sm:$0xff]  ;;  %v11894_v32 = vld [vmem:[#allocation76_spill] sm:$0xff] }
 0x3b0   : >> { %v3916_v7 = vrot.slane %v3900_v62, %v8291_v27  ;;  %v4464_v57 = vcombine.high %v4156_v22, %v4156_v22  ;;  %v4471_v2 = vrot.slane %v4156_v22, %v8291_v27  ;;  %v4148_v52 = vadd.f32 %v11888_v63, %v11868_v53  ;;  %v11895_v29 = vld [vmem:[#allocation77_spill] sm:$0xff]  ;;  %v11897_v63 = vld [vmem:[#allocation78_spill] sm:$0xff] }
 0x3b1   : >> { %v11206_v21 = vadd.f32 %v11890_v5, %v11889_v6  ;;  %v11210_v31 = vadd.f32 %v11891_v26, %v11873_v41  ;;  %v3909_v49 = vcombine.high %v3907_v47, %v3907_v47  ;;  %v3923_v3 = vrot.slane %v3907_v47, %v8291_v27  ;;  %v11898_v5 = vld [vmem:[#allocation79_spill] sm:$0xff] }
 0x3b2   : >> { %v3930_v42 = vrot.slane %v3908_v19, %v8291_v27  ;;  %v3938_v62 = vcombine.high %v3916_v7, %v3916_v7  ;;  %v6325_v55 = vrot.slane %v3916_v7, %v8297_v28  ;;  %v4478_v22 = vrot.slane %v4464_v57, %v8291_v27  ;;  %v11896_v57 = vld [vmem:[#allocation82_spill] sm:$0xff] }
 0x3b3   : >> { %v4479_v46 = vcombine.high %v4471_v2, %v4471_v2  ;;  %v4487_v53 = vrot.slane %v4471_v2, %v8291_v27  ;;  %v3937_v14 = vrot.slane %v3909_v49, %v8291_v27  ;;  %v3939_v9 = vcombine.high %v3923_v3, %v3923_v3 }
 0x3b4   : >> { %v3940_v61 = vcombine.high %v3930_v42, %v3930_v42  ;;  %v6329_v41 = vrot.slane %v3930_v42, %v8297_v28  ;;  %v6333_v51 = vrot.slane %v3938_v62, %v8297_v28  ;;  %v6341_v48 = vrot.slane %v3923_v3, %v8297_v28 }
 0x3b5   : >> { %v11223_v18 = vsel %vm339_vm10, %v11892_v44, %v6325_v55  ;;  %v4480_v39 = vcombine.high %v4478_v22, %v4478_v22  ;;  %v3941_v4 = vcombine.high %v3937_v14, %v3937_v14  ;;  %v6345_v16 = vrot.slane %v3937_v14, %v8297_v28  ;;  %v11899_v55 = vld [vmem:[#allocation80_spill] sm:$0xff] }
 0x3b6   : >> { %v6337_v34 = vrot.slane %v3940_v61, %v8297_v28  ;;  %v6349_v15 = vrot.slane %v3939_v9, %v8297_v28  ;;  %v11230_v43 = vsel %vm339_vm10, %v11893_v33, %v6329_v41  ;;  %v11234_v50 = vsel %vm339_vm10, %v11894_v32, %v6333_v51 }
 0x3b7   : >> { %v11238_v47 = vsel %vm339_vm10, %v11895_v29, %v6341_v48  ;;  %v4494_v19 = vrot.slane %v4478_v22, %v8291_v27  ;;  %v6353_v7 = vrot.slane %v3941_v4, %v8297_v28  ;;  %v11248_v6 = vsel %vm339_vm10, %v11897_v63, %v6345_v16 }
 0x3b8   : >> { %v11244_v2 = vsel %vm339_vm10, %v11896_v57, %v6337_v34  ;;  %v11252_v26 = vsel %vm339_vm10, %v11898_v5, %v6349_v15  ;;  %v4501_v49 = vrot.slane %v4479_v46, %v8291_v27  ;;  %v4508_v3 = vrot.slane %v4480_v39, %v8291_v27 }
 0x3b9   : >> { %v4509_v42 = vcombine.high %v4487_v53, %v4487_v53  ;;  %v4510_v62 = vcombine.high %v4494_v19, %v4494_v19  ;;  %v11258_v22 = vsel %vm339_vm10, %v11899_v55, %v6353_v7  ;;  %v6677_v14 = vrot.slane %v4487_v53, %v8297_v28 }
 0x3ba   : >> { %v6693_v9 = vrot.slane %v4494_v19, %v8297_v28  ;;  %v4366_v61 = vcombine.high %v4148_v52, %v4148_v52  ;;  %v4511_v41 = vcombine.high %v4501_v49, %v4501_v49  ;;  %v4512_v51 = vcombine.high %v4508_v3, %v4508_v3 }
 0x3bb   : >> { %v6681_v46 = vrot.slane %v4501_v49, %v8297_v28  ;;  %v6685_v48 = vrot.slane %v4509_v42, %v8297_v28  ;;  %v6697_v44 = vrot.slane %v4508_v3, %v8297_v28  ;;  %v6701_v39 = vrot.slane %v4510_v62, %v8297_v28 }
 0x3bc   : >> { %v7236_v4 = vsel %vm7187_vm0, %v11021_v13, %v6677_v14  ;;  %v7240_v53 = vsel %vm7187_vm0, %v11025_v59, %v6693_v9  ;;  %v6689_v34 = vrot.slane %v4511_v41, %v8297_v28  ;;  %v6705_v16 = vrot.slane %v4512_v51, %v8297_v28 }
 0x3bd   : >> { %v7237_v15 = vsel %vm7187_vm0, %v11031_v60, %v6681_v46  ;;  %v7238_v33 = vsel %vm7187_vm0, %v11035_v35, %v6685_v48  ;;  %7302 = vst.msk [vmem:[%s10831_s18 + $0x300] sm:$0xff] %vm7253_vm1, %v7236_v4  ;;  %7306 = vst.msk [vmem:[%s10831_s18 + $0x340] sm:$0xff] %vm7253_vm1, %v7240_v53  ;;  %v7241_v13 = vsel %vm7187_vm0, %v11039_v30, %v6697_v44 }
 0x3be   : >> { %v7242_v59 = vsel %vm7187_vm0, %v11043_v56, %v6701_v39  ;;  %7303 = vst.msk [vmem:[%s10831_s18 + $0x310] sm:$0xff] %vm7253_vm1, %v7237_v15  ;;  %7304 = vst.msk [vmem:[%s10831_s18 + $0x320] sm:$0xff] %vm7253_vm1, %v7238_v33  ;;  %v4373_v60 = vrot.slane %v4148_v52, %v8291_v27  ;;  %v4380_v32 = vrot.slane %v4366_v61, %v8291_v27 }
 0x3bf   : >> { %v7239_v35 = vsel %vm7187_vm0, %v11049_v23, %v6689_v34  ;;  %v7243_v29 = vsel %vm7187_vm0, %v11053_v38, %v6705_v16  ;;  %7307 = vst.msk [vmem:[%s10831_s18 + $0x350] sm:$0xff] %vm7253_vm1, %v7241_v13  ;;  %7308 = vst.msk [vmem:[%s10831_s18 + $0x360] sm:$0xff] %vm7253_vm1, %v7242_v59  ;;  %v4513_v30 = vcombine.high %v11206_v21, %v11206_v21 }
 0x3c0   : >> { %v4520_v56 = vrot.slane %v11206_v21, %v8291_v27  ;;  %7305 = vst.msk [vmem:[%s10831_s18 + $0x330] sm:$0xff] %vm7253_vm1, %v7239_v35  ;;  %7309 = vst.msk [vmem:[%s10831_s18 + $0x370] sm:$0xff] %vm7253_vm1, %v7243_v29  ;;  %v4381_v52 = vcombine.high %v4373_v60, %v4373_v60  ;;  %v4382_v19 = vcombine.high %v4380_v32, %v4380_v32 }
 0x3c1   : >> { %v4389_v23 = vrot.slane %v4373_v60, %v8291_v27  ;;  %v4396_v38 = vrot.slane %v4380_v32, %v8291_v27  ;;  %v4527_v7 = vrot.slane %v4513_v30, %v8291_v27  ;;  %v4415_v5 = vcombine.high %v11210_v31, %v11210_v31 }
 0x3c2   : >> { %v4528_v57 = vcombine.high %v4520_v56, %v4520_v56  ;;  %v4536_v63 = vrot.slane %v4520_v56, %v8291_v27  ;;  %v4403_v21 = vrot.slane %v4381_v52, %v8291_v27  ;;  %v4410_v49 = vrot.slane %v4382_v19, %v8291_v27 }
 0x3c3   : >> { %v4411_v3 = vcombine.high %v4389_v23, %v4389_v23  ;;  %v4412_v42 = vcombine.high %v4396_v38, %v4396_v38  ;;  %v6613_v62 = vrot.slane %v4389_v23, %v8297_v28  ;;  %v6629_v55 = vrot.slane %v4396_v38, %v8297_v28 }
 0x3c4   : >> { %v4529_v14 = vcombine.high %v4527_v7, %v4527_v7  ;;  %v4543_v9 = vrot.slane %v4527_v7, %v8291_v27  ;;  %v4413_v61 = vcombine.high %v4403_v21, %v4403_v21  ;;  %v4414_v41 = vcombine.high %v4410_v49, %v4410_v49 }
 0x3c5   : >> { %v6617_v51 = vrot.slane %v4403_v21, %v8297_v28  ;;  %v6621_v46 = vrot.slane %v4411_v3, %v8297_v28  ;;  %v6633_v48 = vrot.slane %v4410_v49, %v8297_v28  ;;  %v6637_v44 = vrot.slane %v4412_v42, %v8297_v28 }
 0x3c6   : >> { %v7220_v39 = vsel %vm7187_vm0, %v11118_v12, %v6613_v62  ;;  %v7224_v4 = vsel %vm7187_vm0, %v11133_v11, %v6629_v55  ;;  %v6625_v53 = vrot.slane %v4413_v61, %v8297_v28  ;;  %v6641_v34 = vrot.slane %v4414_v41, %v8297_v28 }
 0x3c7   : >> { %v7221_v16 = vsel %vm7187_vm0, %v11125_v24, %v6617_v51  ;;  %v7222_v15 = vsel %vm7187_vm0, %v11129_v58, %v6621_v46  ;;  %7286 = vst.msk [vmem:[%s10831_s18 + $0x200] sm:$0xff] %vm7253_vm1, %v7220_v39  ;;  %7290 = vst.msk [vmem:[%s10831_s18 + $0x240] sm:$0xff] %vm7253_vm1, %v7224_v4  ;;  %v7225_v12 = vsel %vm7187_vm0, %v11142_v25, %v6633_v48 }
 0x3c8   : >> { %v7226_v11 = vsel %vm7187_vm0, %v11146_v0, %v6637_v44  ;;  %7287 = vst.msk [vmem:[%s10831_s18 + $0x210] sm:$0xff] %vm7253_vm1, %v7221_v16  ;;  %7288 = vst.msk [vmem:[%s10831_s18 + $0x220] sm:$0xff] %vm7253_vm1, %v7222_v15  ;;  %v4550_v24 = vrot.slane %v4528_v57, %v8291_v27  ;;  %v4557_v33 = vrot.slane %v4529_v14, %v8291_v27 }
 0x3c9   : >> { %v7223_v58 = vsel %vm7187_vm0, %v11138_v1, %v6625_v53  ;;  %v7227_v13 = vsel %vm7187_vm0, %v11154_v37, %v6641_v34  ;;  %7291 = vst.msk [vmem:[%s10831_s18 + $0x250] sm:$0xff] %vm7253_vm1, %v7225_v12  ;;  %7292 = vst.msk [vmem:[%s10831_s18 + $0x260] sm:$0xff] %vm7253_vm1, %v7226_v11  ;;  %v4558_v25 = vcombine.high %v4536_v63, %v4536_v63 }
 0x3ca   : >> { %v4559_v0 = vcombine.high %v4543_v9, %v4543_v9  ;;  %7289 = vst.msk [vmem:[%s10831_s18 + $0x230] sm:$0xff] %vm7253_vm1, %v7223_v58  ;;  %7293 = vst.msk [vmem:[%s10831_s18 + $0x270] sm:$0xff] %vm7253_vm1, %v7227_v13  ;;  %v4560_v59 = vcombine.high %v4550_v24, %v4550_v24  ;;  %v4561_v60 = vcombine.high %v4557_v33, %v4557_v33 }
 0x3cb   : >> { %v6709_v32 = vrot.slane %v4536_v63, %v8297_v28  ;;  %v6713_v1 = vrot.slane %v4550_v24, %v8297_v28  ;;  %v6717_v37 = vrot.slane %v4558_v25, %v8297_v28  ;;  %v6725_v35 = vrot.slane %v4543_v9, %v8297_v28 }
 0x3cc   : >> { %v6729_v29 = vrot.slane %v4557_v33, %v8297_v28  ;;  %v6733_v30 = vrot.slane %v4559_v0, %v8297_v28  ;;  %v6721_v56 = vrot.slane %v4560_v59, %v8297_v28  ;;  %v6737_v52 = vrot.slane %v4561_v60, %v8297_v28 }
 0x3cd   : >> { %v7244_v19 = vsel %vm7187_vm0, %v11169_v40, %v6709_v32  ;;  %v7245_v23 = vsel %vm7187_vm0, %v11173_v54, %v6713_v1  ;;  %v7246_v38 = vsel %vm7187_vm0, %v11185_v36, %v6717_v37  ;;  %v7248_v7 = vsel %vm7187_vm0, %v11177_v8, %v6725_v35 }
 0x3ce   : >> { %v7249_v57 = vsel %vm7187_vm0, %v11181_v45, %v6729_v29  ;;  %v7250_v63 = vsel %vm7187_vm0, %v11193_v17, %v6733_v30  ;;  %7310 = vst.msk [vmem:[%s10831_s18 + $0x380] sm:$0xff] %vm7253_vm1, %v7244_v19  ;;  %7311 = vst.msk [vmem:[%s10831_s18 + $0x390] sm:$0xff] %vm7253_vm1, %v7245_v23  ;;  %v7247_v40 = vsel %vm7187_vm0, %v11189_v20, %v6721_v56 }
 0x3cf   : >> { %v7251_v54 = vsel %vm7187_vm0, %v11197_v10, %v6737_v52  ;;  %7312 = vst.msk [vmem:[%s10831_s18 + $0x3a0] sm:$0xff] %vm7253_vm1, %v7246_v38  ;;  %7314 = vst.msk [vmem:[%s10831_s18 + $0x3c0] sm:$0xff] %vm7253_vm1, %v7248_v7  ;;  %v4422_v8 = vrot.slane %v11210_v31, %v8291_v27  ;;  %v4429_v45 = vrot.slane %v4415_v5, %v8291_v27 }
 0x3d0   : >> { %7315 = vst.msk [vmem:[%s10831_s18 + $0x3d0] sm:$0xff] %vm7253_vm1, %v7249_v57  ;;  %7316 = vst.msk [vmem:[%s10831_s18 + $0x3e0] sm:$0xff] %vm7253_vm1, %v7250_v63 }
 0x3d1   : >> { %7313 = vst.msk [vmem:[%s10831_s18 + $0x3b0] sm:$0xff] %vm7253_vm1, %v7247_v40  ;;  %7317 = vst.msk [vmem:[%s10831_s18 + $0x3f0] sm:$0xff] %vm7253_vm1, %v7251_v54  ;;  %v4430_v36 = vcombine.high %v4422_v8, %v4422_v8  ;;  %v4431_v20 = vcombine.high %v4429_v45, %v4429_v45  ;;  %v4438_v17 = vrot.slane %v4422_v8, %v8291_v27 }
 0x3d2   : >> { %v4445_v10 = vrot.slane %v4429_v45, %v8291_v27 }
 0x3d3   : >> { %v4452_v21 = vrot.slane %v4430_v36, %v8291_v27  ;;  %v4459_v49 = vrot.slane %v4431_v20, %v8291_v27  ;;  %v4460_v3 = vcombine.high %v4438_v17, %v4438_v17  ;;  %v6645_v31 = vrot.slane %v4438_v17, %v8297_v28 }
 0x3d4   : >> { %v4461_v42 = vcombine.high %v4445_v10, %v4445_v10  ;;  %v6661_v5 = vrot.slane %v4445_v10, %v8297_v28 }
 0x3d5   : >> { %v4462_v62 = vcombine.high %v4452_v21, %v4452_v21  ;;  %v4463_v55 = vcombine.high %v4459_v49, %v4459_v49  ;;  %v6649_v14 = vrot.slane %v4452_v21, %v8297_v28  ;;  %v6653_v9 = vrot.slane %v4460_v3, %v8297_v28  ;;  %256 = sbr.rel (!%p254_p5) target bundleno = 149 (0x95), region = 71 }
 0x3d6   : >> { %v6665_v61 = vrot.slane %v4459_v49, %v8297_v28  ;;  %v6669_v27 = vrot.slane %v4461_v42, %v8297_v28  ;;  %v7228_v41 = vsel %vm7187_vm0, %v11223_v18, %v6645_v31  ;;  %v7232_v51 = vsel %vm7187_vm0, %v11238_v47, %v6661_v5 }
 0x3d7   : >> { %v6657_v46 = vrot.slane %v4462_v62, %v8297_v28  ;;  %v6673_v48 = vrot.slane %v4463_v55, %v8297_v28  ;;  %v7229_v44 = vsel %vm7187_vm0, %v11230_v43, %v6649_v14  ;;  %v7230_v39 = vsel %vm7187_vm0, %v11234_v50, %v6653_v9  ;;  %7294 = vst.msk [vmem:[%s10831_s18 + $0x280] sm:$0xff] %vm7253_vm1, %v7228_v41 }
 0x3d8   : >> { %7298 = vst.msk [vmem:[%s10831_s18 + $0x2c0] sm:$0xff] %vm7253_vm1, %v7232_v51  ;;  %v7233_v18 = vsel %vm7187_vm0, %v11248_v6, %v6665_v61  ;;  %v7234_v47 = vsel %vm7187_vm0, %v11252_v26, %v6669_v27  ;;  %7295 = vst.msk [vmem:[%s10831_s18 + $0x290] sm:$0xff] %vm7253_vm1, %v7229_v44 }
 0x3d9   : >> { %7296 = vst.msk [vmem:[%s10831_s18 + $0x2a0] sm:$0xff] %vm7253_vm1, %v7230_v39  ;;  %v7231_v28 = vsel %vm7187_vm0, %v11244_v2, %v6657_v46  ;;  %v7235_v43 = vsel %vm7187_vm0, %v11258_v22, %v6673_v48  ;;  %7299 = vst.msk [vmem:[%s10831_s18 + $0x2d0] sm:$0xff] %vm7253_vm1, %v7233_v18 }
 0x3da   : >> { %7300 = vst.msk [vmem:[%s10831_s18 + $0x2e0] sm:$0xff] %vm7253_vm1, %v7234_v47  ;;  %7297 = vst.msk [vmem:[%s10831_s18 + $0x2b0] sm:$0xff] %vm7253_vm1, %v7231_v28 }
 0x3db   : >> { %7301 = vst.msk [vmem:[%s10831_s18 + $0x2f0] sm:$0xff] %vm7253_vm1, %v7235_v43 }
 0x3dc PF: > { %s13_s14 = sadd.s32 1, %s7686_s14   ;;  %s11900_s12 = smov %s7682_s13 }
 0x3dd   : > { %p10_p6 = scmp.ge.s32.totalorder %s13_s14, 4   ;;  %s11901_s13 = smov %s11903_s15 }
 0x3df   :  { %12 = sbr.rel (!%p10_p6) target bundleno = 2 (0x2), region = 82 }

</bundles_post_ra>
